<compile_context>
chip_gen: v6e
topology: v6e:2x2x1
jax: 0.10.0
libtpu: 0.0.40
codegen_flags: <defaults>
</compile_context>

<pallas_src>
import jax
import jax.numpy as jnp
from jax import lax
from jax.experimental import pallas as pl
from jax.experimental.pallas import tpu as pltpu


def _round_up(x, m):
    return ((x + m - 1) // m) * m


# --------------------------------------------------------------------------- #
# Kernel
# --------------------------------------------------------------------------- #
def force_decoder_kernel(x_ref, w1_ref, b1_ref, w2_ref, b2_ref, w3_ref, b3t_ref,
                         o_ref):
    # Activation dtype is carried by the bias dtype (f32 for v5e/accuracy,
    # bf16 for v6e/v7x where the VPU/EUP have a bf16 path).
    act_dtype = b1_ref.dtype

    # lin1 + swish  (bf16 MXU operands, f32 accumulation).
    x = x_ref[...].astype(jnp.bfloat16)  # no-op if the producer already gave bf16
    h = jnp.dot(x, w1_ref[...], preferred_element_type=jnp.float32)
    h = h.astype(act_dtype) + b1_ref[...]
    h = h * jax.nn.sigmoid(h)

    # lin2 + swish
    h = jnp.dot(h.astype(jnp.bfloat16), w2_ref[...],
                preferred_element_type=jnp.float32)
    h = h.astype(act_dtype) + b2_ref[...]
    h = h * jax.nn.sigmoid(h)

    # lin3, emitted lane-dense as [3, tile_n]:
    #   y[o, n] = sum_k w3[k, o] * h[n, k]   (== (h @ w3).T, no explicit transpose)
    y = lax.dot_general(w3_ref[...], h.astype(jnp.bfloat16),
                        dimension_numbers=(((0,), (1,)), ((), ())),
                        preferred_element_type=jnp.float32)
    o_ref[...] = (y + b3t_ref[...]).astype(o_ref.dtype)


# --------------------------------------------------------------------------- #
# Wrapper
# --------------------------------------------------------------------------- #
def _select_tile_n(n, tile_n):
    tile_n = max(128, _round_up(tile_n, 128))
    # Never allocate a tile larger than the (rounded-up) problem.
    tile_n = min(tile_n, _round_up(n, 128))
    # Prefer >= 2 grid steps so v7x can shard atoms across both TensorCores;
    # the extra ~0.35 us per step is negligible on single-TC chips.
    if n > 2 * 128 and pl.cdiv(n, tile_n) < 2:
        tile_n = _round_up(pl.cdiv(n, 2), 128)
    return tile_n


def _force_decoder_xla(x, w1, b1, w2, b2, w3, b3, act_dtype=jnp.float32):
    """Plain-XLA path emulating the kernel's math (bf16 operands, f32 accum)."""
    bf = jnp.bfloat16
    h = jnp.dot(x.astype(bf), w1.astype(bf), preferred_element_type=jnp.float32)
    h = h.astype(act_dtype) + b1.astype(act_dtype)
    h = h * jax.nn.sigmoid(h)
    h = jnp.dot(h.astype(bf), w2.astype(bf), preferred_element_type=jnp.float32)
    h = h.astype(act_dtype) + b2.astype(act_dtype)
    h = h * jax.nn.sigmoid(h)
    y = jnp.dot(h.astype(bf), w3.astype(bf), preferred_element_type=jnp.float32)
    return (y + b3).astype(jnp.float32)


def force_decoder(x, w1, b1, w2, b2, w3, b3, *, tile_n=4096,
                  bf16_activations=False, lane_dense_output=False,
                  min_pallas_n=512):
    """Pallas ForceDecoder forward.

    x:  [N, C_in] f32 or bf16 (pass bf16 from the producer to halve HBM traffic)
    w1: [C_in, H], b1: [1, H]
    w2: [H, H],    b2: [1, H]
    w3: [H, 3],    b3: [1, 3]
    Returns [N, 3] f32 (or [3, N] f32 if lane_dense_output=True, which avoids
    the wrapper-side transpose when the consumer can take that layout).

    bf16_activations=True runs the bias-add + swish in bf16 (v6e/v7x); keep the
    default f32 path on v5e or when force precision matters.
    """
    n, c_in = x.shape
    hid = w1.shape[1]
    n_out = w3.shape[1]  # 3
    act_dtype = jnp.bfloat16 if bf16_activations else jnp.float32

    # Small-N fast path: pallas_call launch + per-step overhead dominates for a
    # handful of atoms; plain XLA is faster and numerically equivalent.
    if n < min_pallas_n:
        out = _force_decoder_xla(x, w1, b1, w2, b2, w3, b3, act_dtype=act_dtype)
        return out.T if lane_dense_output else out

    tile_n = _select_tile_n(n, tile_n)
    grid = (pl.cdiv(n, tile_n),)

    # MXU-native bf16 weights (cast once, stay VMEM-resident across grid steps).
    w1b = w1.astype(jnp.bfloat16)
    w2b = w2.astype(jnp.bfloat16)
    w3b = w3.astype(jnp.bfloat16)
    # Biases in the activation dtype; b3 transposed to (3, 1) so it broadcasts
    # against the lane-dense [3, tile_n] result (tiny, done once).
    b1c = b1.astype(act_dtype)
    b2c = b2.astype(act_dtype)
    b3t = jnp.transpose(b3).astype(jnp.float32)

    const = lambda i: (0, 0)  # weights/biases: same block every step (resident)

    # Advisory cost estimate (flops / transcendentals / bytes).
    n_rows = grid[0] * tile_n
    flops = 2 * n_rows * (c_in * hid + hid * hid + hid * n_out)
    transcendentals = 4 * n_rows * hid  # sigmoid ~ exp + reciprocal, two layers
    x_bytes = jnp.dtype(x.dtype).itemsize
    bytes_accessed = (n * c_in * x_bytes                       # x read
                      + n * n_out * 4                          # output write
                      + (c_in * hid + hid * hid + hid * n_out) * 2  # bf16 weights
                      + (2 * hid + n_out) * 4)                 # biases

    # Scoped-VMEM budget: double-buffered x/out tiles + resident weights + a few
    # live [tile_n, hid] activation temporaries (accumulators are f32). Cap at
    # 64 MiB so we never exceed v7x's physical VMEM; floor at 32 MiB so large
    # tiles don't trip v5e's 16 MiB default scoped limit.
    vmem_est = (2 * tile_n * c_in * x_bytes
                + 2 * n_out * tile_n * 4
                + 2 * (c_in * hid + hid * hid + hid * n_out) * 2
                + 2 * (2 * hid + n_out) * 4
                + 4 * tile_n * hid * 4)
    vmem_limit = int(min(64 * 1024 * 1024,
                         max(32 * 1024 * 1024, int(vmem_est * 1.5))))

    out_t = pl.pallas_call(
        force_decoder_kernel,
        out_shape=jax.ShapeDtypeStruct((n_out, n), jnp.float32),
        grid=grid,
        in_specs=[
            pl.BlockSpec((tile_n, c_in), lambda i: (i, 0)),  # x tile (pipelined)
            pl.BlockSpec((c_in, hid), const),                # w1
            pl.BlockSpec((1, hid), const),                   # b1
            pl.BlockSpec((hid, hid), const),                 # w2
            pl.BlockSpec((1, hid), const),                   # b2
            pl.BlockSpec((hid, n_out), const),               # w3
            pl.BlockSpec((n_out, 1), const),                 # b3^T
        ],
        out_specs=pl.BlockSpec((n_out, tile_n), lambda i: (0, i)),  # lane-dense
        # TODO(synk): on v7x, confirm in the profile that the atom axis shards
        # across both TensorCores; if one TC idles, switch to pltpu.CORE_PARALLEL.
        compiler_params=pltpu.CompilerParams(
            dimension_semantics=("parallel",),
            vmem_limit_bytes=vmem_limit),
        cost_estimate=pl.CostEstimate(
            flops=int(flops),
            transcendentals=int(transcendentals),
            bytes_accessed=int(bytes_accessed)),
    )(x, w1b, b1c, w2b, b2c, w3b, b3t)

    if lane_dense_output:
        return out_t                      # (3, N): no transpose, no slicing
    return out_t.T                        # (N, 3): module-native layout


# --------------------------------------------------------------------------- #
# References
# --------------------------------------------------------------------------- #
def force_decoder_ref_f32(x, w1, b1, w2, b2, w3, b3):
    """Pure-f32 JAX reference (PyTorch module semantics)."""
    h = x.astype(jnp.float32) @ w1 + b1
    h = h * jax.nn.sigmoid(h)
    h = h @ w2 + b2
    h = h * jax.nn.sigmoid(h)
    return h @ w3 + b3


# --------------------------------------------------------------------------- #
# Self-test
# --------------------------------------------------------------------------- #
if __name__ == "__main__":
    key = jax.random.PRNGKey(0)
    C_IN, HID = 32, 128  # module defaults: input_channels=32, hidden_channels=128

    k = jax.random.split(key, 7)
    # Deterministic parameter init (fan-in scaled normal), shapes [in, out].
    w1 = jax.random.normal(k[1], (C_IN, HID), dtype=jnp.float32) / jnp.sqrt(C_IN)
    b1 = jax.random.normal(k[2], (1, HID), dtype=jnp.float32) * 0.01
    w2 = jax.random.normal(k[3], (HID, HID), dtype=jnp.float32) / jnp.sqrt(HID)
    b2 = jax.random.normal(k[4], (1, HID), dtype=jnp.float32) * 0.01
    w3 = jax.random.normal(k[5], (HID, 3), dtype=jnp.float32) / jnp.sqrt(HID)
    b3 = jax.random.normal(k[6], (1, 3), dtype=jnp.float32) * 0.01

    # (a) Pallas path: ragged N (not a multiple of 128) -> 2 grid steps, the
    #     second a partial tile; no wrapper padding anywhere.
    N = 2000
    x = jax.random.normal(k[0], (N, C_IN), dtype=jnp.float32)

    out = jax.block_until_ready(force_decoder(x, w1, b1, w2, b2, w3, b3))
    assert out.shape == (N, 3)

    ref_kernel = _force_decoder_xla(x, w1, b1, w2, b2, w3, b3,
                                    act_dtype=jnp.float32)
    assert jnp.allclose(out, ref_kernel, atol=1e-4, rtol=1e-4), \
        "mismatch vs bf16-operand emulated reference"

    ref_f32 = force_decoder_ref_f32(x, w1, b1, w2, b2, w3, b3)
    assert jnp.allclose(out, ref_f32, atol=5e-2, rtol=5e-2), \
        "mismatch vs f32 reference beyond bf16 tolerance"

    # (b) bf16-activation variant (v6e/v7x bias-add + swish in bf16).
    out_bf = jax.block_until_ready(
        force_decoder(x, w1, b1, w2, b2, w3, b3, bf16_activations=True))
    ref_bf = _force_decoder_xla(x, w1, b1, w2, b2, w3, b3,
                                act_dtype=jnp.bfloat16)
    assert out_bf.shape == (N, 3)
    assert jnp.all(jnp.isfinite(out_bf))
    assert jnp.allclose(out_bf, ref_bf, atol=5e-2, rtol=5e-2), \
        "bf16-activation path mismatch vs emulated reference"

    # (c) Lane-dense output: skips the wrapper transpose entirely.
    out_ld = jax.block_until_ready(
        force_decoder(x, w1, b1, w2, b2, w3, b3, lane_dense_output=True))
    assert out_ld.shape == (3, N)
    assert jnp.allclose(out_ld.T, out, atol=1e-6, rtol=0)

    # (d) Small-N fast path (XLA dispatch below min_pallas_n atoms).
    xs = jax.random.normal(k[0], (8, C_IN), dtype=jnp.float32)
    outs = jax.block_until_ready(force_decoder(xs, w1, b1, w2, b2, w3, b3))
    assert outs.shape == (8, 3)
    assert jnp.allclose(outs,
                        _force_decoder_xla(xs, w1, b1, w2, b2, w3, b3),
                        atol=1e-4, rtol=1e-4)

    print("KERNEL_OK")
</pallas_src>

<mosaic_0001>
module attributes {stable_mosaic.version = 11 : i64} {
  func.func @force_decoder_kernel(%arg0: i32, %arg1: memref<1024x32xf32, #tpu.memory_space<vmem>>, %arg2: memref<32x128xbf16, #tpu.memory_space<vmem>>, %arg3: memref<1x128xf32, #tpu.memory_space<vmem>>, %arg4: memref<128x128xbf16, #tpu.memory_space<vmem>>, %arg5: memref<1x128xf32, #tpu.memory_space<vmem>>, %arg6: memref<128x3xbf16, #tpu.memory_space<vmem>>, %arg7: memref<3x1xf32, #tpu.memory_space<vmem>>, %arg8: memref<3x1024xf32, #tpu.memory_space<vmem>>) attributes {dimension_semantics = [#tpu.dimension_semantics<parallel>], iteration_bounds = array<i64: 2>, scalar_prefetch = 0 : i64, scratch_operands = 0 : i64, tpu.core_type = #tpu.core_type<tc>, window_params = [{transform_indices = @transform_0, window_bounds = array<i64: 1024, 32>}, {pipeline_mode = #tpu.pipeline_mode<synchronous>, transform_indices = @transform_1, window_bounds = array<i64: 32, 128>}, {pipeline_mode = #tpu.pipeline_mode<synchronous>, transform_indices = @transform_2, window_bounds = array<i64: 1, 128>}, {pipeline_mode = #tpu.pipeline_mode<synchronous>, transform_indices = @transform_3, window_bounds = array<i64: 128, 128>}, {pipeline_mode = #tpu.pipeline_mode<synchronous>, transform_indices = @transform_4, window_bounds = array<i64: 1, 128>}, {pipeline_mode = #tpu.pipeline_mode<synchronous>, transform_indices = @transform_5, window_bounds = array<i64: 128, 3>}, {pipeline_mode = #tpu.pipeline_mode<synchronous>, transform_indices = @transform_6, window_bounds = array<i64: 3, 1>}, {transform_indices = @transform_7, window_bounds = array<i64: 3, 1024>}]} {
    %c0 = arith.constant 0 : index
    %c0_0 = arith.constant 0 : index
    %0 = vector.load %arg1[%c0, %c0_0] : memref<1024x32xf32, #tpu.memory_space<vmem>>, vector<1024x32xf32>
    %1 = arith.truncf %0 : vector<1024x32xf32> to vector<1024x32xbf16>
    %c0_1 = arith.constant 0 : index
    %c0_2 = arith.constant 0 : index
    %2 = vector.load %arg2[%c0_1, %c0_2] : memref<32x128xbf16, #tpu.memory_space<vmem>>, vector<32x128xbf16>
    %cst = arith.constant dense<0.000000e+00> : vector<1024x128xf32>
    %3 = tpu.matmul %1, %2, %cst {dimension_numbers = #tpu.dot_dimension_numbers<[1], [0], [0], [1], [0, 0, 1, 1], [], []>} : vector<1024x32xbf16>, vector<32x128xbf16>, vector<1024x128xf32> -> vector<1024x128xf32>
    %c0_3 = arith.constant 0 : index
    %c0_4 = arith.constant 0 : index
    %4 = vector.load %arg3[%c0_3, %c0_4] : memref<1x128xf32, #tpu.memory_space<vmem>>, vector<1x128xf32>
    %5 = vector.broadcast %4 : vector<1x128xf32> to vector<1024x128xf32>
    %6 = arith.addf %3, %5 : vector<1024x128xf32>
    %7 = arith.negf %6 : vector<1024x128xf32>
    %8 = math.exp %7 : vector<1024x128xf32>
    %cst_5 = arith.constant 1.000000e+00 : f32
    %9 = vector.broadcast %cst_5 : f32 to vector<1024x128xf32>
    %10 = arith.addf %9, %8 : vector<1024x128xf32>
    %11 = arith.divf %9, %10 : vector<1024x128xf32>
    %12 = arith.mulf %6, %11 : vector<1024x128xf32>
    %13 = arith.truncf %12 : vector<1024x128xf32> to vector<1024x128xbf16>
    %c0_6 = arith.constant 0 : index
    %c0_7 = arith.constant 0 : index
    %14 = vector.load %arg4[%c0_6, %c0_7] : memref<128x128xbf16, #tpu.memory_space<vmem>>, vector<128x128xbf16>
    %cst_8 = arith.constant dense<0.000000e+00> : vector<1024x128xf32>
    %15 = tpu.matmul %13, %14, %cst_8 {dimension_numbers = #tpu.dot_dimension_numbers<[1], [0], [0], [1], [0, 0, 1, 1], [], []>} : vector<1024x128xbf16>, vector<128x128xbf16>, vector<1024x128xf32> -> vector<1024x128xf32>
    %c0_9 = arith.constant 0 : index
    %c0_10 = arith.constant 0 : index
    %16 = vector.load %arg5[%c0_9, %c0_10] : memref<1x128xf32, #tpu.memory_space<vmem>>, vector<1x128xf32>
    %17 = vector.broadcast %16 : vector<1x128xf32> to vector<1024x128xf32>
    %18 = arith.addf %15, %17 : vector<1024x128xf32>
    %19 = arith.negf %18 : vector<1024x128xf32>
    %20 = math.exp %19 : vector<1024x128xf32>
    %cst_11 = arith.constant 1.000000e+00 : f32
    %21 = vector.broadcast %cst_11 : f32 to vector<1024x128xf32>
    %22 = arith.addf %21, %20 : vector<1024x128xf32>
    %23 = arith.divf %21, %22 : vector<1024x128xf32>
    %24 = arith.mulf %18, %23 : vector<1024x128xf32>
    %c0_12 = arith.constant 0 : index
    %c0_13 = arith.constant 0 : index
    %25 = vector.load %arg6[%c0_12, %c0_13] : memref<128x3xbf16, #tpu.memory_space<vmem>>, vector<128x3xbf16>
    %26 = arith.truncf %24 : vector<1024x128xf32> to vector<1024x128xbf16>
    %cst_14 = arith.constant dense<0.000000e+00> : vector<3x1024xf32>
    %27 = tpu.matmul %25, %26, %cst_14 {dimension_numbers = #tpu.dot_dimension_numbers<[0], [1], [1], [0], [0, 1, 1, 0], [], []>} : vector<128x3xbf16>, vector<1024x128xbf16>, vector<3x1024xf32> -> vector<3x1024xf32>
    %c0_15 = arith.constant 0 : index
    %c0_16 = arith.constant 0 : index
    %28 = vector.load %arg7[%c0_15, %c0_16] : memref<3x1xf32, #tpu.memory_space<vmem>>, vector<3x1xf32>
    %29 = vector.broadcast %28 : vector<3x1xf32> to vector<3x1024xf32>
    %30 = arith.addf %27, %29 : vector<3x1024xf32>
    %c0_17 = arith.constant 0 : index
    %c0_18 = arith.constant 0 : index
    %31 = vector.load %arg8[%c0_17, %c0_18] : memref<3x1024xf32, #tpu.memory_space<vmem>>, vector<3x1024xf32>
    tpu.vector_store %arg8[%c0_17, %c0_18], %30 {strides = array<i32>} : memref<3x1024xf32, #tpu.memory_space<vmem>>, vector<3x1024xf32>,
    return
  }
  func.func @transform_0(%arg0: i32) -> (i32, i32) {
    %c0_i32 = arith.constant 0 : i32
    %c0_i32_0 = arith.constant 0 : i32
    return %arg0, %c0_i32 : i32, i32
  }
  func.func @transform_1(%arg0: i32) -> (i32, i32) {
    %c0_i32 = arith.constant 0 : i32
    %c0_i32_0 = arith.constant 0 : i32
    %c0_i32_1 = arith.constant 0 : i32
    return %c0_i32, %c0_i32_0 : i32, i32
  }
  func.func @transform_2(%arg0: i32) -> (i32, i32) {
    %c0_i32 = arith.constant 0 : i32
    %c0_i32_0 = arith.constant 0 : i32
    %c0_i32_1 = arith.constant 0 : i32
    return %c0_i32, %c0_i32_0 : i32, i32
  }
  func.func @transform_3(%arg0: i32) -> (i32, i32) {
    %c0_i32 = arith.constant 0 : i32
    %c0_i32_0 = arith.constant 0 : i32
    %c0_i32_1 = arith.constant 0 : i32
    return %c0_i32, %c0_i32_0 : i32, i32
  }
  func.func @transform_4(%arg0: i32) -> (i32, i32) {
    %c0_i32 = arith.constant 0 : i32
    %c0_i32_0 = arith.constant 0 : i32
    %c0_i32_1 = arith.constant 0 : i32
    return %c0_i32, %c0_i32_0 : i32, i32
  }
  func.func @transform_5(%arg0: i32) -> (i32, i32) {
    %c0_i32 = arith.constant 0 : i32
    %c0_i32_0 = arith.constant 0 : i32
    %c0_i32_1 = arith.constant 0 : i32
    return %c0_i32, %c0_i32_0 : i32, i32
  }
  func.func @transform_6(%arg0: i32) -> (i32, i32) {
    %c0_i32 = arith.constant 0 : i32
    %c0_i32_0 = arith.constant 0 : i32
    %c0_i32_1 = arith.constant 0 : i32
    return %c0_i32, %c0_i32_0 : i32, i32
  }
  func.func @transform_7(%arg0: i32) -> (i32, i32) {
    %c0_i32 = arith.constant 0 : i32
    %c0_i32_0 = arith.constant 0 : i32
    return %c0_i32, %arg0 : i32, i32
  }
}

</mosaic_0001>

<bundles_post_ra>
// kernel: tpu_custom_call.1
= control target key start
LH: loop header
LB: loop body
LE: loop exit
PB: predicated region body
PF: predicated region fallthrough
CT: control target
= control target key end

     0   :  { %12 = vsyncpa [#allocation3], 0  ;;  %s8447_s0 = inlined_call_operand.vmem [shape: f32[2000,32], index: 0, kind: input, shape index: {}]   ;;  %s8448_s1 = inlined_call_operand.vmem [shape: bf16[32,128], index: 1, kind: input, shape index: {}]   ;;  %s8449_s2 = inlined_call_operand.vmem [shape: f32[1,128], index: 2, kind: input, shape index: {}]   ;;  %s8450_s3 = inlined_call_operand.vmem [shape: bf16[128,128], index: 3, kind: input, shape index: {}]   ;;  %s8451_s4 = inlined_call_operand.vmem [shape: f32[1,128], index: 4, kind: input, shape index: {}]   ;;  %s8452_s5 = inlined_call_operand.vmem [shape: bf16[128,3], index: 5, kind: input, shape index: {}]   ;;  %s8453_s6 = inlined_call_operand.vmem [shape: f32[3,1], index: 6, kind: input, shape index: {}]   ;;  %s8454_s7 = inlined_call_operand.hbm [shape: f32[3,2000], index: 7, kind: output, shape index: {}]  }
   0x1   :  { %14 = vsyncpa [#allocation3 + $0x1], 0  ;;  %s6165_s24 = smov 0   ;;  %s6167_s25 = smov 0  }
   0x2   :  { %s6169_s26 = smov 0   ;;  %s6171_s27 = smov 0  }
   0x3 LB: > { %s6186_s28 = sadd.s32 4294967295, %s6121_s27   ;;  %s4134_s29 = sadd.s32 4294967294, %s6121_s27   ;;  %s6121_s27 = sphi %s6171_s27, %s8644_s27   ;;  %s6117_s26 = sphi %s6169_s26, %s8643_s26   ;;  %s6113_s25 = sphi %s6167_s25, %s8642_s25   ;;  %s6109_s24 = sphi %s6165_s24, %s8641_s24  }
   0x4   : > { %s6190_s30 = sadd.s32 1, %s6121_s27   ;;  %s179_s8 = sadd.s32 1, %s6117_s26 }
   0x5   : > { %s176_s9 = ssub.s32 %s6121_s27, %s6190_s30  ;;  %p189_p0 = scmp.ne.s32.totalorder %s6117_s26, %s6113_s25 }
   0x6   : > { %p177_p1 = scmp.eq.s32.totalorder %s176_s9, 0  ;;  %p190_p2 = scmp.eq.s32.totalorder %s6186_s28, 1 }
   0x7   : > { %p195_p3 = scmp.ne.s32.totalorder %s6113_s25, %s6109_s24  ;;  %p196_p4 = scmp.eq.s32.totalorder %s4134_s29, 1 }
   0x8   : > { %s6201_s10 = scalar_select %p177_p1, %s6117_s26, %s179_s8  }
   0x9   : > { %p6203_p5 = por %p190_p2, %p189_p0  ;;  %p6207_p6 = por %p196_p4, %p195_p3 }
   0xa   : > { %p4137_p7 = scmp.ge.s32.totalorder %s6121_s27, 1  ;;  %p249_p8 = scmp.lt.s32.totalorder %s6121_s27, 3 }
   0xc   : > { %p250_p9 = pnand %p4137_p7, %p249_p8 }
   0xe   : > { %253 = sbr.rel (%p250_p9) target bundleno = 1042 (0x412), region = 48 }
  0x13   : > { %v5015_v0 = vld [vmem:[%s8448_s1 + $0x8] sm:$0xff]   ;;  %s4139_s15 = sshll.u32 %s6186_s28, 7  ;;  %v5016_v1 = vld [vmem:[%s8448_s1] sm:$0xff]   ;;  %vm516_vm0 = vcmask 261120  }
  0x14   : > { %p290_p10 = scmp.lt.s32.totalorder %s4139_s15, 249  ;;  %4697 = vmatprep.subr.bf16.mxu0 %v5015_v0 }
  0x15   : > { %4698 = vmatpush3.bf16.msra.mxu0 %v5015_v0 }
  0x16   : > { %s8646_s15 = smov (!%p290_p10, %s4139_s15), 249  ;;  %4699 = vmatprep.subr.bf16.mxu0 %v5016_v1 }
  0x17   : > { %s4140_s18 = sshll.u32 %s8646_s15, 3  ;;  %s4486_s15 = sshll.u32 %s6186_s28, 9 }
  0x18   : > { %s6223_s21 = scalar_lea.vmem %s8447_s0, %s4140_s18  ;;  %s8410_s19 = scalar_lea.hbm %s8454_s7, %s4486_s15 }
  0x19   : > { %4700 = vmatpush3.bf16.msra.mxu0 %v5016_v1  ;;  %v301_v2 = vld [vmem:[%s6223_s21] sm:$0xff]  ;;  %v302_v3 = vld [vmem:[%s6223_s21 + $0x8] sm:$0xff]  ;;  %v303_v4 = vld [vmem:[%s6223_s21 + $0x10] sm:$0xff]  ;;  %s6124_s28 = smov [#allocation2]  }
  0x1a   : > { %v429_v5 = vpack.c.bf16 %v302_v3, %v301_v2  ;;  %v304_v6 = vld [vmem:[%s6223_s21 + $0x18] sm:$0xff]  ;;  %v305_v7 = vld [vmem:[%s6223_s21 + $0x20] sm:$0xff]  ;;  %v306_v8 = vld [vmem:[%s6223_s21 + $0x28] sm:$0xff]  ;;  %s6065_s23 = sshll.u32 %s6124_s28, 4  ;;  %s6066_s23 = int_to_ptr.vmem [resolvable:$false] %s6065_s23 }
  0x1b   : > { %v430_v9 = vpack.c.bf16 %v304_v6, %v303_v4  ;;  %v431_v10 = vpack.c.bf16 %v306_v8, %v305_v7  ;;  %v307_v11 = vld [vmem:[%s6223_s21 + $0x30] sm:$0xff]  ;;  %v308_v12 = vld [vmem:[%s6223_s21 + $0x38] sm:$0xff]  ;;  %v309_v13 = vld [vmem:[%s6223_s21 + $0x40] sm:$0xff]  ;;  %s6067_s29 = scalar_lea.vmem %s6066_s23, 1024 }
  0x1c   : > { %4701 = vmatprep.mubr.msk.bf16.mxu0 %vm516_vm0, %v429_v5  ;;  %v310_v14 = vld [vmem:[%s6223_s21 + $0x48] sm:$0xff]  ;;  %v432_v15 = vpack.c.bf16 %v308_v12, %v307_v11  ;;  %v311_v17 = vld [vmem:[%s6223_s21 + $0x50] sm:$0xff]  ;;  %v312_v18 = vld [vmem:[%s6223_s21 + $0x58] sm:$0xff] }
  0x1d   : > { %4702 = vmatmul.mubr.msk.bf16.vlgmr.msra.gmra.mxu0 %vm516_vm0, %v430_v9  ;;  %v433_v16 = vpack.c.bf16 %v310_v14, %v309_v13  ;;  %v313_v19 = vld [vmem:[%s6223_s21 + $0x60] sm:$0xff]  ;;  %v314_v20 = vld [vmem:[%s6223_s21 + $0x68] sm:$0xff]  ;;  %v434_v21 = vpack.c.bf16 %v312_v18, %v311_v17  ;;  %v315_v23 = vld [vmem:[%s6223_s21 + $0x70] sm:$0xff] }
  0x1e   : > { %4705 = vmatprep.mubr.msk.bf16.mxu0 %vm516_vm0, %v431_v10  ;;  %v435_v22 = vpack.c.bf16 %v314_v20, %v313_v19  ;;  %v316_v24 = vld [vmem:[%s6223_s21 + $0x78] sm:$0xff]  ;;  %v317_v25 = vld [vmem:[%s6223_s21 + $0x80] sm:$0xff]  ;;  %v318_v26 = vld [vmem:[%s6223_s21 + $0x88] sm:$0xff] }
  0x1f   : > { %v436_v27 = vpack.c.bf16 %v316_v24, %v315_v23  ;;  %v437_v28 = vpack.c.bf16 %v318_v26, %v317_v25  ;;  %v319_v29 = vld [vmem:[%s6223_s21 + $0x90] sm:$0xff]  ;;  %v320_v30 = vld [vmem:[%s6223_s21 + $0x98] sm:$0xff]  ;;  %v321_v31 = vld [vmem:[%s6223_s21 + $0xa0] sm:$0xff] }
  0x20   : > { %v322_v32 = vld [vmem:[%s6223_s21 + $0xa8] sm:$0xff]  ;;  %v438_v33 = vpack.c.bf16 %v320_v30, %v319_v29  ;;  %v323_v35 = vld [vmem:[%s6223_s21 + $0xb0] sm:$0xff]  ;;  %v324_v36 = vld [vmem:[%s6223_s21 + $0xb8] sm:$0xff] }
  0x21   : > { %v439_v34 = vpack.c.bf16 %v322_v32, %v321_v31  ;;  %v325_v37 = vld [vmem:[%s6223_s21 + $0xc0] sm:$0xff]  ;;  %v326_v38 = vld [vmem:[%s6223_s21 + $0xc8] sm:$0xff]  ;;  %v440_v39 = vpack.c.bf16 %v324_v36, %v323_v35  ;;  %v327_v41 = vld [vmem:[%s6223_s21 + $0xd0] sm:$0xff] }
  0x22   : > { %v441_v40 = vpack.c.bf16 %v326_v38, %v325_v37  ;;  %v328_v42 = vld [vmem:[%s6223_s21 + $0xd8] sm:$0xff]  ;;  %v329_v43 = vld [vmem:[%s6223_s21 + $0xe0] sm:$0xff]  ;;  %v330_v44 = vld [vmem:[%s6223_s21 + $0xe8] sm:$0xff] }
  0x23   : > { %v442_v45 = vpack.c.bf16 %v328_v42, %v327_v41  ;;  %v443_v46 = vpack.c.bf16 %v330_v44, %v329_v43  ;;  %v331_v47 = vld [vmem:[%s6223_s21 + $0xf0] sm:$0xff]  ;;  %v332_v48 = vld [vmem:[%s6223_s21 + $0xf8] sm:$0xff]  ;;  %v333_v49 = vld [vmem:[%s6223_s21 + $0x100] sm:$0xff] }
  0x24   : > { %v334_v50 = vld [vmem:[%s6223_s21 + $0x108] sm:$0xff]  ;;  %v444_v51 = vpack.c.bf16 %v332_v48, %v331_v47  ;;  %v335_v53 = vld [vmem:[%s6223_s21 + $0x110] sm:$0xff]  ;;  %v336_v54 = vld [vmem:[%s6223_s21 + $0x118] sm:$0xff] }
  0x25   : > { %4706 = vmatmul.mubr.msk.bf16.gmra.mxu0 %vm516_vm0, %v432_v15  ;;  %v445_v52 = vpack.c.bf16 %v334_v50, %v333_v49  ;;  %v337_v55 = vld [vmem:[%s6223_s21 + $0x120] sm:$0xff]  ;;  %v338_v56 = vld [vmem:[%s6223_s21 + $0x128] sm:$0xff]  ;;  %v446_v57 = vpack.c.bf16 %v336_v54, %v335_v53  ;;  %v339_v59 = vld [vmem:[%s6223_s21 + $0x130] sm:$0xff] }
  0x26   : > { %4709 = vmatprep.mubr.msk.bf16.mxu0 %vm516_vm0, %v433_v16  ;;  %v447_v58 = vpack.c.bf16 %v338_v56, %v337_v55  ;;  %v340_v60 = vld [vmem:[%s6223_s21 + $0x138] sm:$0xff]  ;;  %v341_v61 = vld [vmem:[%s6223_s21 + $0x140] sm:$0xff]  ;;  %v342_v62 = vld [vmem:[%s6223_s21 + $0x148] sm:$0xff] }
  0x27   : > { %v448_v63 = vpack.c.bf16 %v340_v60, %v339_v59  ;;  %v449_v0 = vpack.c.bf16 %v342_v62, %v341_v61  ;;  %v343_v1 = vld [vmem:[%s6223_s21 + $0x150] sm:$0xff]  ;;  %v344_v2 = vld [vmem:[%s6223_s21 + $0x158] sm:$0xff]  ;;  %v345_v3 = vld [vmem:[%s6223_s21 + $0x160] sm:$0xff] }
  0x28   : > { %v346_v4 = vld [vmem:[%s6223_s21 + $0x168] sm:$0xff]  ;;  %v450_v5 = vpack.c.bf16 %v344_v2, %v343_v1  ;;  %v5017_v6 = vld [vmem:[%s8450_s3 + $0x38] sm:$0xff]   ;;  %v347_v8 = vld [vmem:[%s6223_s21 + $0x170] sm:$0xff] }
  0x29   : > { %v451_v7 = vpack.c.bf16 %v346_v4, %v345_v3  ;;  %4829 = vmatprep.subr.bf16.mxu1 %v5017_v6  ;;  %v348_v9 = vld [vmem:[%s6223_s21 + $0x178] sm:$0xff]  ;;  %v5018_v10 = vld [vmem:[%s8450_s3 + $0x30] sm:$0xff]   ;;  %v349_v11 = vld [vmem:[%s6223_s21 + $0x180] sm:$0xff] }
  0x2a   : > { %4830 = vmatpush3.bf16.msra.mxu1 %v5017_v6  ;;  %v350_v12 = vld [vmem:[%s6223_s21 + $0x188] sm:$0xff]  ;;  %v452_v13 = vpack.c.bf16 %v348_v9, %v347_v8  ;;  %v351_v16 = vld [vmem:[%s6223_s21 + $0x190] sm:$0xff]  ;;  %v352_v17 = vld [vmem:[%s6223_s21 + $0x198] sm:$0xff] }
  0x2b   : > { %4831 = vmatprep.subr.bf16.mxu1 %v5018_v10  ;;  %v453_v14 = vpack.c.bf16 %v350_v12, %v349_v11  ;;  %v5019_v15 = vld [vmem:[%s8450_s3 + $0x28] sm:$0xff]   ;;  %v5020_v18 = vld [vmem:[%s8450_s3 + $0x20] sm:$0xff]   ;;  %v5021_v23 = vld [vmem:[%s8450_s3 + $0x18] sm:$0xff]  }
  0x2c   : > { %v353_v19 = vld [vmem:[%s6223_s21 + $0x1a0] sm:$0xff]  ;;  %v354_v20 = vld [vmem:[%s6223_s21 + $0x1a8] sm:$0xff]  ;;  %v355_v24 = vld [vmem:[%s6223_s21 + $0x1b0] sm:$0xff] }
  0x2d   : > { %4710 = vmatmul.mubr.msk.bf16.gmra.mxu0 %vm516_vm0, %v434_v21  ;;  %v454_v21 = vpack.c.bf16 %v352_v17, %v351_v16  ;;  %v356_v25 = vld [vmem:[%s6223_s21 + $0x1b8] sm:$0xff]  ;;  %v5022_v26 = vld [vmem:[%s8450_s3 + $0x10] sm:$0xff]   ;;  %v5023_v31 = vld [vmem:[%s8450_s3 + $0x8] sm:$0xff]  }
  0x2e   : > { %4713 = vmatprep.mubr.msk.bf16.mxu0 %vm516_vm0, %v435_v22  ;;  %4832 = vmatpush3.bf16.msra.mxu1 %v5018_v10  ;;  %v455_v22 = vpack.c.bf16 %v354_v20, %v353_v19  ;;  %v456_v29 = vpack.c.bf16 %v356_v25, %v355_v24  ;;  %v359_v32 = vld [vmem:[%s6223_s21 + $0x1d0] sm:$0xff]  ;;  %v361_v35 = vld [vmem:[%s6223_s21 + $0x1e0] sm:$0xff]  ;;  %v362_v36 = vld [vmem:[%s6223_s21 + $0x1e8] sm:$0xff] }
  0x2f   : > { %4833 = vmatprep.subr.bf16.mxu1 %v5019_v15  ;;  %v459_v38 = vpack.c.bf16 %v362_v36, %v361_v35  ;;  %v365_v41 = vld [vmem:[%s6223_s21 + $0x200] sm:$0xff]  ;;  %v366_v42 = vld [vmem:[%s6223_s21 + $0x208] sm:$0xff]  ;;  %v384_v6 = vld [vmem:[%s6223_s21 + $0x298] sm:$0xff] }
  0x30   : > { %v461_v44 = vpack.c.bf16 %v366_v42, %v365_v41  ;;  %v369_v47 = vld [vmem:[%s6223_s21 + $0x220] sm:$0xff]  ;;  %v370_v48 = vld [vmem:[%s6223_s21 + $0x228] sm:$0xff]  ;;  %v387_v11 = vld [vmem:[%s6223_s21 + $0x2b0] sm:$0xff] }
  0x31   : > { %v463_v50 = vpack.c.bf16 %v370_v48, %v369_v47  ;;  %v373_v53 = vld [vmem:[%s6223_s21 + $0x240] sm:$0xff]  ;;  %v374_v54 = vld [vmem:[%s6223_s21 + $0x248] sm:$0xff]  ;;  %v388_v12 = vld [vmem:[%s6223_s21 + $0x2b8] sm:$0xff] }
  0x32   : > { %4834 = vmatpush3.bf16.msra.mxu1 %v5019_v15  ;;  %v465_v56 = vpack.c.bf16 %v374_v54, %v373_v53  ;;  %v377_v59 = vld [vmem:[%s6223_s21 + $0x260] sm:$0xff]  ;;  %v378_v60 = vld [vmem:[%s6223_s21 + $0x268] sm:$0xff]  ;;  %v472_v15 = vpack.c.bf16 %v388_v12, %v387_v11  ;;  %v391_v17 = vld [vmem:[%s6223_s21 + $0x2d0] sm:$0xff] }
  0x33   : > { %4835 = vmatprep.subr.bf16.mxu1 %v5020_v18  ;;  %v467_v62 = vpack.c.bf16 %v378_v60, %v377_v59  ;;  %v381_v1 = vld [vmem:[%s6223_s21 + $0x280] sm:$0xff]  ;;  %v382_v2 = vld [vmem:[%s6223_s21 + $0x288] sm:$0xff]  ;;  %v396_v24 = vld [vmem:[%s6223_s21 + $0x2f8] sm:$0xff] }
  0x34   : > { %v469_v4 = vpack.c.bf16 %v382_v2, %v381_v1  ;;  %v386_v8 = vld [vmem:[%s6223_s21 + $0x2a8] sm:$0xff]  ;;  %v393_v19 = vld [vmem:[%s6223_s21 + $0x2e0] sm:$0xff]  ;;  %v412_v11 = vld [vmem:[%s6223_s21 + $0x378] sm:$0xff] }
  0x35   : > { %4714 = vmatmul.mubr.msk.bf16.gmra.mxu0 %vm516_vm0, %v436_v27  ;;  %v357_v27 = vld [vmem:[%s6223_s21 + $0x1c0] sm:$0xff]  ;;  %v394_v20 = vld [vmem:[%s6223_s21 + $0x2e8] sm:$0xff] }
  0x36   : > { %4717 = vmatprep.mubr.msk.bf16.mxu0 %vm516_vm0, %v437_v28  ;;  %4836 = vmatpush3.bf16.msra.mxu1 %v5020_v18  ;;  %v358_v28 = vld [vmem:[%s6223_s21 + $0x1c8] sm:$0xff]  ;;  %v392_v18 = vld [vmem:[%s6223_s21 + $0x2d8] sm:$0xff]  ;;  %v397_v25 = vld [vmem:[%s6223_s21 + $0x300] sm:$0xff] }
  0x37   : > { %4837 = vmatprep.subr.bf16.mxu1 %v5021_v23  ;;  %v457_v30 = vpack.c.bf16 %v358_v28, %v357_v27  ;;  %v6403_v35 = vld [vmem:[%s8449_s2] ss:$0 sm:$0xff]  ;;  %v406_v42 = vld [vmem:[%s6223_s21 + $0x348] sm:$0xff] }
  0x38   : > { %v405_v41 = vld [vmem:[%s6223_s21 + $0x340] sm:$0xff]  ;;  %v410_v60 = vld [vmem:[%s6223_s21 + $0x368] sm:$0xff] }
  0x39   : > { %v409_v59 = vld [vmem:[%s6223_s21 + $0x360] sm:$0xff] }
  0x3a   : > { %4838 = vmatpush3.bf16.msra.mxu1 %v5021_v23  ;;  %v395_v23 = vld [vmem:[%s6223_s21 + $0x2f0] sm:$0xff]  ;;  %v413_v12 = vld [vmem:[%s6223_s21 + $0x380] sm:$0xff] }
  0x3b   : > { %4839 = vmatprep.subr.bf16.mxu1 %v5022_v26  ;;  %v476_v27 = vpack.c.bf16 %v396_v24, %v395_v23 }
  0x3d   : > { %4718 = vmatmul.mubr.msk.bf16.gmra.mxu0 %vm516_vm0, %v438_v33  ;;  %v360_v33 = vld [vmem:[%s6223_s21 + $0x1d8] sm:$0xff] }
  0x3e   : > { %4721 = vmatprep.mubr.msk.bf16.mxu0 %vm516_vm0, %v439_v34  ;;  %4840 = vmatpush3.bf16.msra.mxu1 %v5022_v26  ;;  %v5024_v34 = vld [vmem:[%s8450_s3] sm:$0xff]   ;;  %v458_v37 = vpack.c.bf16 %v360_v33, %v359_v32  ;;  %v398_v26 = vld [vmem:[%s6223_s21 + $0x308] sm:$0xff] }
  0x3f   : > { %4841 = vmatprep.subr.bf16.mxu1 %v5023_v31  ;;  %v477_v28 = vpack.c.bf16 %v398_v26, %v397_v25  ;;  %v402_v32 = vld [vmem:[%s6223_s21 + $0x328] sm:$0xff] }
  0x42   : > { %4842 = vmatpush3.bf16.msra.mxu1 %v5023_v31  ;;  %v401_v31 = vld [vmem:[%s6223_s21 + $0x320] sm:$0xff] }
  0x43   : > { %4843 = vmatprep.subr.bf16.mxu1 %v5024_v34 }
  0x45   : > { %4722 = vmatmul.mubr.msk.bf16.gmra.mxu0 %vm516_vm0, %v440_v39  ;;  %v363_v39 = vld [vmem:[%s6223_s21 + $0x1f0] sm:$0xff] }
  0x46   : > { %4725 = vmatprep.mubr.msk.bf16.mxu0 %vm516_vm0, %v441_v40  ;;  %4844 = vmatpush3.bf16.msra.mxu1 %v5024_v34  ;;  %v364_v40 = vld [vmem:[%s6223_s21 + $0x1f8] sm:$0xff]  ;;  %v479_v34 = vpack.c.bf16 %v402_v32, %v401_v31 }
  0x47   : > { %v460_v43 = vpack.c.bf16 %v364_v40, %v363_v39  ;;  %v404_v39 = vld [vmem:[%s6223_s21 + $0x338] sm:$0xff] }
  0x4d   : > { %4726 = vmatmul.mubr.msk.bf16.gmra.mxu0 %vm516_vm0, %v442_v45  ;;  %v367_v45 = vld [vmem:[%s6223_s21 + $0x210] sm:$0xff] }
  0x4e   : > { %4729 = vmatprep.mubr.msk.bf16.mxu0 %vm516_vm0, %v443_v46  ;;  %v368_v46 = vld [vmem:[%s6223_s21 + $0x218] sm:$0xff] }
  0x4f   : > { %v462_v49 = vpack.c.bf16 %v368_v46, %v367_v45 }
  0x55   : > { %4730 = vmatmul.mubr.msk.bf16.gmra.mxu0 %vm516_vm0, %v444_v51  ;;  %v371_v51 = vld [vmem:[%s6223_s21 + $0x230] sm:$0xff] }
  0x56   : > { %4733 = vmatprep.mubr.msk.bf16.mxu0 %vm516_vm0, %v445_v52  ;;  %v372_v52 = vld [vmem:[%s6223_s21 + $0x238] sm:$0xff] }
  0x57   : > { %v464_v55 = vpack.c.bf16 %v372_v52, %v371_v51 }
  0x5d   : > { %4734 = vmatmul.mubr.msk.bf16.gmra.mxu0 %vm516_vm0, %v446_v57  ;;  %v375_v57 = vld [vmem:[%s6223_s21 + $0x250] sm:$0xff] }
  0x5e   : > { %4737 = vmatprep.mubr.msk.bf16.mxu0 %vm516_vm0, %v447_v58  ;;  %v376_v58 = vld [vmem:[%s6223_s21 + $0x258] sm:$0xff] }
  0x5f   : > { %v466_v61 = vpack.c.bf16 %v376_v58, %v375_v57  ;;  %v408_v57 = vld [vmem:[%s6223_s21 + $0x358] sm:$0xff] }
  0x65   : > { %4738 = vmatmul.mubr.msk.bf16.gmra.mxu0 %vm516_vm0, %v448_v63  ;;  %v379_v63 = vld [vmem:[%s6223_s21 + $0x270] sm:$0xff] }
  0x66   : > { %4741 = vmatprep.mubr.msk.bf16.mxu0 %vm516_vm0, %v449_v0  ;;  %v380_v0 = vld [vmem:[%s6223_s21 + $0x278] sm:$0xff] }
  0x67   : > { %v468_v3 = vpack.c.bf16 %v380_v0, %v379_v63 }
  0x6d   : > { %4742 = vmatmul.mubr.msk.bf16.gmra.mxu0 %vm516_vm0, %v450_v5  ;;  %v383_v5 = vld [vmem:[%s6223_s21 + $0x290] sm:$0xff] }
  0x6e   : > { %4745 = vmatprep.mubr.msk.bf16.mxu0 %vm516_vm0, %v451_v7  ;;  %v385_v7 = vld [vmem:[%s6223_s21 + $0x2a0] sm:$0xff]  ;;  %v470_v9 = vpack.c.bf16 %v384_v6, %v383_v5 }
  0x6f   : > { %v471_v10 = vpack.c.bf16 %v386_v8, %v385_v7  ;;  %v411_v8 = vld [vmem:[%s6223_s21 + $0x370] sm:$0xff] }
  0x75   : > { %4746 = vmatmul.mubr.msk.bf16.gmra.mxu0 %vm516_vm0, %v452_v13  ;;  %v389_v13 = vld [vmem:[%s6223_s21 + $0x2c0] sm:$0xff] }
  0x76   : > { %4749 = vmatprep.mubr.msk.bf16.mxu0 %vm516_vm0, %v453_v14  ;;  %v390_v14 = vld [vmem:[%s6223_s21 + $0x2c8] sm:$0xff] }
  0x77   : > { %v473_v16 = vpack.c.bf16 %v390_v14, %v389_v13  ;;  %v414_v13 = vld [vmem:[%s6223_s21 + $0x388] sm:$0xff] }
  0x7d   : > { %4750 = vmatmul.mubr.msk.bf16.gmra.mxu0 %vm516_vm0, %v454_v21  ;;  %v474_v21 = vpack.c.bf16 %v392_v18, %v391_v17 }
  0x7e   : > { %4753 = vmatprep.mubr.msk.bf16.mxu0 %vm516_vm0, %v455_v22  ;;  %v475_v22 = vpack.c.bf16 %v394_v20, %v393_v19 }
  0x85   : > { %4754 = vmatmul.mubr.msk.bf16.gmra.mxu0 %vm516_vm0, %v456_v29  ;;  %v399_v29 = vld [vmem:[%s6223_s21 + $0x310] sm:$0xff] }
  0x86   : > { %4757 = vmatprep.mubr.msk.bf16.mxu0 %vm516_vm0, %v457_v30  ;;  %v400_v30 = vld [vmem:[%s6223_s21 + $0x318] sm:$0xff] }
  0x87   : > { %v478_v33 = vpack.c.bf16 %v400_v30, %v399_v29 }
  0x8d   : > { %4758 = vmatmul.mubr.msk.bf16.gmra.mxu0 %vm516_vm0, %v458_v37 }
  0x8e   : > { %4761 = vmatprep.mubr.msk.bf16.mxu0 %vm516_vm0, %v459_v38  ;;  %v403_v38 = vld [vmem:[%s6223_s21 + $0x330] sm:$0xff] }
  0x8f   : > { %v480_v46 = vpack.c.bf16 %v404_v39, %v403_v38  ;;  %v416_v39 = vld [vmem:[%s6223_s21 + $0x398] sm:$0xff] }
  0x95   : > { %4762 = vmatmul.mubr.msk.bf16.gmra.mxu0 %vm516_vm0, %v460_v43 }
  0x96   : > { %4765 = vmatprep.mubr.msk.bf16.mxu0 %vm516_vm0, %v461_v44 }
  0x9d   : > { %4766 = vmatmul.mubr.msk.bf16.gmra.mxu0 %vm516_vm0, %v462_v49  ;;  %v481_v49 = vpack.c.bf16 %v406_v42, %v405_v41  ;;  %v418_v41 = vld [vmem:[%s6223_s21 + $0x3a8] sm:$0xff] }
  0x9e   : > { %4769 = vmatprep.mubr.msk.bf16.mxu0 %vm516_vm0, %v463_v50 }
  0xa5   : > { %4770 = vmatmul.mubr.msk.bf16.gmra.mxu0 %vm516_vm0, %v464_v55 }
  0xa6   : > { %4773 = vmatprep.mubr.msk.bf16.mxu0 %vm516_vm0, %v465_v56  ;;  %v407_v56 = vld [vmem:[%s6223_s21 + $0x350] sm:$0xff] }
  0xa7   : > { %v482_v0 = vpack.c.bf16 %v408_v57, %v407_v56 }
  0xad   : > { %4774 = vmatmul.mubr.msk.bf16.gmra.mxu0 %vm516_vm0, %v466_v61 }
  0xae   : > { %4777 = vmatprep.mubr.msk.bf16.mxu0 %vm516_vm0, %v467_v62 }
  0xb5   : > { %4778 = vmatmul.mubr.msk.bf16.gmra.mxu0 %vm516_vm0, %v468_v3  ;;  %v483_v3 = vpack.c.bf16 %v410_v60, %v409_v59 }
  0xb6   : > { %4781 = vmatprep.mubr.msk.bf16.mxu0 %vm516_vm0, %v469_v4 }
  0xbd   : > { %4782 = vmatmul.mubr.msk.bf16.gmra.mxu0 %vm516_vm0, %v470_v9 }
  0xbe   : > { %4785 = vmatprep.mubr.msk.bf16.mxu0 %vm516_vm0, %v471_v10 }
  0xc5   : > { %4786 = vmatmul.mubr.msk.bf16.gmra.mxu0 %vm516_vm0, %v472_v15 }
  0xc6   : > { %4789 = vmatprep.mubr.msk.bf16.mxu0 %vm516_vm0, %v473_v16 }
  0xcd   : > { %4790 = vmatmul.mubr.msk.bf16.gmra.mxu0 %vm516_vm0, %v474_v21  ;;  %v484_v21 = vpack.c.bf16 %v412_v11, %v411_v8  ;;  %v420_v8 = vld [vmem:[%s6223_s21 + $0x3b8] sm:$0xff] }
  0xce   : > { %4793 = vmatprep.mubr.msk.bf16.mxu0 %vm516_vm0, %v475_v22  ;;  %v485_v22 = vpack.c.bf16 %v414_v13, %v413_v12  ;;  %v421_v12 = vld [vmem:[%s6223_s21 + $0x3c0] sm:$0xff]  ;;  %v422_v13 = vld [vmem:[%s6223_s21 + $0x3c8] sm:$0xff] }
  0xd5   : > { %4794 = vmatmul.mubr.msk.bf16.gmra.mxu0 %vm516_vm0, %v476_v27 }
  0xd6   : > { %4797 = vmatprep.mubr.msk.bf16.mxu0 %vm516_vm0, %v477_v28 }
  0xdd   : > { %v4703_v36 = vpop.f32.mrf.mxu0  ;;  %4798 = vmatmul.mubr.msk.bf16.gmra.mxu0 %vm516_vm0, %v478_v33  ;;  %v415_v33 = vld [vmem:[%s6223_s21 + $0x390] sm:$0xff] }
  0xde   : > { %v6407_v37 = vadd.f32 %v4703_v36, %v6403_v35  ;;  %4801 = vmatprep.mubr.msk.bf16.mxu0 %vm516_vm0, %v479_v34 }
  0xdf   : > { %v743_v40 = vpop.f32.mrf.mxu0 }
  0xe0   : > { %v4210_v43 = vmul.f32 -1.442695, %v6407_v37  ;;  %v6416_v44 = vadd.f32 %v6403_v35, %v743_v40  ;;  %v417_v40 = vld [vmem:[%s6223_s21 + $0x3a0] sm:$0xff] }
  0xe1   : > { %v4704_v45 = vpop.f32.mrf.mxu0 }
  0xe2   : > { %5033 = vpow2.f32 %v4210_v43  ;;  %v4208_v47 = vmul.f32 -1.442695, %v6416_v44  ;;  %v6420_v48 = vadd.f32 %v4704_v45, %v6403_v35 }
  0xe3   : > { %v746_v50 = vpop.f32.mrf.mxu0 }
  0xe4   : > { %5035 = vpow2.f32 %v4208_v47  ;;  %v4211_v51 = vmul.f32 -1.442695, %v6420_v48  ;;  %v6424_v52 = vadd.f32 %v6403_v35, %v746_v50 }
  0xe5   : > { %v4707_v53 = vpop.f32.mrf.mxu0  ;;  %4802 = vmatmul.mubr.msk.bf16.gmra.mxu0 %vm516_vm0, %v480_v46 }
  0xe6   : > { %5037 = vpow2.f32 %v4211_v51  ;;  %v4209_v54 = vmul.f32 -1.442695, %v6424_v52  ;;  %v6429_v55 = vadd.f32 %v4707_v53, %v6403_v35  ;;  %4805 = vmatprep.mubr.msk.bf16.mxu0 %vm516_vm0, %v481_v49  ;;  %v486_v51 = vpack.c.bf16 %v416_v39, %v415_v33 }
  0xe7   : > { %v759_v58 = vpop.f32.mrf.mxu0  ;;  %v487_v53 = vpack.c.bf16 %v418_v41, %v417_v40 }
  0xe8   : > { %5039 = vpow2.f32 %v4209_v54  ;;  %v4214_v61 = vmul.f32 -1.442695, %v6429_v55  ;;  %v6438_v62 = vadd.f32 %v6403_v35, %v759_v58 }
  0xe9   : > { %v4708_v63 = vpop.f32.mrf.mxu0 }
  0xea   : > { %5041 = vpow2.f32 %v4214_v61  ;;  %v4212_v1 = vmul.f32 -1.442695, %v6438_v62  ;;  %v6442_v2 = vadd.f32 %v4708_v63, %v6403_v35 }
  0xeb   : > { %v762_v4 = vpop.f32.mrf.mxu0 }
  0xec   : > { %5043 = vpow2.f32 %v4212_v1  ;;  %v4215_v5 = vmul.f32 -1.442695, %v6442_v2  ;;  %v6446_v6 = vadd.f32 %v6403_v35, %v762_v4 }
  0xed   : > { %v4711_v7 = vpop.f32.mrf.mxu0  ;;  %4806 = vmatmul.mubr.msk.bf16.gmra.mxu0 %vm516_vm0, %v482_v0 }
  0xee   : > { %5045 = vpow2.f32 %v4215_v5  ;;  %v4213_v9 = vmul.f32 -1.442695, %v6446_v6  ;;  %v6452_v10 = vadd.f32 %v4711_v7, %v6403_v35  ;;  %4809 = vmatprep.mubr.msk.bf16.mxu0 %vm516_vm0, %v483_v3  ;;  %v419_v7 = vld [vmem:[%s6223_s21 + $0x3b0] sm:$0xff] }
  0xef   : > { %v5034_v14 = vpop.eup %5033  ;;  %v775_v15 = vpop.f32.mrf.mxu0 }
  0xf0   : > { %v1640_v16 = vadd.f32 1.0, %v5034_v14  ;;  %5047 = vpow2.f32 %v4213_v9  ;;  %v4218_v17 = vmul.f32 -1.442695, %v6452_v10  ;;  %v6460_v18 = vadd.f32 %v6403_v35, %v775_v15 }
  0xf1   : > { %v5036_v19 = vpop.eup %5035  ;;  %v4712_v20 = vpop.f32.mrf.mxu0 }
  0xf2   : > { %5049 = vrcp.f32 %v1640_v16  ;;  %v1638_v23 = vadd.f32 1.0, %v5036_v19  ;;  %v4216_v24 = vmul.f32 -1.442695, %v6460_v18  ;;  %v6464_v25 = vadd.f32 %v4712_v20, %v6403_v35 }
  0xf3   : > { %v5038_v26 = vpop.eup %5037  ;;  %5051 = vpow2.f32 %v4218_v17  ;;  %v778_v27 = vpop.f32.mrf.mxu0 }
  0xf4   : > { %5053 = vrcp.f32 %v1638_v23  ;;  %v1641_v28 = vadd.f32 1.0, %v5038_v26  ;;  %v4219_v29 = vmul.f32 -1.442695, %v6464_v25  ;;  %v6468_v30 = vadd.f32 %v6403_v35, %v778_v27 }
  0xf5   : > { %v5040_v31 = vpop.eup %5039  ;;  %5055 = vpow2.f32 %v4216_v24  ;;  %v4715_v32 = vpop.f32.mrf.mxu0  ;;  %4810 = vmatmul.mubr.msk.bf16.gmra.mxu0 %vm516_vm0, %v484_v21  ;;  %v488_v21 = vpack.c.bf16 %v420_v8, %v419_v7  ;;  %v489_v26 = vpack.c.bf16 %v422_v13, %v421_v12 }
  0xf6   : > { %5057 = vrcp.f32 %v1641_v28  ;;  %v1639_v34 = vadd.f32 1.0, %v5040_v31  ;;  %v4217_v36 = vmul.f32 -1.442695, %v6468_v30  ;;  %v6474_v38 = vadd.f32 %v4715_v32, %v6403_v35  ;;  %4813 = vmatprep.mubr.msk.bf16.mxu0 %vm516_vm0, %v485_v22 }
  0xf7   : > { %v5042_v42 = vpop.eup %5041  ;;  %5059 = vpow2.f32 %v4219_v29  ;;  %v791_v43 = vpop.f32.mrf.mxu0 }
  0xf8   : > { %5061 = vrcp.f32 %v1639_v34  ;;  %v1644_v45 = vadd.f32 1.0, %v5042_v42  ;;  %v4222_v46 = vmul.f32 -1.442695, %v6474_v38  ;;  %v6482_v47 = vadd.f32 %v6403_v35, %v791_v43  ;;  %v423_v34 = vld [vmem:[%s6223_s21 + $0x3d0] sm:$0xff] }
  0xf9   : > { %v5044_v49 = vpop.eup %5043  ;;  %5063 = vpow2.f32 %v4217_v36  ;;  %v4716_v50 = vpop.f32.mrf.mxu0  ;;  %v424_v36 = vld [vmem:[%s6223_s21 + $0x3d8] sm:$0xff] }
  0xfa   : > { %5065 = vrcp.f32 %v1644_v45  ;;  %v1642_v54 = vadd.f32 1.0, %v5044_v49  ;;  %v4220_v56 = vmul.f32 -1.442695, %v6482_v47  ;;  %v6486_v57 = vadd.f32 %v4716_v50, %v6403_v35  ;;  %v425_v50 = vld [vmem:[%s6223_s21 + $0x3e0] sm:$0xff] }
  0xfb   : > { %v5046_v58 = vpop.eup %5045  ;;  %5067 = vpow2.f32 %v4222_v46  ;;  %v794_v59 = vpop.f32.mrf.mxu0 }
  0xfc   : > { %5069 = vrcp.f32 %v1642_v54  ;;  %v1645_v60 = vadd.f32 1.0, %v5046_v58  ;;  %v4223_v61 = vmul.f32 -1.442695, %v6486_v57  ;;  %v6490_v63 = vadd.f32 %v6403_v35, %v794_v59 }
  0xfd   : > { %v5048_v0 = vpop.eup %5047  ;;  %5071 = vpow2.f32 %v4220_v56  ;;  %v4719_v1 = vpop.f32.mrf.mxu0  ;;  %4814 = vmatmul.mubr.msk.bf16.gmra.mxu0 %vm516_vm0, %v486_v51  ;;  %v426_v51 = vld [vmem:[%s6223_s21 + $0x3e8] sm:$0xff]  ;;  %v490_v58 = vpack.c.bf16 %v424_v36, %v423_v34 }
  0xfe   : > { %5073 = vrcp.f32 %v1645_v60  ;;  %v1643_v3 = vadd.f32 1.0, %v5048_v0  ;;  %v4221_v4 = vmul.f32 -1.442695, %v6490_v63  ;;  %v6495_v5 = vadd.f32 %v4719_v1, %v6403_v35  ;;  %4817 = vmatprep.mubr.msk.bf16.mxu0 %vm516_vm0, %v487_v53 }
  0xff   : > { %v5050_v9 = vpop.eup %5049  ;;  %5075 = vpow2.f32 %v4223_v61  ;;  %v807_v11 = vpop.f32.mrf.mxu0  ;;  %v491_v7 = vpack.c.bf16 %v426_v51, %v425_v50 }
 0x100   : > { %v5052_v14 = vpop.eup %5051  ;;  %5077 = vrcp.f32 %v1643_v3  ;;  %v4226_v15 = vmul.f32 -1.442695, %v6495_v5  ;;  %v6504_v16 = vadd.f32 %v6403_v35, %v807_v11  ;;  %v2024_v60 = vmul.f32 %v5050_v9, %v6407_v37 }
 0x101   : > { %v5054_v17 = vpop.eup %5053  ;;  %v1648_v19 = vadd.f32 1.0, %v5052_v14  ;;  %5079 = vpow2.f32 %v4221_v4  ;;  %v4720_v20 = vpop.f32.mrf.mxu0 }
 0x102   : > { %v5056_v22 = vpop.eup %5055  ;;  %5081 = vpow2.f32 %v4226_v15  ;;  %v4224_v23 = vmul.f32 -1.442695, %v6504_v16  ;;  %v6508_v24 = vadd.f32 %v4720_v20, %v6403_v35  ;;  %v2022_v56 = vmul.f32 %v5054_v17, %v6416_v44 }
 0x103   : > { %v5058_v27 = vpop.eup %5057  ;;  %5083 = vrcp.f32 %v1648_v19  ;;  %v1646_v28 = vadd.f32 1.0, %v5056_v22  ;;  %v810_v29 = vpop.f32.mrf.mxu0 }
 0x104   : > { %v5060_v31 = vpop.eup %5059  ;;  %5085 = vpow2.f32 %v4224_v23  ;;  %v4227_v32 = vmul.f32 -1.442695, %v6508_v24  ;;  %v6512_v33 = vadd.f32 %v6403_v35, %v810_v29  ;;  %v2025_v40 = vmul.f32 %v5058_v27, %v6420_v48  ;;  %v427_v29 = vld [vmem:[%s6223_s21 + $0x3f0] sm:$0xff] }
 0x105   : > { %v5062_v39 = vpop.eup %5061  ;;  %5087 = vrcp.f32 %v1646_v28  ;;  %v1649_v41 = vadd.f32 1.0, %v5060_v31  ;;  %v4723_v42 = vpop.f32.mrf.mxu0  ;;  %4818 = vmatmul.mubr.msk.bf16.gmra.mxu0 %vm516_vm0, %v488_v21  ;;  %v428_v31 = vld [vmem:[%s6223_s21 + $0x3f8] sm:$0xff]  ;;  %s282_s21 = sand.u32 1, %s6113_s25  }
 0x106   : > { %v5064_v43 = vpop.eup %5063  ;;  %5089 = vpow2.f32 %v4227_v32  ;;  %v4225_v45 = vmul.f32 -1.442695, %v6512_v33  ;;  %v6520_v46 = vadd.f32 %v4723_v42, %v6403_v35  ;;  %v2023_v49 = vmul.f32 %v5062_v39, %v6424_v52  ;;  %4821 = vmatprep.mubr.msk.bf16.mxu0 %vm516_vm0, %v489_v26  ;;  %s4138_s13 = sshll.u32 %s282_s21, 5  ;;  %s4061_s20 = scalar_lea.sflag [#allocation3], %s282_s21 }
 0x107   : > { %v5066_v53 = vpop.eup %5065  ;;  %5091 = vrcp.f32 %v1649_v41  ;;  %v1647_v48 = vadd.f32 1.0, %v5064_v43  ;;  %v823_v54 = vpop.f32.mrf.mxu0  ;;  %v2151_v37 = vpack.c.bf16 %v2025_v40, %v2024_v60  ;;  %v492_v51 = vpack.c.bf16 %v428_v31, %v427_v29  ;;  %s284_s14 = scalar_lea.vmem [#allocation2], %s4138_s13 }
 0x108   : > { %v5068_v59 = vpop.eup %5067  ;;  %5093 = vpow2.f32 %v4225_v45  ;;  %v4230_v61 = vmul.f32 -1.442695, %v6520_v46  ;;  %v6530_v0 = vadd.f32 %v6403_v35, %v823_v54  ;;  %v2150_v4 = vpack.c.bf16 %v2023_v49, %v2022_v56  ;;  %s4075_s16 = sshll.u32 %s284_s14, 4  ;;  %s4076_s16 = int_to_ptr.vmem [resolvable:$true] %s4075_s16 }
 0x109   : > { %v5070_v52 = vpop.eup %5069  ;;  %5095 = vrcp.f32 %v1647_v48  ;;  %v1652_v1 = vadd.f32 1.0, %v5068_v59  ;;  %v4724_v3 = vpop.f32.mrf.mxu0  ;;  %s6061_s22 = scalar_lea.vmem %s4076_s16, 512  ;;  %p6068_p0 = scmp.lt.s32.totalorder %s4076_s16, %s6066_s23 }
 0x10a   : > { %v5072_v8 = vpop.eup %5071  ;;  %5097 = vpow2.f32 %v4230_v61  ;;  %v4228_v44 = vmul.f32 -1.442695, %v6530_v0  ;;  %v6534_v11 = vadd.f32 %v4724_v3, %v6403_v35  ;;  %4845 = vmatprep.mubr.bf16.mxu1 %v2150_v4  ;;  %v2026_v34 = vmul.f32 %v5070_v52, %v6438_v62  ;;  %p6062_p11 = scmp.ne.s32.totalorder %s4076_s16, %s6061_s22  ;;  %p6069_p1 = scmp.lt.s32.totalorder %s6067_s29, %s6061_s22 }
 0x10b   : > { %v5074_v9 = vpop.eup %5073  ;;  %5099 = vrcp.f32 %v1652_v1  ;;  %v1650_v12 = vadd.f32 1.0, %v5072_v8  ;;  %v826_v13 = vpop.f32.mrf.mxu0  ;;  %4846 = vmatmul.mubr.bf16.vlgmr.msra.gmra.mxu1 %v2151_v37 }
 0x10c   : > { %v5076_v14 = vpop.eup %5075  ;;  %5101 = vpow2.f32 %v4228_v44  ;;  %v4231_v15 = vmul.f32 -1.442695, %v6534_v11  ;;  %v6538_v17 = vadd.f32 %v6403_v35, %v826_v13  ;;  %v2029_v20 = vmul.f32 %v5074_v9, %v6442_v2  ;;  %p6063_p12 = pnand %p6062_p11, %p6203_p5  ;;  %p6070_p2 = por %p6069_p1, %p6068_p0 }
 0x10d   : > { %v5078_v19 = vpop.eup %5077  ;;  %5103 = vrcp.f32 %v1650_v12  ;;  %v1653_v21 = vadd.f32 1.0, %v5076_v14  ;;  %v4727_v22 = vpop.f32.mrf.mxu0  ;;  %4822 = vmatmul.mubr.msk.bf16.gmra.mxu0 %vm516_vm0, %v490_v58  ;;  %v2028_v2 = vmul.f32 %v5066_v53, %v6429_v55 }
 0x10e   : > { %v5080_v23 = vpop.eup %5079  ;;  %v2027_v26 = vmul.f32 %v5078_v19, %v6446_v6  ;;  %5105 = vpow2.f32 %v4231_v15  ;;  %v4229_v27 = vmul.f32 -1.442695, %v6538_v17  ;;  %v6545_v28 = vadd.f32 %v4727_v22, %v6403_v35  ;;  %4825 = vmatprep.mubr.msk.bf16.mxu0 %vm516_vm0, %v491_v7  ;;  %p6064_p13 = pneg %p6063_p12 }
 0x10f   : > { %v5082_v32 = vpop.eup %5081  ;;  %5107 = vrcp.f32 %v1653_v21  ;;  %v1651_v36 = vadd.f32 1.0, %v5080_v23  ;;  %v839_v39 = vpop.f32.mrf.mxu0  ;;  %v2153_v50 = vpack.c.bf16 %v2029_v20, %v2028_v2 }
 0x110   : > { %v5084_v40 = vpop.eup %5083  ;;  %v1656_v6 = vadd.f32 1.0, %v5082_v32  ;;  %5109 = vpow2.f32 %v4229_v27  ;;  %v4234_v41 = vmul.f32 -1.442695, %v6545_v28  ;;  %v6554_v42 = vadd.f32 %v6403_v35, %v839_v39  ;;  %p6071_p3 = pnand %p6070_p2, %p6064_p13 }
 0x111   : > { %v5086_v43 = vpop.eup %5085  ;;  %5111 = vrcp.f32 %v1651_v36  ;;  %v4728_v45 = vpop.f32.mrf.mxu0  ;;  %v2152_v49 = vpack.c.bf16 %v2027_v26, %v2026_v34  ;;  %v2032_v9 = vmul.f32 %v5084_v40, %v6452_v10 }
 0x112   : > { %v5088_v55 = vpop.eup %5087  ;;  %5113 = vrcp.f32 %v1656_v6  ;;  %v1654_v62 = vadd.f32 1.0, %v5086_v43  ;;  %v4232_v53 = vmul.f32 -1.442695, %v6554_v42  ;;  %v6558_v48 = vadd.f32 %v4728_v45, %v6403_v35 }
 0x113   : > { %v5090_v54 = vpop.eup %5089  ;;  %5115 = vpow2.f32 %v4234_v41  ;;  %4849 = vmatprep.mubr.bf16.mxu1 %v2152_v49  ;;  %v842_v56 = vpop.f32.mrf.mxu0  ;;  %v2030_v12 = vmul.f32 %v5088_v55, %v6460_v18 }
 0x114   : > { %v5092_v58 = vpop.eup %5091  ;;  %5117 = vrcp.f32 %v1654_v62  ;;  %v1657_v59 = vadd.f32 1.0, %v5090_v54  ;;  %v4235_v60 = vmul.f32 -1.442695, %v6558_v48  ;;  %v6562_v61 = vadd.f32 %v6403_v35, %v842_v56  ;;  %4850 = vmatmul.mubr.bf16.gmra.mxu1 %v2153_v50 }
 0x115   : > { %v5094_v52 = vpop.eup %5093  ;;  %v2033_v1 = vmul.f32 %v5092_v58, %v6464_v25  ;;  %5119 = vpow2.f32 %v4232_v53  ;;  %v4731_v3 = vpop.f32.mrf.mxu0  ;;  %4826 = vmatmul.mubr.msk.bf16.gmra.mxu0 %vm516_vm0, %v492_v51 }
 0x116   : > { %v5096_v4 = vpop.eup %5095  ;;  %5121 = vrcp.f32 %v1657_v59  ;;  %v1655_v7 = vadd.f32 1.0, %v5094_v52  ;;  %v4233_v8 = vmul.f32 -1.442695, %v6562_v61  ;;  %v6568_v44 = vadd.f32 %v4731_v3, %v6403_v35 }
 0x117   : > { %v5098_v37 = vpop.eup %5097  ;;  %v2031_v13 = vmul.f32 %v5096_v4, %v6468_v30  ;;  %5123 = vpow2.f32 %v4235_v60  ;;  %v855_v25 = vpop.f32.mrf.mxu0  ;;  %v2155_v26 = vpack.c.bf16 %v2033_v1, %v2032_v9 }
 0x118   : > { %v5100_v14 = vpop.eup %5099  ;;  %5125 = vrcp.f32 %v1655_v7  ;;  %v1660_v15 = vadd.f32 1.0, %v5098_v37  ;;  %v4238_v19 = vmul.f32 -1.442695, %v6568_v44  ;;  %v6575_v20 = vadd.f32 %v6403_v35, %v855_v25 }
 0x119   : > { %v5102_v21 = vpop.eup %5101  ;;  %5127 = vpow2.f32 %v4233_v8  ;;  %v4732_v22 = vpop.f32.mrf.mxu0  ;;  %v2154_v23 = vpack.c.bf16 %v2031_v13, %v2030_v12 }
 0x11a   : > { %v5104_v10 = vpop.eup %5103  ;;  %5129 = vrcp.f32 %v1660_v15  ;;  %v1658_v18 = vadd.f32 1.0, %v5102_v21  ;;  %v4236_v30 = vmul.f32 -1.442695, %v6575_v20  ;;  %v6579_v27 = vadd.f32 %v4732_v22, %v6403_v35 }
 0x11b   : > { %v5106_v29 = vpop.eup %5105  ;;  %5131 = vpow2.f32 %v4238_v19  ;;  %4853 = vmatprep.mubr.bf16.mxu1 %v2154_v23  ;;  %v858_v31 = vpop.f32.mrf.mxu0  ;;  %v2034_v51 = vmul.f32 %v5104_v10, %v6482_v47 }
 0x11c   : > { %v5108_v32 = vpop.eup %5107  ;;  %5133 = vrcp.f32 %v1658_v18  ;;  %v1661_v2 = vadd.f32 1.0, %v5106_v29  ;;  %v4239_v34 = vmul.f32 -1.442695, %v6579_v27  ;;  %v6583_v36 = vadd.f32 %v6403_v35, %v858_v31  ;;  %4854 = vmatmul.mubr.bf16.gmra.mxu1 %v2155_v26 }
 0x11d   : > { %v5110_v39 = vpop.eup %5109  ;;  %v2037_v40 = vmul.f32 %v5108_v32, %v6486_v57  ;;  %5135 = vpow2.f32 %v4236_v30  ;;  %v4735_v6 = vpop.f32.mrf.mxu0  ;;  %v2036_v57 = vmul.f32 %v5100_v14, %v6474_v38 }
 0x11e   : > { %v5112_v41 = vpop.eup %5111  ;;  %5137 = vrcp.f32 %v1661_v2  ;;  %v1659_v43 = vadd.f32 1.0, %v5110_v39  ;;  %v4237_v45 = vmul.f32 -1.442695, %v6583_v36  ;;  %v6588_v49 = vadd.f32 %v4735_v6, %v6403_v35 }
 0x11f   : > { %v5114_v50 = vpop.eup %5113  ;;  %v2035_v55 = vmul.f32 %v5112_v41, %v6490_v63  ;;  %5139 = vpow2.f32 %v4239_v34  ;;  %v871_v62 = vpop.f32.mrf.mxu0  ;;  %v2157_v3 = vpack.c.bf16 %v2037_v40, %v2036_v57 }
 0x120   : > { %v5116_v53 = vpop.eup %5115  ;;  %5141 = vrcp.f32 %v1659_v43  ;;  %v4242_v54 = vmul.f32 -1.442695, %v6588_v49  ;;  %v6595_v56 = vadd.f32 %v6403_v35, %v871_v62 }
 0x121   : > { %v5118_v58 = vpop.eup %5117  ;;  %v1664_v59 = vadd.f32 1.0, %v5116_v53  ;;  %5143 = vpow2.f32 %v4237_v45  ;;  %v4736_v60 = vpop.f32.mrf.mxu0  ;;  %v2156_v52 = vpack.c.bf16 %v2035_v55, %v2034_v51 }
 0x122   : > { %v5120_v1 = vpop.eup %5119  ;;  %5145 = vpow2.f32 %v4242_v54  ;;  %v4240_v47 = vmul.f32 -1.442695, %v6595_v56  ;;  %v6599_v63 = vadd.f32 %v4736_v60, %v6403_v35  ;;  %v2038_v26 = vmul.f32 %v5118_v58, %v6504_v16 }
 0x123   : > { %v5122_v38 = vpop.eup %5121  ;;  %5147 = vrcp.f32 %v1664_v59  ;;  %v1662_v4 = vadd.f32 1.0, %v5120_v1  ;;  %4857 = vmatprep.mubr.bf16.mxu1 %v2156_v52  ;;  %v874_v7 = vpop.f32.mrf.mxu0 }
 0x124   : > { %v5124_v8 = vpop.eup %5123  ;;  %5149 = vpow2.f32 %v4240_v47  ;;  %v4243_v37 = vmul.f32 -1.442695, %v6599_v63  ;;  %v6603_v9 = vadd.f32 %v6403_v35, %v874_v7  ;;  %4858 = vmatmul.mubr.bf16.gmra.mxu1 %v2157_v3  ;;  %v2041_v13 = vmul.f32 %v5122_v38, %v6508_v24 }
 0x125   : > { %v5126_v12 = vpop.eup %5125  ;;  %5151 = vrcp.f32 %v1662_v4  ;;  %v1665_v25 = vadd.f32 1.0, %v5124_v8  ;;  %v4739_v14 = vpop.f32.mrf.mxu0  ;;  %v2040_v24 = vmul.f32 %v5114_v50, %v6495_v5 }
 0x126   : > { %v5128_v15 = vpop.eup %5127  ;;  %v2039_v19 = vmul.f32 %v5126_v12, %v6512_v33  ;;  %5153 = vpow2.f32 %v4243_v37  ;;  %v4241_v21 = vmul.f32 -1.442695, %v6603_v9  ;;  %v6609_v22 = vadd.f32 %v4739_v14, %v6403_v35 }
 0x127   : > { %v5130_v23 = vpop.eup %5129  ;;  %5155 = vrcp.f32 %v1665_v25  ;;  %v1663_v10 = vadd.f32 1.0, %v5128_v15  ;;  %v887_v18 = vpop.f32.mrf.mxu0  ;;  %v2159_v6 = vpack.c.bf16 %v2041_v13, %v2040_v24 }
 0x128   : > { %v5132_v30 = vpop.eup %5131  ;;  %5157 = vpow2.f32 %v4241_v21  ;;  %v4246_v29 = vmul.f32 -1.442695, %v6609_v22  ;;  %v6615_v33 = vadd.f32 %v6403_v35, %v887_v18  ;;  %v2158_v34 = vpack.c.bf16 %v2039_v19, %v2038_v26 }
 0x129   : > { %v5134_v31 = vpop.eup %5133  ;;  %5159 = vrcp.f32 %v1663_v10  ;;  %v1668_v32 = vadd.f32 1.0, %v5132_v30  ;;  %v4740_v2 = vpop.f32.mrf.mxu0  ;;  %v2044_v1 = vmul.f32 %v5130_v23, %v6520_v46 }
 0x12a   : > { %v5136_v39 = vpop.eup %5135  ;;  %5161 = vpow2.f32 %v4246_v29  ;;  %v4244_v16 = vmul.f32 -1.442695, %v6615_v33  ;;  %v6619_v40 = vadd.f32 %v4740_v2, %v6403_v35  ;;  %4861 = vmatprep.mubr.bf16.mxu1 %v2158_v34  ;;  %v2042_v47 = vmul.f32 %v5134_v31, %v6530_v0 }
 0x12b   : > { %v5138_v5 = vpop.eup %5137  ;;  %5163 = vrcp.f32 %v1668_v32  ;;  %v1666_v41 = vadd.f32 1.0, %v5136_v39  ;;  %v890_v43 = vpop.f32.mrf.mxu0 }
 0x12c   : > { %v5140_v45 = vpop.eup %5139  ;;  %5165 = vpow2.f32 %v4244_v16  ;;  %v4247_v50 = vmul.f32 -1.442695, %v6619_v40  ;;  %v6623_v51 = vadd.f32 %v6403_v35, %v890_v43  ;;  %4862 = vmatmul.mubr.bf16.gmra.mxu1 %v2159_v6  ;;  %v2045_v62 = vmul.f32 %v5138_v5, %v6534_v11 }
 0x12d   : > { %v5142_v55 = vpop.eup %5141  ;;  %5167 = vrcp.f32 %v1666_v41  ;;  %v1669_v53 = vadd.f32 1.0, %v5140_v45  ;;  %v4743_v57 = vpop.f32.mrf.mxu0 }
 0x12e   : > { %v5144_v54 = vpop.eup %5143  ;;  %v2043_v58 = vmul.f32 %v5142_v55, %v6538_v17  ;;  %5169 = vpow2.f32 %v4247_v50  ;;  %v4245_v59 = vmul.f32 -1.442695, %v6623_v51  ;;  %v6629_v60 = vadd.f32 %v4743_v57, %v6403_v35 }
 0x12f   : > { %v5146_v52 = vpop.eup %5145  ;;  %5171 = vrcp.f32 %v1669_v53  ;;  %v1667_v3 = vadd.f32 1.0, %v5144_v54  ;;  %v903_v11 = vpop.f32.mrf.mxu0  ;;  %v2161_v13 = vpack.c.bf16 %v2045_v62, %v2044_v1 }
 0x130   : > { %v5148_v38 = vpop.eup %5147  ;;  %v1672_v4 = vadd.f32 1.0, %v5146_v52  ;;  %5173 = vpow2.f32 %v4245_v59  ;;  %v4250_v7 = vmul.f32 -1.442695, %v6629_v60  ;;  %v6635_v17 = vadd.f32 %v6403_v35, %v903_v11 }
 0x131   : > { %v5150_v8 = vpop.eup %5149  ;;  %5175 = vrcp.f32 %v1667_v3  ;;  %v4744_v37 = vpop.f32.mrf.mxu0  ;;  %v2160_v12 = vpack.c.bf16 %v2043_v58, %v2042_v47  ;;  %v2048_v39 = vmul.f32 %v5148_v38, %v6545_v28 }
 0x132   : > { %v5152_v25 = vpop.eup %5151  ;;  %5177 = vrcp.f32 %v1672_v4  ;;  %v1670_v46 = vadd.f32 1.0, %v5150_v8  ;;  %v4248_v0 = vmul.f32 -1.442695, %v6635_v17  ;;  %v6639_v14 = vadd.f32 %v4744_v37, %v6403_v35 }
 0x133   : > { %v5154_v15 = vpop.eup %5153  ;;  %5179 = vpow2.f32 %v4250_v7  ;;  %4865 = vmatprep.mubr.bf16.mxu1 %v2160_v12  ;;  %v906_v19 = vpop.f32.mrf.mxu0  ;;  %v2046_v16 = vmul.f32 %v5152_v25, %v6554_v42 }
 0x134   : > { %v5156_v21 = vpop.eup %5155  ;;  %5181 = vrcp.f32 %v1670_v46  ;;  %v1673_v23 = vadd.f32 1.0, %v5154_v15  ;;  %v4251_v26 = vmul.f32 -1.442695, %v6639_v14  ;;  %v6643_v10 = vadd.f32 %v6403_v35, %v906_v19  ;;  %4866 = vmatmul.mubr.bf16.gmra.mxu1 %v2161_v13 }
 0x135   : > { %v5158_v18 = vpop.eup %5157  ;;  %v2049_v30 = vmul.f32 %v5156_v21, %v6558_v48  ;;  %5183 = vpow2.f32 %v4248_v0  ;;  %v4747_v24 = vpop.f32.mrf.mxu0 }
 0x136   : > { %v5160_v29 = vpop.eup %5159  ;;  %5185 = vrcp.f32 %v1673_v23  ;;  %v1671_v31 = vadd.f32 1.0, %v5158_v18  ;;  %v4249_v32 = vmul.f32 -1.442695, %v6643_v10  ;;  %v6648_v2 = vadd.f32 %v4747_v24, %v6403_v35 }
 0x137   : > { %v5162_v34 = vpop.eup %5161  ;;  %v2047_v6 = vmul.f32 %v5160_v29, %v6562_v61  ;;  %5187 = vpow2.f32 %v4251_v26  ;;  %v919_v5 = vpop.f32.mrf.mxu0  ;;  %v2163_v53 = vpack.c.bf16 %v2049_v30, %v2048_v39 }
 0x138   : > { %v5164_v48 = vpop.eup %5163  ;;  %5189 = vrcp.f32 %v1671_v31  ;;  %v1676_v41 = vadd.f32 1.0, %v5162_v34  ;;  %v4254_v43 = vmul.f32 -1.442695, %v6648_v2  ;;  %v6655_v45 = vadd.f32 %v6403_v35, %v919_v5 }
 0x139   : > { %v5166_v50 = vpop.eup %5165  ;;  %5191 = vpow2.f32 %v4249_v32  ;;  %v4748_v55 = vpop.f32.mrf.mxu0  ;;  %v2162_v62 = vpack.c.bf16 %v2047_v6, %v2046_v16 }
 0x13a   : > { %v5168_v28 = vpop.eup %5167  ;;  %5193 = vrcp.f32 %v1676_v41  ;;  %v1674_v42 = vadd.f32 1.0, %v5166_v50  ;;  %v4252_v61 = vmul.f32 -1.442695, %v6655_v45  ;;  %v6659_v57 = vadd.f32 %v4748_v55, %v6403_v35 }
 0x13b   : > { %v5170_v54 = vpop.eup %5169  ;;  %5195 = vpow2.f32 %v4254_v43  ;;  %4869 = vmatprep.mubr.bf16.mxu1 %v2162_v62  ;;  %v922_v58 = vpop.f32.mrf.mxu0  ;;  %v2050_v13 = vmul.f32 %v5168_v28, %v6575_v20 }
 0x13c   : > { %v5172_v59 = vpop.eup %5171  ;;  %5197 = vrcp.f32 %v1674_v42  ;;  %v1677_v52 = vadd.f32 1.0, %v5170_v54  ;;  %v4255_v1 = vmul.f32 -1.442695, %v6659_v57  ;;  %v6663_v47 = vadd.f32 %v6403_v35, %v922_v58  ;;  %4870 = vmatmul.mubr.bf16.gmra.mxu1 %v2163_v53 }
 0x13d   : > { %v5174_v3 = vpop.eup %5173  ;;  %v2053_v11 = vmul.f32 %v5172_v59, %v6579_v27  ;;  %5199 = vpow2.f32 %v4252_v61  ;;  %v4751_v38 = vpop.f32.mrf.mxu0  ;;  %v2052_v27 = vmul.f32 %v5164_v48, %v6568_v44 }
 0x13e   : > { %v5176_v4 = vpop.eup %5175  ;;  %5201 = vrcp.f32 %v1677_v52  ;;  %v1675_v7 = vadd.f32 1.0, %v5174_v3  ;;  %v4253_v8 = vmul.f32 -1.442695, %v6663_v47  ;;  %v6668_v37 = vadd.f32 %v4751_v38, %v6403_v35 }
 0x13f   : > { %v5178_v12 = vpop.eup %5177  ;;  %v2051_v25 = vmul.f32 %v5176_v4, %v6583_v36  ;;  %5203 = vpow2.f32 %v4255_v1  ;;  %v935_v46 = vpop.f32.mrf.mxu0  ;;  %v2165_v24 = vpack.c.bf16 %v2053_v11, %v2052_v27  ;;  %v6701_v11 = vld [vmem:[%s8449_s2] ss:$0 sm:$0xff] }
 0x140   : > { %v5180_v0 = vpop.eup %5179  ;;  %5205 = vrcp.f32 %v1675_v7  ;;  %v4258_v15 = vmul.f32 -1.442695, %v6668_v37  ;;  %v6675_v19 = vadd.f32 %v6403_v35, %v935_v46 }
 0x141   : > { %v5182_v21 = vpop.eup %5181  ;;  %v1680_v23 = vadd.f32 1.0, %v5180_v0  ;;  %5207 = vpow2.f32 %v4253_v8  ;;  %v4752_v26 = vpop.f32.mrf.mxu0  ;;  %v2164_v18 = vpack.c.bf16 %v2051_v25, %v2050_v13 }
 0x142   : > { %v5184_v30 = vpop.eup %5183  ;;  %5209 = vpow2.f32 %v4258_v15  ;;  %v4256_v20 = vmul.f32 -1.442695, %v6675_v19  ;;  %v6679_v36 = vadd.f32 %v4752_v26, %v6403_v35  ;;  %v2054_v53 = vmul.f32 %v5182_v21, %v6595_v56 }
 0x143   : > { %v5186_v44 = vpop.eup %5185  ;;  %5211 = vrcp.f32 %v1680_v23  ;;  %v1678_v29 = vadd.f32 1.0, %v5184_v30  ;;  %4873 = vmatprep.mubr.bf16.mxu1 %v2164_v18  ;;  %v938_v31 = vpop.f32.mrf.mxu0 }
 0x144   : > { %v5188_v32 = vpop.eup %5187  ;;  %5213 = vpow2.f32 %v4256_v20  ;;  %v4259_v34 = vmul.f32 -1.442695, %v6679_v36  ;;  %v6683_v39 = vadd.f32 %v6403_v35, %v938_v31  ;;  %4874 = vmatmul.mubr.bf16.gmra.mxu1 %v2165_v24  ;;  %v2057_v6 = vmul.f32 %v5186_v44, %v6599_v63 }
 0x145   : > { %v5190_v16 = vpop.eup %5189  ;;  %5215 = vrcp.f32 %v1678_v29  ;;  %v1681_v5 = vadd.f32 1.0, %v5188_v32  ;;  %v4755_v48 = vpop.f32.mrf.mxu0  ;;  %v2056_v63 = vmul.f32 %v5178_v12, %v6588_v49 }
 0x146   : > { %v5192_v41 = vpop.eup %5191  ;;  %v2055_v43 = vmul.f32 %v5190_v16, %v6603_v9  ;;  %5217 = vpow2.f32 %v4259_v34  ;;  %v4257_v50 = vmul.f32 -1.442695, %v6683_v39  ;;  %v6689_v55 = vadd.f32 %v4755_v48, %v6403_v35 }
 0x147   : > { %v5194_v62 = vpop.eup %5193  ;;  %5219 = vrcp.f32 %v1681_v5  ;;  %v1679_v28 = vadd.f32 1.0, %v5192_v41  ;;  %v951_v42 = vpop.f32.mrf.mxu0  ;;  %v2167_v38 = vpack.c.bf16 %v2057_v6, %v2056_v63 }
 0x148   : > { %v5196_v61 = vpop.eup %5195  ;;  %5221 = vpow2.f32 %v4257_v50  ;;  %v4262_v54 = vmul.f32 -1.442695, %v6689_v55  ;;  %v6695_v9 = vadd.f32 %v6403_v35, %v951_v42  ;;  %v2166_v1 = vpack.c.bf16 %v2055_v43, %v2054_v53 }
 0x149   : > { %v5198_v58 = vpop.eup %5197  ;;  %5223 = vrcp.f32 %v1679_v28  ;;  %v1684_v59 = vadd.f32 1.0, %v5196_v61  ;;  %v4756_v52 = vpop.f32.mrf.mxu0  ;;  %v2060_v30 = vmul.f32 %v5194_v62, %v6609_v22 }
 0x14a   : > { %v5200_v3 = vpop.eup %5199  ;;  %5225 = vpow2.f32 %v4262_v54  ;;  %v4260_v56 = vmul.f32 -1.442695, %v6695_v9  ;;  %v6704_v49 = vadd.f32 %v6701_v11, %v4756_v52  ;;  %4877 = vmatprep.mubr.bf16.mxu1 %v2166_v1  ;;  %v2058_v20 = vmul.f32 %v5198_v58, %v6615_v33 }
 0x14b   : > { %v5202_v35 = vpop.eup %5201  ;;  %5227 = vrcp.f32 %v1684_v59  ;;  %v1682_v4 = vadd.f32 1.0, %v5200_v3  ;;  %v954_v7 = vpop.f32.mrf.mxu0 }
 0x14c   : > { %v5204_v8 = vpop.eup %5203  ;;  %5229 = vpow2.f32 %v4260_v56  ;;  %v4263_v12 = vmul.f32 -1.442695, %v6704_v49  ;;  %v6708_v13 = vadd.f32 %v6701_v11, %v954_v7  ;;  %4878 = vmatmul.mubr.bf16.gmra.mxu1 %v2167_v38  ;;  %v2061_v46 = vmul.f32 %v5202_v35, %v6619_v40 }
 0x14d   : > { %v5206_v25 = vpop.eup %5205  ;;  %5231 = vrcp.f32 %v1682_v4  ;;  %v1685_v0 = vadd.f32 1.0, %v5204_v8  ;;  %v4759_v27 = vpop.f32.mrf.mxu0 }
 0x14e   : > { %v5208_v15 = vpop.eup %5207  ;;  %v2059_v21 = vmul.f32 %v5206_v25, %v6623_v51  ;;  %5233 = vpow2.f32 %v4263_v12  ;;  %v4261_v23 = vmul.f32 -1.442695, %v6708_v13  ;;  %v6714_v26 = vadd.f32 %v6701_v11, %v4759_v27 }
 0x14f   : > { %v5210_v18 = vpop.eup %5209  ;;  %5235 = vrcp.f32 %v1685_v0  ;;  %v1683_v24 = vadd.f32 1.0, %v5208_v15  ;;  %v967_v40 = vpop.f32.mrf.mxu0  ;;  %v2169_v6 = vpack.c.bf16 %v2061_v46, %v2060_v30 }
 0x150   : > { %v5212_v44 = vpop.eup %5211  ;;  %v1688_v29 = vadd.f32 1.0, %v5210_v18  ;;  %5237 = vpow2.f32 %v4261_v23  ;;  %v4266_v31 = vmul.f32 -1.442695, %v6714_v26  ;;  %v6720_v51 = vadd.f32 %v6701_v11, %v967_v40 }
 0x151   : > { %v5214_v32 = vpop.eup %5213  ;;  %5239 = vrcp.f32 %v1683_v24  ;;  %v4760_v34 = vpop.f32.mrf.mxu0  ;;  %v2168_v16 = vpack.c.bf16 %v2059_v21, %v2058_v20  ;;  %v2064_v3 = vmul.f32 %v5212_v44, %v6629_v60 }
 0x152   : > { %v5216_v5 = vpop.eup %5215  ;;  %5241 = vrcp.f32 %v1688_v29  ;;  %v1686_v22 = vadd.f32 1.0, %v5214_v32  ;;  %v4264_v33 = vmul.f32 -1.442695, %v6720_v51  ;;  %v6724_v48 = vadd.f32 %v6701_v11, %v4760_v34 }
 0x153   : > { %v5218_v41 = vpop.eup %5217  ;;  %5243 = vpow2.f32 %v4266_v31  ;;  %4881 = vmatprep.mubr.bf16.mxu1 %v2168_v16  ;;  %v970_v43 = vpop.f32.mrf.mxu0  ;;  %v2062_v56 = vmul.f32 %v5216_v5, %v6635_v17 }
 0x154   : > { %v5220_v50 = vpop.eup %5219  ;;  %5245 = vrcp.f32 %v1686_v22  ;;  %v1689_v62 = vadd.f32 1.0, %v5218_v41  ;;  %v4267_v53 = vmul.f32 -1.442695, %v6724_v48  ;;  %v6728_v28 = vadd.f32 %v6701_v11, %v970_v43  ;;  %4882 = vmatmul.mubr.bf16.gmra.mxu1 %v2169_v6 }
 0x155   : > { %v5222_v42 = vpop.eup %5221  ;;  %v2065_v61 = vmul.f32 %v5220_v50, %v6639_v14  ;;  %5247 = vpow2.f32 %v4264_v33  ;;  %v4763_v63 = vpop.f32.mrf.mxu0 }
 0x156   : > { %v5224_v54 = vpop.eup %5223  ;;  %5249 = vrcp.f32 %v1689_v62  ;;  %v1687_v58 = vadd.f32 1.0, %v5222_v42  ;;  %v4265_v59 = vmul.f32 -1.442695, %v6728_v28  ;;  %v6733_v52 = vadd.f32 %v6701_v11, %v4763_v63 }
 0x157   : > { %v5226_v1 = vpop.eup %5225  ;;  %v2063_v38 = vmul.f32 %v5224_v54, %v6643_v10  ;;  %5251 = vpow2.f32 %v4267_v53  ;;  %v983_v35 = vpop.f32.mrf.mxu0  ;;  %v2171_v0 = vpack.c.bf16 %v2065_v61, %v2064_v3 }
 0x158   : > { %v5228_v14 = vpop.eup %5227  ;;  %5253 = vrcp.f32 %v1687_v58  ;;  %v1692_v4 = vadd.f32 1.0, %v5226_v1  ;;  %v4270_v7 = vmul.f32 -1.442695, %v6733_v52  ;;  %v6740_v8 = vadd.f32 %v6701_v11, %v983_v35 }
 0x159   : > { %v5230_v12 = vpop.eup %5229  ;;  %5255 = vpow2.f32 %v4265_v59  ;;  %v4764_v25 = vpop.f32.mrf.mxu0  ;;  %v2170_v46 = vpack.c.bf16 %v2063_v38, %v2062_v56 }
 0x15a   : > { %v5232_v60 = vpop.eup %5231  ;;  %5257 = vrcp.f32 %v1692_v4  ;;  %v1690_v17 = vadd.f32 1.0, %v5230_v12  ;;  %v4268_v10 = vmul.f32 -1.442695, %v6740_v8  ;;  %v6744_v27 = vadd.f32 %v6701_v11, %v4764_v25 }
 0x15b   : > { %v5234_v15 = vpop.eup %5233  ;;  %5259 = vpow2.f32 %v4270_v7  ;;  %4885 = vmatprep.mubr.bf16.mxu1 %v2170_v46  ;;  %v986_v21 = vpop.f32.mrf.mxu0  ;;  %v2066_v6 = vmul.f32 %v5232_v60, %v6655_v45 }
 0x15c   : > { %v5236_v23 = vpop.eup %5235  ;;  %5261 = vrcp.f32 %v1690_v17  ;;  %v1693_v18 = vadd.f32 1.0, %v5234_v15  ;;  %v4271_v30 = vmul.f32 -1.442695, %v6744_v27  ;;  %v6748_v20 = vadd.f32 %v6701_v11, %v986_v21  ;;  %4886 = vmatmul.mubr.bf16.gmra.mxu1 %v2171_v0 }
 0x15d   : > { %v5238_v24 = vpop.eup %5237  ;;  %v2069_v40 = vmul.f32 %v5236_v23, %v6659_v57  ;;  %5263 = vpow2.f32 %v4268_v10  ;;  %v4767_v44 = vpop.f32.mrf.mxu0  ;;  %v2068_v57 = vmul.f32 %v5228_v14, %v6648_v2 }
 0x15e   : > { %v5240_v29 = vpop.eup %5239  ;;  %5265 = vrcp.f32 %v1693_v18  ;;  %v1691_v31 = vadd.f32 1.0, %v5238_v24  ;;  %v4269_v32 = vmul.f32 -1.442695, %v6748_v20  ;;  %v6753_v34 = vadd.f32 %v6701_v11, %v4767_v44 }
 0x15f   : > { %v5242_v16 = vpop.eup %5241  ;;  %v2067_v5 = vmul.f32 %v5240_v29, %v6663_v47  ;;  %5267 = vpow2.f32 %v4271_v30  ;;  %v999_v22 = vpop.f32.mrf.mxu0  ;;  %v2173_v63 = vpack.c.bf16 %v2069_v40, %v2068_v57 }
 0x160   : > { %v5244_v33 = vpop.eup %5243  ;;  %5269 = vrcp.f32 %v1691_v31  ;;  %v4274_v41 = vmul.f32 -1.442695, %v6753_v34  ;;  %v6760_v43 = vadd.f32 %v6701_v11, %v999_v22 }
 0x161   : > { %v5246_v50 = vpop.eup %5245  ;;  %v1696_v62 = vadd.f32 1.0, %v5244_v33  ;;  %5271 = vpow2.f32 %v4269_v32  ;;  %v4768_v53 = vpop.f32.mrf.mxu0  ;;  %v2172_v42 = vpack.c.bf16 %v2067_v5, %v2066_v6 }
 0x162   : > { %v5248_v61 = vpop.eup %5247  ;;  %5273 = vpow2.f32 %v4274_v41  ;;  %v4272_v45 = vmul.f32 -1.442695, %v6760_v43  ;;  %v6764_v47 = vadd.f32 %v6701_v11, %v4768_v53  ;;  %v2070_v0 = vmul.f32 %v5246_v50, %v6675_v19 }
 0x163   : > { %v5250_v2 = vpop.eup %5249  ;;  %5275 = vrcp.f32 %v1696_v62  ;;  %v1694_v54 = vadd.f32 1.0, %v5248_v61  ;;  %4889 = vmatprep.mubr.bf16.mxu1 %v2172_v42  ;;  %v1002_v58 = vpop.f32.mrf.mxu0 }
 0x164   : > { %v5252_v59 = vpop.eup %5251  ;;  %5277 = vpow2.f32 %v4272_v45  ;;  %v4275_v1 = vmul.f32 -1.442695, %v6764_v47  ;;  %v6768_v3 = vadd.f32 %v6701_v11, %v1002_v58  ;;  %4890 = vmatmul.mubr.bf16.gmra.mxu1 %v2173_v63  ;;  %v2073_v38 = vmul.f32 %v5250_v2, %v6679_v36 }
 0x165   : > { %v5254_v56 = vpop.eup %5253  ;;  %5279 = vrcp.f32 %v1694_v54  ;;  %v1697_v35 = vadd.f32 1.0, %v5252_v59  ;;  %v4771_v14 = vpop.f32.mrf.mxu0  ;;  %v2072_v36 = vmul.f32 %v5242_v16, %v6668_v37 }
 0x166   : > { %v5256_v4 = vpop.eup %5255  ;;  %v2071_v7 = vmul.f32 %v5254_v56, %v6683_v39  ;;  %5281 = vpow2.f32 %v4275_v1  ;;  %v4273_v12 = vmul.f32 -1.442695, %v6768_v3  ;;  %v6774_v25 = vadd.f32 %v6701_v11, %v4771_v14 }
 0x167   : > { %v5258_v46 = vpop.eup %5257  ;;  %5283 = vrcp.f32 %v1697_v35  ;;  %v1695_v60 = vadd.f32 1.0, %v5256_v4  ;;  %v1015_v17 = vpop.f32.mrf.mxu0  ;;  %v2175_v44 = vpack.c.bf16 %v2073_v38, %v2072_v36 }
 0x168   : > { %v5260_v10 = vpop.eup %5259  ;;  %5285 = vpow2.f32 %v4273_v12  ;;  %v4278_v15 = vmul.f32 -1.442695, %v6774_v25  ;;  %v6780_v39 = vadd.f32 %v6701_v11, %v1015_v17  ;;  %v2174_v30 = vpack.c.bf16 %v2071_v7, %v2070_v0 }
 0x169   : > { %v5262_v21 = vpop.eup %5261  ;;  %5287 = vrcp.f32 %v1695_v60  ;;  %v1700_v23 = vadd.f32 1.0, %v5260_v10  ;;  %v4772_v18 = vpop.f32.mrf.mxu0  ;;  %v2076_v61 = vmul.f32 %v5258_v46, %v6689_v55 }
 0x16a   : > { %v5264_v24 = vpop.eup %5263  ;;  %5289 = vpow2.f32 %v4278_v15  ;;  %v4276_v19 = vmul.f32 -1.442695, %v6780_v39  ;;  %v6784_v40 = vadd.f32 %v6701_v11, %v4772_v18  ;;  %4893 = vmatprep.mubr.bf16.mxu1 %v2174_v30  ;;  %v2074_v45 = vmul.f32 %v5262_v21, %v6695_v9 }
 0x16b   : > { %v5266_v37 = vpop.eup %5265  ;;  %5291 = vrcp.f32 %v1700_v23  ;;  %v1698_v29 = vadd.f32 1.0, %v5264_v24  ;;  %v1018_v31 = vpop.f32.mrf.mxu0 }
 0x16c   : > { %v5268_v32 = vpop.eup %5267  ;;  %5293 = vpow2.f32 %v4276_v19  ;;  %v4279_v16 = vmul.f32 -1.442695, %v6784_v40  ;;  %v6788_v6 = vadd.f32 %v6701_v11, %v1018_v31  ;;  %4894 = vmatmul.mubr.bf16.gmra.mxu1 %v2175_v44  ;;  %v2077_v22 = vmul.f32 %v5266_v37, %v6704_v49 }
 0x16d   : > { %v5270_v5 = vpop.eup %5269  ;;  %5295 = vrcp.f32 %v1698_v29  ;;  %v1701_v33 = vadd.f32 1.0, %v5268_v32  ;;  %v4775_v57 = vpop.f32.mrf.mxu0 }
 0x16e   : > { %v5272_v41 = vpop.eup %5271  ;;  %v2075_v50 = vmul.f32 %v5270_v5, %v6708_v13  ;;  %5297 = vpow2.f32 %v4279_v16  ;;  %v4277_v62 = vmul.f32 -1.442695, %v6788_v6  ;;  %v6794_v53 = vadd.f32 %v6701_v11, %v4775_v57 }
 0x16f   : > { %v5274_v42 = vpop.eup %5273  ;;  %5299 = vrcp.f32 %v1701_v33  ;;  %v1699_v63 = vadd.f32 1.0, %v5272_v41  ;;  %v1031_v49 = vpop.f32.mrf.mxu0  ;;  %v2177_v38 = vpack.c.bf16 %v2077_v22, %v2076_v61 }
 0x170   : > { %v5276_v2 = vpop.eup %5275  ;;  %v1704_v54 = vadd.f32 1.0, %v5274_v42  ;;  %5301 = vpow2.f32 %v4277_v62  ;;  %v4282_v58 = vmul.f32 -1.442695, %v6794_v53  ;;  %v6800_v13 = vadd.f32 %v6701_v11, %v1031_v49 }
 0x171   : > { %v5278_v59 = vpop.eup %5277  ;;  %5303 = vrcp.f32 %v1699_v63  ;;  %v4776_v1 = vpop.f32.mrf.mxu0  ;;  %v2176_v56 = vpack.c.bf16 %v2075_v50, %v2074_v45  ;;  %v2080_v24 = vmul.f32 %v5276_v2, %v6714_v26 }
 0x172   : > { %v5280_v35 = vpop.eup %5279  ;;  %5305 = vrcp.f32 %v1704_v54  ;;  %v1702_v55 = vadd.f32 1.0, %v5278_v59  ;;  %v4280_v9 = vmul.f32 -1.442695, %v6800_v13  ;;  %v6804_v14 = vadd.f32 %v6701_v11, %v4776_v1 }
 0x173   : > { %v5282_v4 = vpop.eup %5281  ;;  %5307 = vpow2.f32 %v4282_v58  ;;  %4897 = vmatprep.mubr.bf16.mxu1 %v2176_v56  ;;  %v1034_v7 = vpop.f32.mrf.mxu0  ;;  %v2078_v19 = vmul.f32 %v5280_v35, %v6720_v51 }
 0x174   : > { %v5284_v12 = vpop.eup %5283  ;;  %5309 = vrcp.f32 %v1702_v55  ;;  %v1705_v46 = vadd.f32 1.0, %v5282_v4  ;;  %v4283_v0 = vmul.f32 -1.442695, %v6804_v14  ;;  %v6808_v60 = vadd.f32 %v6701_v11, %v1034_v7  ;;  %4898 = vmatmul.mubr.bf16.gmra.mxu1 %v2177_v38 }
 0x175   : > { %v5286_v17 = vpop.eup %5285  ;;  %v2081_v10 = vmul.f32 %v5284_v12, %v6724_v48  ;;  %5311 = vpow2.f32 %v4280_v9  ;;  %v4779_v36 = vpop.f32.mrf.mxu0 }
 0x176   : > { %v5288_v15 = vpop.eup %5287  ;;  %5313 = vrcp.f32 %v1705_v46  ;;  %v1703_v21 = vadd.f32 1.0, %v5286_v17  ;;  %v4281_v23 = vmul.f32 -1.442695, %v6808_v60  ;;  %v6813_v18 = vadd.f32 %v6701_v11, %v4779_v36 }
 0x177   : > { %v5290_v30 = vpop.eup %5289  ;;  %v2079_v44 = vmul.f32 %v5288_v15, %v6728_v28  ;;  %5315 = vpow2.f32 %v4283_v0  ;;  %v1047_v37 = vpop.f32.mrf.mxu0  ;;  %v2179_v33 = vpack.c.bf16 %v2081_v10, %v2080_v24 }
 0x178   : > { %v5292_v48 = vpop.eup %5291  ;;  %5317 = vrcp.f32 %v1703_v21  ;;  %v1708_v29 = vadd.f32 1.0, %v5290_v30  ;;  %v4286_v31 = vmul.f32 -1.442695, %v6813_v18  ;;  %v6820_v32 = vadd.f32 %v6701_v11, %v1047_v37 }
 0x179   : > { %v5294_v16 = vpop.eup %5293  ;;  %5319 = vpow2.f32 %v4281_v23  ;;  %v4780_v5 = vpop.f32.mrf.mxu0  ;;  %v2178_v22 = vpack.c.bf16 %v2079_v44, %v2078_v19 }
 0x17a   : > { %v5296_v26 = vpop.eup %5295  ;;  %5321 = vrcp.f32 %v1708_v29  ;;  %v1706_v51 = vadd.f32 1.0, %v5294_v16  ;;  %v4284_v28 = vmul.f32 -1.442695, %v6820_v32  ;;  %v6824_v57 = vadd.f32 %v6701_v11, %v4780_v5 }
 0x17b   : > { %v5298_v41 = vpop.eup %5297  ;;  %5323 = vpow2.f32 %v4286_v31  ;;  %4901 = vmatprep.mubr.bf16.mxu1 %v2178_v22  ;;  %v1050_v50 = vpop.f32.mrf.mxu0  ;;  %v2082_v38 = vmul.f32 %v5296_v26, %v6740_v8 }
 0x17c   : > { %v5300_v62 = vpop.eup %5299  ;;  %5325 = vrcp.f32 %v1706_v51  ;;  %v1709_v42 = vadd.f32 1.0, %v5298_v41  ;;  %v4287_v61 = vmul.f32 -1.442695, %v6824_v57  ;;  %v6828_v45 = vadd.f32 %v6701_v11, %v1050_v50  ;;  %4902 = vmatmul.mubr.bf16.gmra.mxu1 %v2179_v33 }
 0x17d   : > { %v5302_v63 = vpop.eup %5301  ;;  %v2085_v49 = vmul.f32 %v5300_v62, %v6744_v27  ;;  %5327 = vpow2.f32 %v4284_v28  ;;  %v4783_v2 = vpop.f32.mrf.mxu0  ;;  %v2084_v27 = vmul.f32 %v5292_v48, %v6733_v52 }
 0x17e   : > { %v5304_v54 = vpop.eup %5303  ;;  %5329 = vrcp.f32 %v1709_v42  ;;  %v1707_v58 = vadd.f32 1.0, %v5302_v63  ;;  %v4285_v59 = vmul.f32 -1.442695, %v6828_v45  ;;  %v6833_v1 = vadd.f32 %v6701_v11, %v4783_v2 }
 0x17f   : > { %v5306_v56 = vpop.eup %5305  ;;  %v2083_v35 = vmul.f32 %v5304_v54, %v6748_v20  ;;  %5331 = vpow2.f32 %v4287_v61  ;;  %v1063_v55 = vpop.f32.mrf.mxu0  ;;  %v2181_v36 = vpack.c.bf16 %v2085_v49, %v2084_v27 }
 0x180   : > { %v5308_v9 = vpop.eup %5307  ;;  %5333 = vrcp.f32 %v1707_v58  ;;  %v4290_v4 = vmul.f32 -1.442695, %v6833_v1  ;;  %v6840_v7 = vadd.f32 %v6701_v11, %v1063_v55 }
 0x181   : > { %v5310_v12 = vpop.eup %5309  ;;  %v1712_v46 = vadd.f32 1.0, %v5308_v9  ;;  %5335 = vpow2.f32 %v4285_v59  ;;  %v4784_v0 = vpop.f32.mrf.mxu0  ;;  %v2180_v17 = vpack.c.bf16 %v2083_v35, %v2082_v38 }
 0x182   : > { %v5312_v10 = vpop.eup %5311  ;;  %5337 = vpow2.f32 %v4290_v4  ;;  %v4288_v8 = vmul.f32 -1.442695, %v6840_v7  ;;  %v6844_v20 = vadd.f32 %v6701_v11, %v4784_v0  ;;  %v2086_v33 = vmul.f32 %v5310_v12, %v6760_v43 }
 0x183   : > { %v5314_v52 = vpop.eup %5313  ;;  %5339 = vrcp.f32 %v1712_v46  ;;  %v1710_v15 = vadd.f32 1.0, %v5312_v10  ;;  %4905 = vmatprep.mubr.bf16.mxu1 %v2180_v17  ;;  %v1066_v21 = vpop.f32.mrf.mxu0 }
 0x184   : > { %v5316_v23 = vpop.eup %5315  ;;  %5341 = vpow2.f32 %v4288_v8  ;;  %v4291_v30 = vmul.f32 -1.442695, %v6844_v20  ;;  %v6848_v24 = vadd.f32 %v6701_v11, %v1066_v21  ;;  %4906 = vmatmul.mubr.bf16.gmra.mxu1 %v2181_v36  ;;  %v2089_v44 = vmul.f32 %v5314_v52, %v6764_v47 }
 0x185   : > { %v5318_v19 = vpop.eup %5317  ;;  %5343 = vrcp.f32 %v1710_v15  ;;  %v1713_v37 = vadd.f32 1.0, %v5316_v23  ;;  %v4787_v48 = vpop.f32.mrf.mxu0  ;;  %v2088_v47 = vmul.f32 %v5306_v56, %v6753_v34 }
 0x186   : > { %v5320_v29 = vpop.eup %5319  ;;  %v2087_v31 = vmul.f32 %v5318_v19, %v6768_v3  ;;  %5345 = vpow2.f32 %v4291_v30  ;;  %v4289_v16 = vmul.f32 -1.442695, %v6848_v24  ;;  %v6854_v5 = vadd.f32 %v6701_v11, %v4787_v48 }
 0x187   : > { %v5322_v22 = vpop.eup %5321  ;;  %5347 = vrcp.f32 %v1713_v37  ;;  %v1711_v26 = vadd.f32 1.0, %v5320_v29  ;;  %v1079_v51 = vpop.f32.mrf.mxu0  ;;  %v2183_v2 = vpack.c.bf16 %v2089_v44, %v2088_v47 }
 0x188   : > { %v5324_v28 = vpop.eup %5323  ;;  %5349 = vpow2.f32 %v4289_v16  ;;  %v4294_v41 = vmul.f32 -1.442695, %v6854_v5  ;;  %v6860_v3 = vadd.f32 %v6701_v11, %v1079_v51  ;;  %v2182_v61 = vpack.c.bf16 %v2087_v31, %v2086_v33 }
 0x189   : > { %v5326_v50 = vpop.eup %5325  ;;  %5351 = vrcp.f32 %v1711_v26  ;;  %v1716_v62 = vadd.f32 1.0, %v5324_v28  ;;  %v4788_v42 = vpop.f32.mrf.mxu0  ;;  %v2092_v10 = vmul.f32 %v5322_v22, %v6774_v25 }
 0x18a   : > { %v5328_v63 = vpop.eup %5327  ;;  %5353 = vpow2.f32 %v4294_v41  ;;  %v4292_v43 = vmul.f32 -1.442695, %v6860_v3  ;;  %v6864_v49 = vadd.f32 %v6701_v11, %v4788_v42  ;;  %4909 = vmatprep.mubr.bf16.mxu1 %v2182_v61  ;;  %v2090_v8 = vmul.f32 %v5326_v50, %v6780_v39 }
 0x18b   : > { %v5330_v34 = vpop.eup %5329  ;;  %5355 = vrcp.f32 %v1716_v62  ;;  %v1714_v54 = vadd.f32 1.0, %v5328_v63  ;;  %v1082_v58 = vpop.f32.mrf.mxu0 }
 0x18c   : > { %v5332_v59 = vpop.eup %5331  ;;  %5357 = vpow2.f32 %v4292_v43  ;;  %v4295_v56 = vmul.f32 -1.442695, %v6864_v49  ;;  %v6868_v38 = vadd.f32 %v6701_v11, %v1082_v58  ;;  %4910 = vmatmul.mubr.bf16.gmra.mxu1 %v2183_v2  ;;  %v2093_v55 = vmul.f32 %v5330_v34, %v6784_v40 }
 0x18d   : > { %v5334_v35 = vpop.eup %5333  ;;  %5359 = vrcp.f32 %v1714_v54  ;;  %v1717_v9 = vadd.f32 1.0, %v5332_v59  ;;  %v4791_v27 = vpop.f32.mrf.mxu0 }
 0x18e   : > { %v5336_v4 = vpop.eup %5335  ;;  %v2091_v12 = vmul.f32 %v5334_v35, %v6788_v6  ;;  %5361 = vpow2.f32 %v4295_v56  ;;  %v4293_v46 = vmul.f32 -1.442695, %v6868_v38  ;;  %v6874_v0 = vadd.f32 %v6701_v11, %v4791_v27 }
 0x18f   : > { %v5338_v17 = vpop.eup %5337  ;;  %5363 = vrcp.f32 %v1717_v9  ;;  %v1715_v36 = vadd.f32 1.0, %v5336_v4  ;;  %v1095_v40 = vpop.f32.mrf.mxu0  ;;  %v2185_v44 = vpack.c.bf16 %v2093_v55, %v2092_v10 }
 0x190   : > { %v5340_v52 = vpop.eup %5339  ;;  %v1720_v15 = vadd.f32 1.0, %v5338_v17  ;;  %5365 = vpow2.f32 %v4293_v46  ;;  %v4298_v21 = vmul.f32 -1.442695, %v6874_v0  ;;  %v6880_v6 = vadd.f32 %v6701_v11, %v1095_v40 }
 0x191   : > { %v5342_v23 = vpop.eup %5341  ;;  %5367 = vrcp.f32 %v1715_v36  ;;  %v4792_v30 = vpop.f32.mrf.mxu0  ;;  %v2184_v19 = vpack.c.bf16 %v2091_v12, %v2090_v8  ;;  %v2096_v63 = vmul.f32 %v5340_v52, %v6794_v53 }
 0x192   : > { %v5344_v37 = vpop.eup %5343  ;;  %5369 = vrcp.f32 %v1720_v15  ;;  %v1718_v25 = vadd.f32 1.0, %v5342_v23  ;;  %v4296_v39 = vmul.f32 -1.442695, %v6880_v6  ;;  %v6884_v48 = vadd.f32 %v6701_v11, %v4792_v30 }
 0x193   : > { %v5346_v29 = vpop.eup %5345  ;;  %5371 = vpow2.f32 %v4298_v21  ;;  %4913 = vmatprep.mubr.bf16.mxu1 %v2184_v19  ;;  %v1098_v31 = vpop.f32.mrf.mxu0  ;;  %v2094_v43 = vmul.f32 %v5344_v37, %v6800_v13 }
 0x194   : > { %v5348_v16 = vpop.eup %5347  ;;  %5373 = vrcp.f32 %v1718_v25  ;;  %v1721_v22 = vadd.f32 1.0, %v5346_v29  ;;  %v4299_v33 = vmul.f32 -1.442695, %v6884_v48  ;;  %v6888_v26 = vadd.f32 %v6701_v11, %v1098_v31  ;;  %4914 = vmatmul.mubr.bf16.gmra.mxu1 %v2185_v44 }
 0x195   : > { %v5350_v51 = vpop.eup %5349  ;;  %v2097_v28 = vmul.f32 %v5348_v16, %v6804_v14  ;;  %5375 = vpow2.f32 %v4296_v39  ;;  %v4795_v47 = vpop.f32.mrf.mxu0 }
 0x196   : > { %v5352_v41 = vpop.eup %5351  ;;  %5377 = vrcp.f32 %v1721_v22  ;;  %v1719_v50 = vadd.f32 1.0, %v5350_v51  ;;  %v4297_v62 = vmul.f32 -1.442695, %v6888_v26  ;;  %v6893_v42 = vadd.f32 %v6701_v11, %v4795_v47 }
 0x197   : > { %v5354_v61 = vpop.eup %5353  ;;  %v2095_v2 = vmul.f32 %v5352_v41, %v6808_v60  ;;  %5379 = vpow2.f32 %v4299_v33  ;;  %v1111_v34 = vpop.f32.mrf.mxu0  ;;  %v2187_v9 = vpack.c.bf16 %v2097_v28, %v2096_v63 }
 0x198   : > { %v5356_v14 = vpop.eup %5355  ;;  %5381 = vrcp.f32 %v1719_v50  ;;  %v1724_v54 = vadd.f32 1.0, %v5354_v61  ;;  %v4302_v58 = vmul.f32 -1.442695, %v6893_v42  ;;  %v6900_v59 = vadd.f32 %v6701_v11, %v1111_v34 }
 0x199   : > { %v5358_v56 = vpop.eup %5357  ;;  %5383 = vpow2.f32 %v4297_v62  ;;  %v4796_v35 = vpop.f32.mrf.mxu0  ;;  %v2186_v55 = vpack.c.bf16 %v2095_v2, %v2094_v43 }
 0x19a   : > { %v5360_v53 = vpop.eup %5359  ;;  %5385 = vrcp.f32 %v1724_v54  ;;  %v1722_v13 = vadd.f32 1.0, %v5358_v56  ;;  %v4300_v60 = vmul.f32 -1.442695, %v6900_v59  ;;  %v6904_v27 = vadd.f32 %v6701_v11, %v4796_v35 }
 0x19b   : > { %v5362_v4 = vpop.eup %5361  ;;  %5387 = vpow2.f32 %v4302_v58  ;;  %4917 = vmatprep.mubr.bf16.mxu1 %v2186_v55  ;;  %v1114_v12 = vpop.f32.mrf.mxu0  ;;  %v2098_v44 = vmul.f32 %v5360_v53, %v6820_v32 }
 0x19c   : > { %v5364_v46 = vpop.eup %5363  ;;  %5389 = vrcp.f32 %v1722_v13  ;;  %v1725_v17 = vadd.f32 1.0, %v5362_v4  ;;  %v4303_v10 = vmul.f32 -1.442695, %v6904_v27  ;;  %v6908_v8 = vadd.f32 %v6701_v11, %v1114_v12  ;;  %4918 = vmatmul.mubr.bf16.gmra.mxu1 %v2187_v9 }
 0x19d   : > { %v5366_v36 = vpop.eup %5365  ;;  %v2101_v40 = vmul.f32 %v5364_v46, %v6824_v57  ;;  %5391 = vpow2.f32 %v4300_v60  ;;  %v4799_v52 = vpop.f32.mrf.mxu0  ;;  %v2100_v57 = vmul.f32 %v5356_v14, %v6813_v18 }
 0x19e   : > { %v5368_v15 = vpop.eup %5367  ;;  %5393 = vrcp.f32 %v1725_v17  ;;  %v1723_v21 = vadd.f32 1.0, %v5366_v36  ;;  %v4301_v23 = vmul.f32 -1.442695, %v6908_v8  ;;  %v6913_v30 = vadd.f32 %v6701_v11, %v4799_v52 }
 0x19f   : > { %v5370_v19 = vpop.eup %5369  ;;  %v2099_v37 = vmul.f32 %v5368_v15, %v6828_v45  ;;  %5395 = vpow2.f32 %v4303_v10  ;;  %v1127_v25 = vpop.f32.mrf.mxu0  ;;  %v2189_v47 = vpack.c.bf16 %v2101_v40, %v2100_v57 }
 0x1a0   : > { %v5372_v39 = vpop.eup %5371  ;;  %5397 = vrcp.f32 %v1723_v21  ;;  %v4306_v29 = vmul.f32 -1.442695, %v6913_v30  ;;  %v6920_v31 = vadd.f32 %v6701_v11, %v1127_v25 }
 0x1a1   : > { %v5374_v16 = vpop.eup %5373  ;;  %v1728_v22 = vadd.f32 1.0, %v5372_v39  ;;  %5399 = vpow2.f32 %v4301_v23  ;;  %v4800_v33 = vpop.f32.mrf.mxu0  ;;  %v2188_v51 = vpack.c.bf16 %v2099_v37, %v2098_v44 }
 0x1a2   : > { %v5376_v28 = vpop.eup %5375  ;;  %5401 = vpow2.f32 %v4306_v29  ;;  %v4304_v32 = vmul.f32 -1.442695, %v6920_v31  ;;  %v6924_v45 = vadd.f32 %v6701_v11, %v4800_v33  ;;  %v2102_v9 = vmul.f32 %v5374_v16, %v6840_v7 }
 0x1a3   : > { %v5378_v18 = vpop.eup %5377  ;;  %5403 = vrcp.f32 %v1728_v22  ;;  %v1726_v41 = vadd.f32 1.0, %v5376_v28  ;;  %4921 = vmatprep.mubr.bf16.mxu1 %v2188_v51  ;;  %v1130_v50 = vpop.f32.mrf.mxu0 }
 0x1a4   : > { %v5380_v62 = vpop.eup %5379  ;;  %5405 = vpow2.f32 %v4304_v32  ;;  %v4307_v61 = vmul.f32 -1.442695, %v6924_v45  ;;  %v6928_v63 = vadd.f32 %v6701_v11, %v1130_v50  ;;  %4922 = vmatmul.mubr.bf16.gmra.mxu1 %v2189_v47  ;;  %v2105_v2 = vmul.f32 %v5378_v18, %v6844_v20 }
 0x1a5   : > { %v5382_v43 = vpop.eup %5381  ;;  %5407 = vrcp.f32 %v1726_v41  ;;  %v1729_v34 = vadd.f32 1.0, %v5380_v62  ;;  %v4803_v14 = vpop.f32.mrf.mxu0  ;;  %v2104_v20 = vmul.f32 %v5370_v19, %v6833_v1 }
 0x1a6   : > { %v5384_v54 = vpop.eup %5383  ;;  %v2103_v58 = vmul.f32 %v5382_v43, %v6848_v24  ;;  %5409 = vpow2.f32 %v4307_v61  ;;  %v4305_v56 = vmul.f32 -1.442695, %v6928_v63  ;;  %v6934_v35 = vadd.f32 %v6701_v11, %v4803_v14 }
 0x1a7   : > { %v5386_v55 = vpop.eup %5385  ;;  %5411 = vrcp.f32 %v1729_v34  ;;  %v1727_v53 = vadd.f32 1.0, %v5384_v54  ;;  %v1143_v13 = vpop.f32.mrf.mxu0  ;;  %v2191_v52 = vpack.c.bf16 %v2105_v2, %v2104_v20 }
 0x1a8   : > { %v5388_v60 = vpop.eup %5387  ;;  %5413 = vpow2.f32 %v4305_v56  ;;  %v4310_v4 = vmul.f32 -1.442695, %v6934_v35  ;;  %v6940_v24 = vadd.f32 %v6701_v11, %v1143_v13  ;;  %v2190_v10 = vpack.c.bf16 %v2103_v58, %v2102_v9 }
 0x1a9   : > { %v5390_v12 = vpop.eup %5389  ;;  %5415 = vrcp.f32 %v1727_v53  ;;  %v1732_v46 = vadd.f32 1.0, %v5388_v60  ;;  %v4804_v17 = vpop.f32.mrf.mxu0  ;;  %v2108_v28 = vmul.f32 %v5386_v55, %v6854_v5 }
 0x1aa   : > { %v5392_v36 = vpop.eup %5391  ;;  %5417 = vpow2.f32 %v4310_v4  ;;  %v4308_v7 = vmul.f32 -1.442695, %v6940_v24  ;;  %v6944_v40 = vadd.f32 %v6701_v11, %v4804_v17  ;;  %4925 = vmatprep.mubr.bf16.mxu1 %v2190_v10  ;;  %v2106_v32 = vmul.f32 %v5390_v12, %v6860_v3 }
 0x1ab   : > { %v5394_v1 = vpop.eup %5393  ;;  %5419 = vrcp.f32 %v1732_v46  ;;  %v1730_v15 = vadd.f32 1.0, %v5392_v36  ;;  %v1146_v21 = vpop.f32.mrf.mxu0 }
 0x1ac   : > { %v5396_v23 = vpop.eup %5395  ;;  %5421 = vpow2.f32 %v4308_v7  ;;  %v4311_v19 = vmul.f32 -1.442695, %v6944_v40  ;;  %v6948_v44 = vadd.f32 %v6701_v11, %v1146_v21  ;;  %4926 = vmatmul.mubr.bf16.gmra.mxu1 %v2191_v52  ;;  %v2109_v25 = vmul.f32 %v5394_v1, %v6864_v49 }
 0x1ad   : > { %v5398_v37 = vpop.eup %5397  ;;  %5423 = vrcp.f32 %v1730_v15  ;;  %v1733_v39 = vadd.f32 1.0, %v5396_v23  ;;  %v4807_v57 = vpop.f32.mrf.mxu0 }
 0x1ae   : > { %v5400_v29 = vpop.eup %5399  ;;  %v2107_v16 = vmul.f32 %v5398_v37, %v6868_v38  ;;  %5425 = vpow2.f32 %v4311_v19  ;;  %v4309_v22 = vmul.f32 -1.442695, %v6948_v44  ;;  %v6954_v33 = vadd.f32 %v6701_v11, %v4807_v57  ;;  %v6962_v38 = vld [vmem:[%s8449_s2] ss:$0 sm:$0xff] }
 0x1af   : > { %v5402_v51 = vpop.eup %5401  ;;  %5427 = vrcp.f32 %v1733_v39  ;;  %v1731_v47 = vadd.f32 1.0, %v5400_v29  ;;  %v1159_v49 = vpop.f32.mrf.mxu0  ;;  %v2193_v61 = vpack.c.bf16 %v2109_v25, %v2108_v28 }
 0x1b0   : > { %v5404_v18 = vpop.eup %5403  ;;  %v1736_v41 = vadd.f32 1.0, %v5402_v51  ;;  %5429 = vpow2.f32 %v4309_v22  ;;  %v4314_v50 = vmul.f32 -1.442695, %v6954_v33  ;;  %v6965_v11 = vadd.f32 %v6962_v38, %v1159_v49 }
 0x1b1   : > { %v5406_v62 = vpop.eup %5405  ;;  %5431 = vrcp.f32 %v1731_v47  ;;  %v4808_v5 = vpop.f32.mrf.mxu0  ;;  %v2192_v3 = vpack.c.bf16 %v2107_v16, %v2106_v32  ;;  %v2112_v36 = vmul.f32 %v5404_v18, %v6874_v0 }
 0x1b2   : > { %v5408_v43 = vpop.eup %5407  ;;  %5433 = vrcp.f32 %v1736_v41  ;;  %v1734_v2 = vadd.f32 1.0, %v5406_v62  ;;  %v4312_v34 = vmul.f32 -1.442695, %v6965_v11  ;;  %v6969_v14 = vadd.f32 %v6962_v38, %v4808_v5 }
 0x1b3   : > { %v5410_v54 = vpop.eup %5409  ;;  %5435 = vpow2.f32 %v4314_v50  ;;  %4929 = vmatprep.mubr.bf16.mxu1 %v2192_v3  ;;  %v1162_v58 = vpop.f32.mrf.mxu0  ;;  %v2110_v7 = vmul.f32 %v5408_v43, %v6880_v6 }
 0x1b4   : > { %v5412_v56 = vpop.eup %5411  ;;  %5437 = vrcp.f32 %v1734_v2  ;;  %v1737_v55 = vadd.f32 1.0, %v5410_v54  ;;  %v4315_v9 = vmul.f32 -1.442695, %v6969_v14  ;;  %v6973_v53 = vadd.f32 %v6962_v38, %v1162_v58  ;;  %4930 = vmatmul.mubr.bf16.gmra.mxu1 %v2193_v61 }
 0x1b5   : > { %v5414_v13 = vpop.eup %5413  ;;  %v2113_v60 = vmul.f32 %v5412_v56, %v6884_v48  ;;  %5439 = vpow2.f32 %v4312_v34  ;;  %v4811_v20 = vpop.f32.mrf.mxu0 }
 0x1b6   : > { %v5416_v4 = vpop.eup %5415  ;;  %5441 = vrcp.f32 %v1737_v55  ;;  %v1735_v12 = vadd.f32 1.0, %v5414_v13  ;;  %v4313_v46 = vmul.f32 -1.442695, %v6973_v53  ;;  %v6978_v17 = vadd.f32 %v6962_v38, %v4811_v20 }
 0x1b7   : > { %v5418_v10 = vpop.eup %5417  ;;  %v2111_v52 = vmul.f32 %v5416_v4, %v6888_v26  ;;  %5443 = vpow2.f32 %v4315_v9  ;;  %v1175_v1 = vpop.f32.mrf.mxu0  ;;  %v2195_v39 = vpack.c.bf16 %v2113_v60, %v2112_v36 }
 0x1b8   : > { %v5420_v48 = vpop.eup %5419  ;;  %5445 = vrcp.f32 %v1735_v12  ;;  %v1740_v15 = vadd.f32 1.0, %v5418_v10  ;;  %v4318_v21 = vmul.f32 -1.442695, %v6978_v17  ;;  %v6985_v23 = vadd.f32 %v6962_v38, %v1175_v1 }
 0x1b9   : > { %v5422_v19 = vpop.eup %5421  ;;  %5447 = vpow2.f32 %v4313_v46  ;;  %v4812_v37 = vpop.f32.mrf.mxu0  ;;  %v2194_v25 = vpack.c.bf16 %v2111_v52, %v2110_v7 }
 0x1ba   : > { %v5424_v0 = vpop.eup %5423  ;;  %5449 = vrcp.f32 %v1740_v15  ;;  %v1738_v6 = vadd.f32 1.0, %v5422_v19  ;;  %v4316_v26 = vmul.f32 -1.442695, %v6985_v23  ;;  %v6989_v57 = vadd.f32 %v6962_v38, %v4812_v37 }
 0x1bb   : > { %v5426_v29 = vpop.eup %5425  ;;  %5451 = vpow2.f32 %v4318_v21  ;;  %4933 = vmatprep.mubr.bf16.mxu1 %v2194_v25  ;;  %v1178_v16 = vpop.f32.mrf.mxu0  ;;  %v2114_v61 = vmul.f32 %v5424_v0, %v6900_v59 }
 0x1bc   : > { %v5428_v22 = vpop.eup %5427  ;;  %5453 = vrcp.f32 %v1738_v6  ;;  %v1741_v51 = vadd.f32 1.0, %v5426_v29  ;;  %v4319_v28 = vmul.f32 -1.442695, %v6989_v57  ;;  %v6993_v32 = vadd.f32 %v6962_v38, %v1178_v16  ;;  %4934 = vmatmul.mubr.bf16.gmra.mxu1 %v2195_v39 }
 0x1bd   : > { %v5430_v47 = vpop.eup %5429  ;;  %v2117_v49 = vmul.f32 %v5428_v22, %v6904_v27  ;;  %5455 = vpow2.f32 %v4316_v26  ;;  %v4815_v18 = vpop.f32.mrf.mxu0  ;;  %v2116_v27 = vmul.f32 %v5420_v48, %v6893_v42 }
 0x1be   : > { %v5432_v41 = vpop.eup %5431  ;;  %5457 = vrcp.f32 %v1741_v51  ;;  %v1739_v50 = vadd.f32 1.0, %v5430_v47  ;;  %v4317_v62 = vmul.f32 -1.442695, %v6993_v32  ;;  %v6998_v5 = vadd.f32 %v6962_v38, %v4815_v18 }
 0x1bf   : > { %v5434_v3 = vpop.eup %5433  ;;  %v2115_v43 = vmul.f32 %v5432_v41, %v6908_v8  ;;  %5459 = vpow2.f32 %v4319_v28  ;;  %v1191_v2 = vpop.f32.mrf.mxu0  ;;  %v2197_v20 = vpack.c.bf16 %v2117_v49, %v2116_v27 }
 0x1c0   : > { %v5436_v34 = vpop.eup %5435  ;;  %5461 = vrcp.f32 %v1739_v50  ;;  %v4322_v54 = vmul.f32 -1.442695, %v6998_v5  ;;  %v7005_v58 = vadd.f32 %v6962_v38, %v1191_v2  ;;  %v2120_v26 = vmul.f32 %v5434_v3, %v6913_v30  ;;  %v7036_v30 = vld [vmem:[%s8451_s4] ss:$0 sm:$0xff] }
 0x1c1   : > { %v5438_v56 = vpop.eup %5437  ;;  %v1744_v55 = vadd.f32 1.0, %v5436_v34  ;;  %5463 = vpow2.f32 %v4317_v62  ;;  %v4816_v9 = vpop.f32.mrf.mxu0  ;;  %v2196_v13 = vpack.c.bf16 %v2115_v43, %v2114_v61 }
 0x1c2   : > { %v5440_v60 = vpop.eup %5439  ;;  %5465 = vpow2.f32 %v4322_v54  ;;  %v4320_v59 = vmul.f32 -1.442695, %v7005_v58  ;;  %v7009_v8 = vadd.f32 %v6962_v38, %v4816_v9  ;;  %v2118_v39 = vmul.f32 %v5438_v56, %v6920_v31 }
 0x1c3   : > { %v5442_v42 = vpop.eup %5441  ;;  %5467 = vrcp.f32 %v1744_v55  ;;  %v1742_v4 = vadd.f32 1.0, %v5440_v60  ;;  %4937 = vmatprep.mubr.bf16.mxu1 %v2196_v13  ;;  %v1194_v12 = vpop.f32.mrf.mxu0 }
 0x1c4   : > { %v5444_v46 = vpop.eup %5443  ;;  %5469 = vpow2.f32 %v4320_v59  ;;  %v4323_v10 = vmul.f32 -1.442695, %v7009_v8  ;;  %v7013_v36 = vadd.f32 %v6962_v38, %v1194_v12  ;;  %4938 = vmatmul.mubr.bf16.gmra.mxu1 %v2197_v20  ;;  %v2121_v52 = vmul.f32 %v5442_v42, %v6924_v45 }
 0x1c5   : > { %v5446_v7 = vpop.eup %5445  ;;  %5471 = vrcp.f32 %v1742_v4  ;;  %v1745_v1 = vadd.f32 1.0, %v5444_v46  ;;  %v4819_v48 = vpop.f32.mrf.mxu0 }
 0x1c6   : > { %v5448_v15 = vpop.eup %5447  ;;  %v2119_v21 = vmul.f32 %v5446_v7, %v6928_v63  ;;  %5473 = vpow2.f32 %v4323_v10  ;;  %v4321_v19 = vmul.f32 -1.442695, %v7013_v36  ;;  %v7019_v37 = vadd.f32 %v6962_v38, %v4819_v48 }
 0x1c7   : > { %v7021_v25 = vpop.eup %5449  ;;  %5475 = vrcp.f32 %v1745_v1  ;;  %v1743_v0 = vadd.f32 1.0, %v5448_v15  ;;  %v1207_v6 = vpop.f32.mrf.mxu0  ;;  %v2199_v18 = vpack.c.bf16 %v2121_v52, %v2120_v26 }
 0x1c8   : > { %v5452_v45 = vpop.eup %5451  ;;  %5477 = vpow2.f32 %v4321_v19  ;;  %v4326_v29 = vmul.f32 -1.442695, %v7019_v37  ;;  %v7027_v63 = vadd.f32 %v6962_v38, %v1207_v6  ;;  %v2198_v28 = vpack.c.bf16 %v2119_v21, %v2118_v39 }
 0x1c9   : > { %v5454_v16 = vpop.eup %5453  ;;  %5479 = vrcp.f32 %v1743_v0  ;;  %v1748_v22 = vadd.f32 1.0, %v5452_v45  ;;  %v4820_v51 = vpop.f32.mrf.mxu0 }
 0x1ca   : > { %v5456_v47 = vpop.eup %5455  ;;  %5481 = vpow2.f32 %v4326_v29  ;;  %v4324_v31 = vmul.f32 -1.442695, %v7027_v63  ;;  %v7031_v49 = vadd.f32 %v6962_v38, %v4820_v51  ;;  %4941 = vmatprep.mubr.bf16.mxu1 %v2198_v28  ;;  %v2122_v39 = vmul.f32 %v5454_v16, %v6940_v24 }
 0x1cb   : > { %v5458_v41 = vpop.eup %5457  ;;  %5483 = vrcp.f32 %v1748_v22  ;;  %v1746_v50 = vadd.f32 1.0, %v5456_v47  ;;  %v1210_v62 = vpop.f32.mrf.mxu0  ;;  %v2124_v51 = vmul.f32 %v7021_v25, %v6934_v35 }
 0x1cc   : > { %v5460_v3 = vpop.eup %5459  ;;  %5485 = vpow2.f32 %v4324_v31  ;;  %v4327_v61 = vmul.f32 -1.442695, %v7031_v49  ;;  %v7040_v43 = vadd.f32 %v6962_v38, %v1210_v62  ;;  %v4847_v2 = vpop.f32.mrf.mxu1  ;;  %4942 = vmatmul.mubr.bf16.gmra.mxu1 %v2199_v18  ;;  %v2125_v0 = vmul.f32 %v5458_v41, %v6944_v40 }
 0x1cd   : > { %v5462_v34 = vpop.eup %5461  ;;  %5487 = vrcp.f32 %v1746_v50  ;;  %v1749_v27 = vadd.f32 1.0, %v5460_v3  ;;  %v7043_v54 = vadd.f32 %v4847_v2, %v7036_v30  ;;  %v4823_v56 = vpop.f32.mrf.mxu0 }
 0x1ce   : > { %v5464_v55 = vpop.eup %5463  ;;  %5489 = vpow2.f32 %v4327_v61  ;;  %v4325_v9 = vmul.f32 -1.442695, %v7040_v43  ;;  %v7047_v13 = vadd.f32 %v6962_v38, %v4823_v56  ;;  %v2319_v60 = vpop.f32.mrf.mxu1  ;;  %v2123_v10 = vmul.f32 %v5462_v34, %v6948_v44 }
 0x1cf   : > { %v5466_v59 = vpop.eup %5465  ;;  %5491 = vrcp.f32 %v1749_v27  ;;  %v1747_v20 = vadd.f32 1.0, %v5464_v55  ;;  %v4347_v42 = vmul.f32 -1.442695, %v7043_v54  ;;  %v7051_v4 = vadd.f32 %v7036_v30, %v2319_v60  ;;  %v1223_v12 = vpop.f32.mrf.mxu0 }
 0x1d0   : > { %v7053_v46 = vpop.eup %5467  ;;  %v1752_v7 = vadd.f32 1.0, %v5466_v59  ;;  %5493 = vpow2.f32 %v4325_v9  ;;  %v4848_v52 = vpop.f32.mrf.mxu1  ;;  %v4330_v48 = vmul.f32 -1.442695, %v7047_v13  ;;  %v7058_v15 = vadd.f32 %v6962_v38, %v1223_v12 }
 0x1d1   : > { %v5470_v1 = vpop.eup %5469  ;;  %5495 = vrcp.f32 %v1747_v20  ;;  %v4824_v21 = vpop.f32.mrf.mxu0  ;;  %v4345_v26 = vmul.f32 -1.442695, %v7051_v4  ;;  %v7064_v29 = vadd.f32 %v4848_v52, %v7036_v30  ;;  %v2200_v47 = vpack.c.bf16 %v2123_v10, %v2122_v39 }
 0x1d2   : > { %v5472_v19 = vpop.eup %5471  ;;  %5497 = vrcp.f32 %v1752_v7  ;;  %v1750_v6 = vadd.f32 1.0, %v5470_v1  ;;  %v2322_v45 = vpop.f32.mrf.mxu1  ;;  %v4328_v40 = vmul.f32 -1.442695, %v7058_v15  ;;  %v7070_v31 = vadd.f32 %v6962_v38, %v4824_v21 }
 0x1d3   : > { %v5474_v44 = vpop.eup %5473  ;;  %5499 = vpow2.f32 %v4347_v42  ;;  %v1226_v18 = vpop.f32.mrf.mxu0  ;;  %4945 = vmatprep.mubr.bf16.mxu1 %v2200_v47  ;;  %v2201_v62 = vpack.c.bf16 %v2125_v0, %v2124_v51  ;;  %v4348_v35 = vmul.f32 -1.442695, %v7064_v29  ;;  %v7074_v25 = vadd.f32 %v7036_v30, %v2322_v45 }
 0x1d4   : > { %v5476_v22 = vpop.eup %5475  ;;  %5501 = vrcp.f32 %v1750_v6  ;;  %v1753_v28 = vadd.f32 1.0, %v5474_v44  ;;  %v4851_v24 = vpop.f32.mrf.mxu1  ;;  %v4331_v9 = vmul.f32 -1.442695, %v7070_v31  ;;  %v7081_v60 = vadd.f32 %v6962_v38, %v1226_v18  ;;  %v5025_v44 = vld [vmem:[%s8452_s5] sm:$0xff]  }
 0x1d5   : > { %v5478_v16 = vpop.eup %5477  ;;  %5503 = vpow2.f32 %v4330_v48  ;;  %4946 = vmatmul.mubr.bf16.gmra.mxu1 %v2201_v62  ;;  %v4827_v59 = vpop.f32.mrf.mxu0  ;;  %v7084_v12 = vadd.f32 %v4851_v24, %v7036_v30  ;;  %v2126_v52 = vmul.f32 %v5472_v19, %v6965_v11  ;;  %v4346_v1 = vmul.f32 -1.442695, %v7074_v25  ;;  %3860 = vxpose.xlu0.c.b16.start [1/8] (narrow) %v5025_v44, 16 }
 0x1d6   : > { %v5480_v41 = vpop.eup %5479  ;;  %5505 = vrcp.f32 %v1753_v28  ;;  %v1751_v50 = vadd.f32 1.0, %v5478_v16  ;;  %v2335_v3 = vpop.f32.mrf.mxu1  ;;  %v7092_v39 = vadd.f32 %v6962_v38, %v4827_v59  ;;  %v2128_v45 = vmul.f32 %v7053_v46, %v6954_v33 }
 0x1d7   : > { %v5482_v61 = vpop.eup %5481  ;;  %5507 = vpow2.f32 %v4345_v26  ;;  %v2127_v55 = vmul.f32 %v5480_v41, %v6973_v53  ;;  %v2129_v53 = vmul.f32 %v5476_v22, %v6969_v14  ;;  %v4329_v11 = vmul.f32 -1.442695, %v7081_v60  ;;  %v1239_v19 = vpop.f32.mrf.mxu0 }
 0x1d8   : > { %v7076_v2 = vpop.eup %5483  ;;  %5509 = vrcp.f32 %v1751_v50  ;;  %v1756_v34 = vadd.f32 1.0, %v5482_v61  ;;  %v4852_v27 = vpop.f32.mrf.mxu1  ;;  %v4351_v51 = vmul.f32 -1.442695, %v7084_v12  ;;  %v7104_v28 = vadd.f32 %v7036_v30, %v2335_v3 }
 0x1d9   : > { %v5486_v56 = vpop.eup %5485  ;;  %5511 = vpow2.f32 %v4328_v40  ;;  %v2202_v14 = vpack.c.bf16 %v2127_v55, %v2126_v52  ;;  %v2203_v24 = vpack.c.bf16 %v2129_v53, %v2128_v45  ;;  %v4334_v18 = vmul.f32 -1.442695, %v7092_v39  ;;  %v4828_v61 = vpop.f32.mrf.mxu0 }
 0x1da   : > { %v5488_v20 = vpop.eup %5487  ;;  %5513 = vrcp.f32 %v1756_v34  ;;  %v1754_v42 = vadd.f32 1.0, %v5486_v56  ;;  %v7086_v10 = vpop.f32.mrf.mxu1  ;;  %v7114_v41 = vadd.f32 %v6962_v38, %v1239_v19  ;;  %v4349_v34 = vmul.f32 -1.442695, %v7104_v28 }
 0x1db   : > { %v5490_v7 = vpop.eup %5489  ;;  %5515 = vpow2.f32 %v4348_v35  ;;  %4949 = vmatprep.mubr.bf16.mxu1 %v2202_v14  ;;  %v2130_v40 = vmul.f32 %v5488_v20, %v6985_v23  ;;  %v5026_v23 = vld [vmem:[%s8452_s5 + $0x8] sm:$0xff]   ;;  %v7144_v14 = vadd.f32 %v7036_v30, %v7086_v10 }
 0x1dc   : > { %v5492_v48 = vpop.eup %5491  ;;  %5517 = vrcp.f32 %v1754_v42  ;;  %v1757_v21 = vadd.f32 1.0, %v5490_v7  ;;  %v7094_v0 = vpop.f32.mrf.mxu1  ;;  %3861 = vxpose.xlu0.c.b16.cont [2/8] (narrow) %v5026_v23, 16  ;;  %v4332_v42 = vmul.f32 -1.442695, %v7114_v41  ;;  %v7130_v7 = vadd.f32 %v6962_v38, %v4828_v61 }
 0x1dd   : > { %v5494_v6 = vpop.eup %5493  ;;  %5519 = vpow2.f32 %v4331_v9  ;;  %4950 = vmatmul.mubr.bf16.gmra.mxu1 %v2203_v24  ;;  %v2133_v59 = vmul.f32 %v5492_v48, %v6989_v57  ;;  %v1242_v48 = vpop.f32.mrf.mxu0 }
 0x1de   : > { %v5496_v26 = vpop.eup %5495  ;;  %5521 = vrcp.f32 %v1757_v21  ;;  %v1755_v22 = vadd.f32 1.0, %v5494_v6  ;;  %v7106_v47 = vpop.f32.mrf.mxu1  ;;  %v5027_v6 = vld [vmem:[%s8452_s5 + $0x10] sm:$0xff]  }
 0x1df   : > { %v7108_v33 = vpop.eup %5497  ;;  %v2131_v46 = vmul.f32 %v5496_v26, %v6993_v32  ;;  %5523 = vpow2.f32 %v4346_v1  ;;  %v7119_v32 = vadd.f32 %v4852_v27, %v7036_v30  ;;  %v2132_v1 = vmul.f32 %v7076_v2, %v6978_v17 }
 0x1e0   : > { %v5500_v16 = vpop.eup %5499  ;;  %5525 = vrcp.f32 %v1755_v22  ;;  %v7116_v50 = vpop.f32.mrf.mxu1  ;;  %3862 = vxpose.xlu0.c.b16.cont [3/8] (narrow) %v5027_v6, 16 }
 0x1e1   : > { %v5502_v62 = vpop.eup %5501  ;;  %v3216_v3 = vadd.f32 1.0, %v5500_v16  ;;  %5527 = vpow2.f32 %v4329_v11  ;;  %v2204_v55 = vpack.c.bf16 %v2131_v46, %v2130_v40  ;;  %v4352_v57 = vmul.f32 -1.442695, %v7119_v32  ;;  %v5028_v16 = vld [vmem:[%s8452_s5 + $0x18] sm:$0xff]  }
 0x1e2   : > { %v5504_v35 = vpop.eup %5503  ;;  %5529 = vpow2.f32 %v4351_v51  ;;  %v7125_v56 = vpop.f32.mrf.mxu1  ;;  %v2134_v11 = vmul.f32 %v5502_v62, %v7005_v58  ;;  %v2205_v26 = vpack.c.bf16 %v2133_v59, %v2132_v1  ;;  %v4335_v51 = vmul.f32 -1.442695, %v7130_v7 }
 0x1e3   : > { %v5506_v9 = vpop.eup %5505  ;;  %5531 = vrcp.f32 %v3216_v3  ;;  %v1760_v20 = vadd.f32 1.0, %v5504_v35  ;;  %4953 = vmatprep.mubr.bf16.mxu1 %v2204_v55  ;;  %v7152_v58 = vadd.f32 %v6962_v38, %v1242_v48  ;;  %v2136_v59 = vmul.f32 %v7108_v33, %v6998_v5 }
 0x1e4   : > { %v5508_v27 = vpop.eup %5507  ;;  %5533 = vpow2.f32 %v4334_v18  ;;  %v7132_v52 = vpop.f32.mrf.mxu1  ;;  %v4350_v18 = vmul.f32 -1.442695, %v7144_v14  ;;  %v2137_v3 = vmul.f32 %v5506_v9, %v7009_v8  ;;  %3863 = vxpose.xlu0.c.b16.cont [4/8] (narrow) %v5028_v16, 16  ;;  %v5029_v8 = vld [vmem:[%s8452_s5 + $0x20] sm:$0xff]   ;;  %v7179_v1 = vadd.f32 %v7036_v30, %v7106_v47 }
 0x1e5   : > { %v5510_v53 = vpop.eup %5509  ;;  %5535 = vrcp.f32 %v1760_v20  ;;  %v3214_v21 = vadd.f32 1.0, %v5508_v27  ;;  %4954 = vmatmul.mubr.bf16.gmra.mxu1 %v2205_v26  ;;  %v4333_v35 = vmul.f32 -1.442695, %v7152_v58  ;;  %v7170_v27 = vadd.f32 %v7094_v0, %v7036_v30 }
 0x1e6   : > { %v5512_v45 = vpop.eup %5511  ;;  %v2135_v19 = vmul.f32 %v5510_v53, %v7013_v36  ;;  %5537 = vpow2.f32 %v4349_v34  ;;  %v7146_v17 = vpop.f32.mrf.mxu1  ;;  %v7206_v16 = vadd.f32 %v7132_v52, %v7036_v30 }
 0x1e7   : > { %v7148_v2 = vpop.eup %5513  ;;  %5539 = vrcp.f32 %v3214_v21  ;;  %v1758_v44 = vadd.f32 1.0, %v5512_v45  ;;  %v2207_v21 = vpack.c.bf16 %v2137_v3, %v2136_v59  ;;  %v4355_v47 = vmul.f32 -1.442695, %v7170_v27 }
 0x1e8   : > { %v5516_v22 = vpop.eup %5515  ;;  %5541 = vpow2.f32 %v4332_v42  ;;  %v7154_v36 = vpop.f32.mrf.mxu1  ;;  %v2206_v46 = vpack.c.bf16 %v2135_v19, %v2134_v11  ;;  %3864 = vxpose.xlu0.c.b16.cont [5/8] (narrow) %v5029_v8, 16  ;;  %v5030_v11 = vld [vmem:[%s8452_s5 + $0x28] sm:$0xff]  }
 0x1e9   : > { %v5518_v10 = vpop.eup %5517  ;;  %5543 = vrcp.f32 %v1758_v44  ;;  %v3217_v24 = vadd.f32 1.0, %v5516_v22  ;;  %v4353_v44 = vmul.f32 -1.442695, %v7179_v1 }
 0x1ea   : > { %v5520_v40 = vpop.eup %5519  ;;  %5545 = vpow2.f32 %v4352_v57  ;;  %v7160_v62 = vpop.f32.mrf.mxu1  ;;  %4957 = vmatprep.mubr.bf16.mxu1 %v2206_v46  ;;  %v2138_v42 = vmul.f32 %v5518_v10, %v7027_v63  ;;  %v7185_v63 = vadd.f32 %v7116_v50, %v7036_v30 }
 0x1eb   : > { %v5522_v38 = vpop.eup %5521  ;;  %5547 = vrcp.f32 %v3217_v24  ;;  %v1761_v61 = vadd.f32 1.0, %v5520_v40 }
 0x1ec   : > { %v5524_v23 = vpop.eup %5523  ;;  %5549 = vpow2.f32 %v4335_v51  ;;  %v7164_v34 = vpop.f32.mrf.mxu1  ;;  %v2141_v22 = vmul.f32 %v5522_v38, %v7031_v49  ;;  %v7201_v51 = vadd.f32 %v7036_v30, %v7125_v56  ;;  %3865 = vxpose.xlu0.c.b16.cont [6/8] (narrow) %v5030_v11, 16  ;;  %v4356_v24 = vmul.f32 -1.442695, %v7185_v63  ;;  %v5031_v56 = vld [vmem:[%s8452_s5 + $0x30] sm:$0xff]  }
 0x1ed   : > { %v5526_v55 = vpop.eup %5525  ;;  %5551 = vrcp.f32 %v1761_v61  ;;  %v3215_v20 = vadd.f32 1.0, %v5524_v23  ;;  %4958 = vmatmul.mubr.bf16.gmra.mxu1 %v2207_v21  ;;  %v2140_v49 = vmul.f32 %v7148_v2, %v7019_v37  ;;  %v4359_v37 = vmul.f32 -1.442695, %v7206_v16 }
 0x1ee   : > { %v5528_v9 = vpop.eup %5527  ;;  %v2139_v53 = vmul.f32 %v5526_v55, %v7040_v43  ;;  %5553 = vpow2.f32 %v4350_v18  ;;  %v7181_v5 = vpop.f32.mrf.mxu1  ;;  %v4354_v52 = vmul.f32 -1.442695, %v7201_v51 }
 0x1ef   : > { %v5530_v33 = vpop.eup %5529  ;;  %5555 = vrcp.f32 %v3215_v20  ;;  %v1759_v0 = vadd.f32 1.0, %v5528_v9 }
 0x1f0   : > { %v5532_v57 = vpop.eup %5531  ;;  %v3220_v48 = vadd.f32 1.0, %v5530_v33  ;;  %5557 = vpow2.f32 %v4333_v35  ;;  %v7187_v43 = vpop.f32.mrf.mxu1  ;;  %v2208_v6 = vpack.c.bf16 %v2139_v53, %v2138_v42  ;;  %v2209_v35 = vpack.c.bf16 %v2141_v22, %v2140_v49  ;;  %3866 = vxpose.xlu0.c.b16.cont [7/8] (narrow) %v5031_v56, 16  ;;  %v5032_v53 = vld [vmem:[%s8452_s5 + $0x38] sm:$0xff]  }
 0x1f1   : > { %v5534_v45 = vpop.eup %5533  ;;  %5559 = vrcp.f32 %v1759_v0  ;;  %v7222_v8 = vmul.f32 %v5532_v57, %v7043_v54  ;;  %v7229_v42 = vadd.f32 %v7164_v34, %v7036_v30 }
 0x1f2   : > { %v7193_v19 = vpop.eup %5535  ;;  %v7196_v26 = vpop.f32.mrf.mxu1  ;;  %4961 = vmatprep.mubr.bf16.mxu1 %v2208_v6  ;;  %5561 = vrcp.f32 %v3220_v48  ;;  %v1764_v57 = vadd.f32 1.0, %v5534_v45  ;;  %v7240_v6 = vadd.f32 %v7036_v30, %v7146_v17 }
 0x1f3   : > { %v5538_v50 = vpop.eup %5537  ;;  %5563 = vpow2.f32 %v4355_v47  ;;  %8506 = vst [vmem:[#allocation5_spill] sm:$0xff] %v7222_v8  ;;  %v7244_v47 = vadd.f32 %v7154_v36, %v7036_v30  ;;  %v4363_v22 = vmul.f32 -1.442695, %v7229_v42  ;;  %v7256_v36 = vadd.f32 %v7187_v43, %v7036_v30 }
 0x1f4   : > { %v5540_v46 = vpop.eup %5539  ;;  %v3218_v10 = vadd.f32 1.0, %v5538_v50  ;;  %v7208_v40 = vpop.f32.mrf.mxu1  ;;  %5565 = vpow2.f32 %v4353_v44  ;;  %3867 = vxpose.xlu0.c.b16.end [8/8] (narrow) %v5032_v53, 16 }
 0x1f5   : > { %v5542_v18 = vpop.eup %5541  ;;  %4962 = vmatmul.mubr.bf16.gmra.mxu1 %v2209_v35  ;;  %v7247_v50 = vmul.f32 %v5540_v46, %v7051_v4  ;;  %v2144_v46 = vmul.f32 %v7193_v19, %v7047_v13  ;;  %v4360_v43 = vmul.f32 -1.442695, %v7244_v47 }
 0x1f6   : > { %v5544_v38 = vpop.eup %5543  ;;  %v1762_v3 = vadd.f32 1.0, %v5542_v18  ;;  %v7215_v61 = vpop.f32.mrf.mxu1  ;;  %5567 = vrcp.f32 %v3218_v10 }
 0x1f7   : > { %v5546_v23 = vpop.eup %5545  ;;  %5569 = vpow2.f32 %v4356_v24  ;;  %8508 = vst [vmem:[#allocation7_spill] sm:$0xff] %v7247_v50  ;;  %v2142_v49 = vmul.f32 %v5544_v38, %v7058_v15  ;;  %v7270_v38 = vadd.f32 %v7036_v30, %v7160_v62 }
 0x1f8   : > { %v5548_v55 = vpop.eup %5547  ;;  %v3221_v59 = vadd.f32 1.0, %v5546_v23  ;;  %v7219_v2 = vpop.f32.mrf.mxu1  ;;  %5571 = vrcp.f32 %v1762_v3 }
 0x1f9   : > { %v5550_v20 = vpop.eup %5549  ;;  %v7225_v9 = vmul.f32 %v5548_v55, %v7064_v29  ;;  %v7277_v55 = vadd.f32 %v7036_v30, %v7181_v5  ;;  %v7290_v5 = vadd.f32 %v7208_v40, %v7036_v30 }
 0x1fa   : > { %v5552_v33 = vpop.eup %5551  ;;  %5573 = vrcp.f32 %v3221_v59  ;;  %v1765_v21 = vadd.f32 1.0, %v5550_v20  ;;  %v7234_v0 = vpop.f32.mrf.mxu1  ;;  %v4358_v20 = vmul.f32 -1.442695, %v7270_v38 }
 0x1fb   : > { %8507 = vst [vmem:[#allocation6_spill] sm:$0xff] %v7225_v9  ;;  %v5554_v54 = vpop.eup %5553  ;;  %5575 = vpow2.f32 %v4354_v52  ;;  %v2145_v24 = vmul.f32 %v5552_v33, %v7070_v31  ;;  %v4357_v31 = vmul.f32 -1.442695, %v7240_v6  ;;  %8510 = vst [vmem:[#allocation9_spill] sm:$0xff] %v7277_v55 }
 0x1fc   : > { %v5556_v48 = vpop.eup %5555  ;;  %v3219_v34 = vadd.f32 1.0, %v5554_v54  ;;  %5577 = vpow2.f32 %v4359_v37  ;;  %v4871_v11 = vpop.f32.mrf.mxu1  ;;  %v7286_v54 = vadd.f32 %v7036_v30, %v7196_v26  ;;  %8512 = vst [vmem:[#allocation11_spill] sm:$0xff] %v7290_v5 }
 0x1fd   : > { %v5558_v44 = vpop.eup %5557  ;;  %v7250_v45 = vmul.f32 %v5556_v48, %v7074_v25  ;;  %5579 = vrcp.f32 %v1765_v21  ;;  %v2211_v15 = vpack.c.bf16 %v2145_v24, %v2144_v46  ;;  %v7308_v46 = vadd.f32 %v4871_v11, %v7036_v30 }
 0x1fe   : > { %v5560_v10 = vpop.eup %5559  ;;  %5581 = vrcp.f32 %v3219_v34  ;;  %v1763_v17 = vadd.f32 1.0, %v5558_v44  ;;  %v2415_v18 = vpop.f32.mrf.mxu1  ;;  %8511 = vst [vmem:[#allocation10_spill] sm:$0xff] %v7286_v54  ;;  %v4361_v44 = vmul.f32 -1.442695, %v7277_v55 }
 0x1ff   : > { %8509 = vst [vmem:[#allocation8_spill] sm:$0xff] %v7250_v45  ;;  %v2143_v25 = vmul.f32 %v5560_v10, %v7081_v60  ;;  %5583 = vrcp.f32 %v1764_v57  ;;  %v5562_v3 = vpop.eup %5561  ;;  %v4364_v60 = vmul.f32 -1.442695, %v7256_v36 }
 0x200   : > { %5585 = vrcp.f32 %v1763_v17  ;;  %v7265_v56 = vpop.f32.mrf.mxu1  ;;  %v5564_v35 = vpop.eup %5563  ;;  %v7293_v48 = vmul.f32 %v5562_v3, %v7084_v12  ;;  %v4362_v12 = vmul.f32 -1.442695, %v7286_v54 }
 0x201   : > { %v2210_v23 = vpack.c.bf16 %v2143_v25, %v2142_v49  ;;  %5587 = vpow2.f32 %v4363_v22  ;;  %v5566_v13 = vpop.eup %5565  ;;  %v3224_v21 = vadd.f32 1.0, %v5564_v35 }
 0x202   : > { %v7273_v52 = vpop.f32.mrf.mxu1  ;;  %5589 = vpow2.f32 %v4357_v31  ;;  %8513 = vst [vmem:[#allocation12_spill] sm:$0xff] %v7293_v48  ;;  %v3222_v24 = vadd.f32 1.0, %v5566_v13 }
 0x203   : > { %4965 = vmatprep.mubr.bf16.mxu1 %v2210_v23  ;;  %v5568_v19 = vpop.eup %5567  ;;  %5591 = vpow2.f32 %v4360_v43 }
 0x204   : > { %4966 = vmatmul.mubr.bf16.gmra.mxu1 %v2211_v15  ;;  %v7279_v59 = vpop.f32.mrf.mxu1  ;;  %v5570_v37 = vpop.eup %5569  ;;  %5593 = vpow2.f32 %v4364_v60  ;;  %v7311_v3 = vmul.f32 %v5568_v19, %v7104_v28 }
 0x205   : > { %v5572_v62 = vpop.eup %5571  ;;  %v3225_v49 = vadd.f32 1.0, %v5570_v37  ;;  %5595 = vpow2.f32 %v4358_v20  ;;  %v7319_v37 = vadd.f32 %v7036_v30, %v2415_v18 }
 0x206   : > { %v7282_v53 = vpop.f32.mrf.mxu1  ;;  %5597 = vrcp.f32 %v3224_v21  ;;  %8515 = vst [vmem:[#allocation14_spill] sm:$0xff] %v7311_v3  ;;  %v2146_v60 = vmul.f32 %v5572_v62, %v7114_v41  ;;  %v7327_v41 = vadd.f32 %v7036_v30, %v7215_v61 }
 0x207   : > { %v5574_v33 = vpop.eup %5573  ;;  %5599 = vpow2.f32 %v4361_v44 }
 0x208   : > { %v5576_v57 = vpop.eup %5575  ;;  %v7296_v34 = vmul.f32 %v5574_v33, %v7119_v32  ;;  %v7299_v22 = vpop.f32.mrf.mxu1  ;;  %v4367_v32 = vmul.f32 -1.442695, %v7290_v5  ;;  %5601 = vrcp.f32 %v3222_v24  ;;  %8517 = vst [vmem:[#allocation16_spill] sm:$0xff] %v7327_v41 }
 0x209   : > { %v5578_v10 = vpop.eup %5577  ;;  %v3223_v23 = vadd.f32 1.0, %v5576_v57  ;;  %5603 = vrcp.f32 %v3225_v49  ;;  %v7338_v49 = vadd.f32 %v7279_v59, %v7036_v30  ;;  %v7351_v59 = vadd.f32 %v7036_v30, %v7273_v52 }
 0x20a   : > { %8514 = vst [vmem:[#allocation13_spill] sm:$0xff] %v7296_v34  ;;  %v5580_v17 = vpop.eup %5579  ;;  %v7303_v40 = vpop.f32.mrf.mxu1  ;;  %5605 = vpow2.f32 %v4362_v12 }
 0x20b   : > { %v5582_v25 = vpop.eup %5581  ;;  %v2149_v13 = vmul.f32 %v5580_v17, %v7130_v7  ;;  %v4371_v7 = vmul.f32 -1.442695, %v7308_v46  ;;  %5607 = vrcp.f32 %v3223_v23  ;;  %v4365_v17 = vmul.f32 -1.442695, %v7327_v41 }
 0x20c   : > { %v5584_v31 = vpop.eup %5583  ;;  %v7314_v43 = vmul.f32 %v5582_v25, %v7144_v14  ;;  %v4879_v35 = vpop.f32.mrf.mxu1  ;;  %v3228_v14 = vadd.f32 1.0, %v5578_v10  ;;  %5609 = vpow2.f32 %v4367_v32  ;;  %v7347_v23 = vadd.f32 %v7036_v30, %v7282_v53 }
 0x20d   : > { %v5586_v15 = vpop.eup %5585  ;;  %v2148_v33 = vmul.f32 %v5584_v31, %v7092_v39  ;;  %v4369_v39 = vmul.f32 -1.442695, %v7319_v37  ;;  %v7362_v53 = vadd.f32 %v7036_v30, %v7234_v0 }
 0x20e   : > { %8516 = vst [vmem:[#allocation15_spill] sm:$0xff] %v7314_v43  ;;  %v2147_v28 = vmul.f32 %v5586_v15, %v7152_v58  ;;  %v2447_v19 = vpop.f32.mrf.mxu1  ;;  %v5588_v20 = vpop.eup %5587  ;;  %v7332_v58 = vadd.f32 %v7219_v2, %v7036_v30  ;;  %5611 = vrcp.f32 %v3228_v14  ;;  %v7342_v2 = vadd.f32 %v7265_v56, %v7036_v30 }
 0x20f   : > { %v3232_v18 = vadd.f32 1.0, %v5588_v20  ;;  %v5590_v57 = vpop.eup %5589  ;;  %v2213_v44 = vpack.c.bf16 %v2149_v13, %v2148_v33  ;;  %5613 = vpow2.f32 %v4371_v7  ;;  %v4375_v56 = vmul.f32 -1.442695, %v7338_v49  ;;  %8519 = vst [vmem:[#allocation18_spill] sm:$0xff] %v7362_v53 }
 0x210   : > { %v2212_v62 = vpack.c.bf16 %v2147_v28, %v2146_v60  ;;  %v4880_v21 = vpop.f32.mrf.mxu1  ;;  %8518 = vst [vmem:[#allocation17_spill] sm:$0xff] %v7332_v58  ;;  %v5592_v10 = vpop.eup %5591  ;;  %v3226_v25 = vadd.f32 1.0, %v5590_v57  ;;  %v4368_v31 = vmul.f32 -1.442695, %v7332_v58  ;;  %v7356_v28 = vadd.f32 %v7299_v22, %v7036_v30 }
 0x211   : > { %v5594_v24 = vpop.eup %5593  ;;  %5615 = vrcp.f32 %v3232_v18  ;;  %v3229_v15 = vadd.f32 1.0, %v5592_v10  ;;  %v4372_v20 = vmul.f32 -1.442695, %v7342_v2  ;;  %v4373_v7 = vmul.f32 -1.442695, %v7347_v23 }
 0x212   : > { %4969 = vmatprep.mubr.bf16.mxu1 %v2212_v62  ;;  %v2450_v61 = vpop.f32.mrf.mxu1  ;;  %v3233_v12 = vadd.f32 1.0, %v5594_v24  ;;  %5617 = vpow2.f32 %v4369_v39  ;;  %v5596_v13 = vpop.eup %5595  ;;  %v7368_v18 = vadd.f32 %v7036_v30, %v7303_v40  ;;  %v4370_v62 = vmul.f32 -1.442695, %v7351_v59 }
 0x213   : > { %4970 = vmatmul.mubr.bf16.gmra.mxu1 %v2213_v44  ;;  %v7358_v14 = vpop.eup %5597  ;;  %v7374_v57 = vadd.f32 %v4879_v35, %v7036_v30  ;;  %v4376_v39 = vmul.f32 -1.442695, %v7356_v28  ;;  %v4366_v24 = vmul.f32 -1.442695, %v7362_v53  ;;  %v7383_v40 = vadd.f32 %v7036_v30, %v2447_v19 }
 0x214   : > { %v4883_v32 = vpop.f32.mrf.mxu1  ;;  %5619 = vrcp.f32 %v3233_v12  ;;  %v5600_v33 = vpop.eup %5599  ;;  %v4374_v35 = vmul.f32 -1.442695, %v7368_v18  ;;  %v3227_v19 = vadd.f32 1.0, %v5596_v13  ;;  %v7401_v4 = vadd.f32 %v7036_v30, %v2450_v61 }
 0x215   : > { %5621 = vpow2.f32 %v4365_v17  ;;  %v7370_v22 = vpop.eup %5601  ;;  %v4377_v29 = vmul.f32 -1.442695, %v7383_v40  ;;  %v3230_v26 = vadd.f32 1.0, %v5600_v33  ;;  %v7408_v45 = vadd.f32 %v4883_v32, %v7036_v30 }
 0x216   : > { %v2463_v60 = vpop.f32.mrf.mxu1  ;;  %5623 = vrcp.f32 %v3226_v25  ;;  %v7376_v44 = vpop.eup %5603 }
 0x217   : > { %5625 = vpow2.f32 %v4368_v31  ;;  %v7379_v10 = vpop.eup %5605  ;;  %v4379_v31 = vmul.f32 -1.442695, %v7374_v57  ;;  %v4383_v55 = vmul.f32 -1.442695, %v7408_v45 }
 0x218   : > { %v4884_v52 = vpop.f32.mrf.mxu1  ;;  %5627 = vrcp.f32 %v3229_v15  ;;  %v7387_v25 = vpop.eup %5607  ;;  %v7394_v15 = vadd.f32 %v4880_v21, %v7036_v30 }
 0x219   : > { %5629 = vpow2.f32 %v4375_v56  ;;  %8520 = vst [vmem:[#allocation19_spill] sm:$0xff] %v7387_v25  ;;  %v7390_v12 = vpop.eup %5609 }
 0x21a   : > { %v2466_v0 = vpop.f32.mrf.mxu1  ;;  %5631 = vpow2.f32 %v4372_v20  ;;  %v4380_v50 = vmul.f32 -1.442695, %v7394_v15 }
 0x21b   : > { %5633 = vpow2.f32 %v4373_v7  ;;  %v7398_v20 = vpop.eup %5611 }
 0x21c   : > { %v7385_v17 = vpop.f32.mrf.mxu1  ;;  %5635 = vpow2.f32 %v4370_v62  ;;  %v5614_v7 = vpop.eup %5613 }
 0x21d   : > { %5637 = vpow2.f32 %v4376_v39  ;;  %v3240_v39 = vadd.f32 1.0, %v5614_v7 }
 0x21e   : > { %v7396_v56 = vpop.f32.mrf.mxu1  ;;  %5639 = vpow2.f32 %v4366_v24  ;;  %v5616_v62 = vpop.eup %5615  ;;  %v4378_v24 = vmul.f32 -1.442695, %v7401_v4 }
 0x21f   : > { %5641 = vpow2.f32 %v4374_v35  ;;  %v5618_v21 = vpop.eup %5617  ;;  %v7416_v9 = vmul.f32 %v5616_v62, %v7229_v42  ;;  %v7422_v35 = vadd.f32 %v7036_v30, %v2463_v60  ;;  %v7432_v42 = vadd.f32 %v4884_v52, %v7036_v30 }
 0x220   : > { %v7404_v11 = vpop.f32.mrf.mxu1  ;;  %5643 = vpow2.f32 %v4379_v31 }
 0x221   : > { %v5620_v61 = vpop.eup %5619  ;;  %5645 = vrcp.f32 %v3227_v19  ;;  %8521 = vst [vmem:[#allocation20_spill] sm:$0xff] %v7416_v9  ;;  %v3238_v19 = vadd.f32 1.0, %v5618_v21  ;;  %v7442_v21 = vadd.f32 %v7036_v30, %v2466_v0  ;;  %v4384_v3 = vmul.f32 -1.442695, %v7432_v42 }
 0x222   : > { %v7410_v13 = vpop.f32.mrf.mxu1  ;;  %v7413_v8 = vpop.eup %5621  ;;  %v7419_v33 = vmul.f32 %v5620_v61, %v7256_v36  ;;  %5647 = vpow2.f32 %v4377_v29 }
 0x223   : > { %v7426_v31 = vpop.eup %5623  ;;  %5649 = vrcp.f32 %v3230_v26  ;;  %v4381_v26 = vmul.f32 -1.442695, %v7422_v35 }
 0x224   : > { %8522 = vst [vmem:[#allocation21_spill] sm:$0xff] %v7419_v33  ;;  %v7424_v32 = vpop.f32.mrf.mxu1  ;;  %v7428_v7 = vpop.eup %5625  ;;  %5651 = vpow2.f32 %v4380_v50  ;;  %v4382_v33 = vmul.f32 -1.442695, %v7442_v21 }
 0x225   : > { %v7438_v60 = vpop.eup %5627  ;;  %5653 = vrcp.f32 %v3240_v39 }
 0x226   : > { %v7434_v36 = vpop.f32.mrf.mxu1  ;;  %v5630_v62 = vpop.eup %5629  ;;  %5655 = vpow2.f32 %v4378_v24 }
 0x227   : > { %v5632_v61 = vpop.eup %5631  ;;  %5657 = vrcp.f32 %v3238_v19  ;;  %v3244_v52 = vadd.f32 1.0, %v5630_v62 }
 0x228   : > { %v7444_v50 = vpop.f32.mrf.mxu1  ;;  %v5634_v54 = vpop.eup %5633  ;;  %5659 = vpow2.f32 %v4383_v55  ;;  %v3241_v62 = vadd.f32 1.0, %v5632_v61  ;;  %v7460_v61 = vadd.f32 %v7036_v30, %v7396_v56 }
 0x229   : > { %v5636_v9 = vpop.eup %5635  ;;  %5661 = vrcp.f32 %v3244_v52  ;;  %v3242_v39 = vadd.f32 1.0, %v5634_v54  ;;  %v7454_v54 = vadd.f32 %v7385_v17, %v7036_v30 }
 0x22a   : > { %v7447_v29 = vpop.f32.mrf.mxu1  ;;  %v5638_v24 = vpop.eup %5637  ;;  %5663 = vpow2.f32 %v4381_v26  ;;  %v3239_v41 = vadd.f32 1.0, %v5636_v9  ;;  %8524 = vst [vmem:[#allocation23_spill] sm:$0xff] %v7460_v61 }
 0x22b   : > { %v7450_v43 = vpop.eup %5639  ;;  %5665 = vrcp.f32 %v3242_v39  ;;  %v3245_v48 = vadd.f32 1.0, %v5638_v24  ;;  %8523 = vst [vmem:[#allocation22_spill] sm:$0xff] %v7454_v54 }
 0x22c   : > { %v4895_v0 = vpop.f32.mrf.mxu1  ;;  %v5642_v19 = vpop.eup %5641  ;;  %5667 = vpow2.f32 %v4384_v3 }
 0x22d   : > { %v5644_v34 = vpop.eup %5643  ;;  %5669 = vrcp.f32 %v3245_v48  ;;  %v3243_v53 = vadd.f32 1.0, %v5642_v19  ;;  %v7466_v48 = vadd.f32 %v7404_v11, %v7036_v30  ;;  %v4385_v11 = vmul.f32 -1.442695, %v7460_v61 }
 0x22e   : > { %v2511_v55 = vpop.f32.mrf.mxu1  ;;  %v7456_v26 = vpop.eup %5645  ;;  %v3248_v52 = vadd.f32 1.0, %v5644_v34  ;;  %5671 = vpow2.f32 %v4382_v33  ;;  %v4387_v34 = vmul.f32 -1.442695, %v7454_v54 }
 0x22f   : > { %v5648_v58 = vpop.eup %5647  ;;  %5673 = vrcp.f32 %v3243_v53  ;;  %8526 = vst [vmem:[#allocation25_spill] sm:$0xff] %v7466_v48  ;;  %v7473_v53 = vadd.f32 %v7036_v30, %v7410_v13 }
 0x230   : > { %v4896_v5 = vpop.f32.mrf.mxu1  ;;  %v7462_v3 = vpop.eup %5649  ;;  %5675 = vrcp.f32 %v3241_v62  ;;  %v3246_v9 = vadd.f32 1.0, %v5648_v58  ;;  %v4388_v62 = vmul.f32 -1.442695, %v7466_v48 }
 0x231   : > { %8525 = vst [vmem:[#allocation24_spill] sm:$0xff] %v7462_v3  ;;  %v5652_v39 = vpop.eup %5651  ;;  %5677 = vrcp.f32 %v3239_v41  ;;  %8527 = vst [vmem:[#allocation26_spill] sm:$0xff] %v7473_v53  ;;  %v4386_v13 = vmul.f32 -1.442695, %v7473_v53 }
 0x232   : > { %v7468_v17 = vpop.f32.mrf.mxu1  ;;  %v7475_v56 = vpop.eup %5653  ;;  %5679 = vrcp.f32 %v3248_v52  ;;  %v3249_v33 = vadd.f32 1.0, %v5652_v39 }
 0x233   : > { %v5656_v58 = vpop.eup %5655  ;;  %5681 = vrcp.f32 %v3246_v9 }
 0x234   : > { %v7477_v24 = vpop.f32.mrf.mxu1  ;;  %v7480_v19 = vpop.eup %5657  ;;  %5683 = vrcp.f32 %v3249_v33  ;;  %v3247_v41 = vadd.f32 1.0, %v5656_v58  ;;  %v7491_v33 = vld [vmem:[%s8451_s4] ss:$0 sm:$0xff] }
 0x235   : > { %v5660_v30 = vpop.eup %5659  ;;  %5685 = vpow2.f32 %v4387_v34  ;;  %v7494_v58 = vadd.f32 %v7491_v33, %v4895_v0  ;;  %v7508_v48 = vadd.f32 %v7491_v33, %v2511_v55  ;;  %v7520_v55 = vadd.f32 %v7491_v33, %v4896_v5 }
 0x236   : > { %v7483_v54 = vpop.f32.mrf.mxu1  ;;  %v5662_v52 = vpop.eup %5661  ;;  %5687 = vrcp.f32 %v3247_v41  ;;  %v3252_v39 = vadd.f32 1.0, %v5660_v30  ;;  %v3612_v41 = vmul.f32 %v7398_v20, %v7206_v16  ;;  %v3237_v30 = vadd.f32 1.0, %v7428_v7 }
 0x237   : > { %v5664_v9 = vpop.eup %5663  ;;  %5689 = vpow2.f32 %v4385_v11  ;;  %v7503_v11 = vadd.f32 %v7491_v33, %v7424_v32  ;;  %v3628_v16 = vmul.f32 %v5662_v52, %v7338_v49  ;;  %v7516_v32 = vadd.f32 %v7491_v33, %v7434_v36 }
 0x238   : > { %v7486_v3 = vpop.f32.mrf.mxu1  ;;  %v5666_v61 = vpop.eup %5665  ;;  %v3250_v25 = vadd.f32 1.0, %v5664_v9  ;;  %5691 = vpow2.f32 %v4388_v62  ;;  %v3613_v9 = vmul.f32 %v7438_v60, %v7244_v47  ;;  %v4395_v60 = vmul.f32 -1.442695, %v7494_v58 }
 0x239   : > { %8528 = vst [vmem:[#allocation27_spill] sm:$0xff] %v7486_v3  ;;  %v5668_v53 = vpop.eup %5667  ;;  %5693 = vpow2.f32 %v4386_v13  ;;  %v3626_v49 = vmul.f32 %v5666_v61, %v7347_v23  ;;  %v7532_v5 = vadd.f32 %v7491_v33, %v7468_v17  ;;  %v4389_v23 = vmul.f32 -1.442695, %v7516_v32 }
 0x23a   : > { %v7496_v34 = vpop.f32.mrf.mxu1  ;;  %v5670_v62 = vpop.eup %5669  ;;  %5695 = vrcp.f32 %v3252_v39  ;;  %v3253_v0 = vadd.f32 1.0, %v5668_v53  ;;  %v3749_v39 = vpack.c.bf16 %v3613_v9, %v3612_v41  ;;  %v3231_v41 = vadd.f32 1.0, %v7379_v10 }
 0x23b   : > { %8529 = vst [vmem:[#allocation28_spill] sm:$0xff] %v7496_v34  ;;  %v5672_v3 = vpop.eup %5671  ;;  %v3629_v20 = vmul.f32 %v5670_v62, %v7356_v28  ;;  %5697 = vrcp.f32 %v3250_v25  ;;  %v4391_v25 = vmul.f32 -1.442695, %v7503_v11  ;;  %v7537_v61 = vpop.trf.xlu0  ;;  %v3236_v9 = vadd.f32 1.0, %v7390_v12 }
 0x23c   : > { %v7510_v34 = vpop.f32.mrf.mxu1  ;;  %v5674_v7 = vpop.eup %5673  ;;  %5699 = vrcp.f32 %v3253_v0  ;;  %v3251_v47 = vadd.f32 1.0, %v5672_v3  ;;  %v4393_v3 = vmul.f32 -1.442695, %v7508_v48  ;;  %4641 = vmatprep.mubr.bf16.mxu0 %v7537_v61  ;;  %v7550_v10 = vadd.f32 %v7491_v33, %v7444_v50  ;;  %4659 = vmatprep.mubr.bf16.mxu1 %v7537_v61 }
 0x23d   : > { %v5676_v13 = vpop.eup %5675  ;;  %v3627_v28 = vmul.f32 %v5674_v7, %v7368_v18  ;;  %v3757_v52 = vpack.c.bf16 %v3629_v20, %v3628_v16  ;;  %v4396_v20 = vmul.f32 -1.442695, %v7520_v55  ;;  %v3611_v7 = vmul.f32 %v7456_v26, %v7270_v38 }
 0x23e   : > { %v7522_v53 = vpop.f32.mrf.mxu1  ;;  %v7527_v36 = vpop.eup %5677  ;;  %5701 = vrcp.f32 %v3251_v47  ;;  %v3234_v47 = vadd.f32 1.0, %v7413_v8  ;;  %v4394_v38 = vmul.f32 -1.442695, %v7532_v5  ;;  %v3610_v50 = vmul.f32 %v7426_v31, %v7240_v6 }
 0x23f   : > { %v5680_v0 = vpop.eup %5679  ;;  %5703 = vrcp.f32 %v3237_v30  ;;  %4625 = vmatprep.subr.bf16.mxu0 %v3757_v52  ;;  %v3756_v18 = vpack.c.bf16 %v3627_v28, %v3626_v49  ;;  %v3625_v28 = vmul.f32 %v5676_v13, %v7342_v2  ;;  %v3235_v2 = vadd.f32 1.0, %v7450_v43 }
 0x240   : > { %v7534_v62 = vpop.f32.mrf.mxu1  ;;  %v5682_v16 = vpop.eup %5681  ;;  %5705 = vpow2.f32 %v4395_v60  ;;  %4626 = vmatpush3.bf16.xpose.msra.mxu0 %v3749_v39  ;;  %v7554_v60 = vmul.f32 %v5680_v0, %v7374_v57  ;;  %v3624_v31 = vmul.f32 %v7475_v56, %v7308_v46  ;;  %v3748_v13 = vpack.c.bf16 %v3611_v7, %v3610_v50 }
 0x241   : > { %v5684_v30 = vpop.eup %5683  ;;  %5707 = vpow2.f32 %v4391_v25  ;;  %4627 = vmatprep.subr.bf16.mxu0 %v3756_v18  ;;  %v7567_v25 = vadd.f32 %v7491_v33, %v7447_v29  ;;  %v4392_v0 = vmul.f32 -1.442695, %v7550_v10  ;;  %v3609_v56 = vmul.f32 %v7376_v44, %v7185_v63 }
 0x242   : > { %v7542_v17 = vpop.f32.mrf.mxu1  ;;  %v5686_v12 = vpop.eup %5685  ;;  %8530 = vst [vmem:[#allocation29_spill] sm:$0xff] %v7554_v60  ;;  %v7557_v49 = vmul.f32 %v5684_v30, %v7394_v15  ;;  %5709 = vpow2.f32 %v4393_v3  ;;  %v7570_v15 = vmul.f32 %v5682_v16, %v7383_v40  ;;  %v3755_v16 = vpack.c.bf16 %v3625_v28, %v3624_v31  ;;  %v8558_v60 = vld [vmem:[#allocation14_spill] sm:$0xff] }
 0x243   : > { %v5688_v8 = vpop.eup %5687  ;;  %5711 = vpow2.f32 %v4389_v23  ;;  %v4390_v18 = vmul.f32 -1.442695, %v7567_v25  ;;  %v7594_v30 = vadd.f32 %v7491_v33, %v7477_v24  ;;  %v3608_v63 = vmul.f32 %v7358_v14, %v7170_v27 }
 0x244   : > { %8531 = vst [vmem:[#allocation30_spill] sm:$0xff] %v7557_v49  ;;  %v7560_v26 = vpop.f32.mrf.mxu1  ;;  %v5690_v57 = vpop.eup %5689  ;;  %8532 = vst [vmem:[#allocation31_spill] sm:$0xff] %v7570_v15  ;;  %v7575_v39 = vmul.f32 %v5688_v8, %v7401_v4  ;;  %5713 = vpow2.f32 %v4396_v20  ;;  %v3256_v20 = vadd.f32 1.0, %v5686_v12  ;;  %v3623_v44 = vmul.f32 %v7527_v36, %v7351_v59 }
 0x245   : > { %v5692_v6 = vpop.eup %5691  ;;  %5715 = vrcp.f32 %v3236_v9  ;;  %8534 = vst [vmem:[#allocation33_spill] sm:$0xff] %v7594_v30  ;;  %v3622_v27 = vmul.f32 %v7480_v19, %v7319_v37  ;;  %v4399_v59 = vmul.f32 -1.442695, %v7594_v30  ;;  %v3747_v36 = vpack.c.bf16 %v3609_v56, %v3608_v63 }
 0x246   : > { %8533 = vst [vmem:[#allocation32_spill] sm:$0xff] %v7575_v39  ;;  %v7577_v3 = vpop.f32.mrf.mxu1  ;;  %v5694_v29 = vpop.eup %5693  ;;  %5717 = vpow2.f32 %v4394_v38  ;;  %v3257_v24 = vadd.f32 1.0, %v5692_v6 }
 0x247   : > { %v5696_v23 = vpop.eup %5695  ;;  %5719 = vrcp.f32 %v3231_v41  ;;  %v3255_v28 = vadd.f32 1.0, %v5694_v29  ;;  %v7627_v29 = vadd.f32 %v7491_v33, %v7483_v54 }
 0x248   : > { %v7585_v4 = vpop.f32.mrf.mxu1  ;;  %v5698_v9 = vpop.eup %5697  ;;  %5721 = vrcp.f32 %v3234_v47  ;;  %4628 = vmatpush3.bf16.xpose.msra.mxu0 %v3748_v13  ;;  %v7597_v41 = vmul.f32 %v5696_v23, %v7408_v45  ;;  %v3254_v47 = vadd.f32 1.0, %v5690_v57  ;;  %v3754_v13 = vpack.c.bf16 %v3623_v44, %v3622_v27 }
 0x249   : > { %v5700_v46 = vpop.eup %5699  ;;  %5723 = vrcp.f32 %v3235_v2  ;;  %4629 = vmatprep.subr.bf16.mxu0 %v3755_v16  ;;  %v7609_v45 = vmul.f32 %v5698_v9, %v7422_v35  ;;  %8539 = vst [vmem:[#allocation38_spill] sm:$0xff] %v7627_v29  ;;  %v7635_v9 = vadd.f32 %v7491_v33, %v7560_v26  ;;  %v7649_v26 = vadd.f32 %v7491_v33, %v7577_v3  ;;  %v8550_v35 = vld [vmem:[#allocation13_spill] sm:$0xff] }
 0x24a   : > { %v7588_v43 = vpop.f32.mrf.mxu1  ;;  %8535 = vst [vmem:[#allocation34_spill] sm:$0xff] %v7597_v41  ;;  %v7600_v7 = vmul.f32 %v5700_v46, %v7432_v42  ;;  %5725 = vpow2.f32 %v4392_v0  ;;  %v8540_v46 = vld [vmem:[#allocation19_spill] sm:$0xff]  ;;  %v7655_v27 = vadd.f32 %v7491_v33, %v7534_v62  ;;  %v7663_v3 = vadd.f32 %v7491_v33, %v7585_v4 }
 0x24b   : > { %v5702_v8 = vpop.eup %5701  ;;  %5727 = vpow2.f32 %v4390_v18  ;;  %8537 = vst [vmem:[#allocation36_spill] sm:$0xff] %v7609_v45  ;;  %v3606_v18 = vmul.f32 %v7370_v22, %v7179_v1  ;;  %v3607_v56 = vmul.f32 %v8540_v46, %v7201_v51  ;;  %v8543_v22 = vld [vmem:[#allocation17_spill] sm:$0xff]  ;;  %v7668_v62 = vadd.f32 %v7491_v33, %v7510_v34 }
 0x24c   : > { %8536 = vst [vmem:[#allocation35_spill] sm:$0xff] %v7600_v7  ;;  %v7602_v38 = vpop.f32.mrf.mxu1  ;;  %v5704_v12 = vpop.eup %5703  ;;  %v7614_v50 = vmul.f32 %v5702_v8, %v7442_v21  ;;  %5729 = vrcp.f32 %v3256_v20  ;;  %v7675_v4 = vadd.f32 %v7491_v33, %v7588_v43  ;;  %v4408_v43 = vmul.f32 -1.442695, %v7663_v3  ;;  %v8560_v45 = vld [vmem:[#allocation21_spill] sm:$0xff] }
 0x24d   : > { %v5706_v2 = vpop.eup %5705  ;;  %5731 = vrcp.f32 %v3254_v47  ;;  %v8541_v47 = vld [vmem:[#allocation27_spill] sm:$0xff]  ;;  %v3621_v44 = vmul.f32 %v5704_v12, %v8543_v22  ;;  %v7682_v34 = vadd.f32 %v7491_v33, %v7602_v38  ;;  %v8564_v7 = vld [vmem:[#allocation9_spill] sm:$0xff] }
 0x24e   : > { %8538 = vst [vmem:[#allocation37_spill] sm:$0xff] %v7614_v50  ;;  %v7616_v57 = vpop.f32.mrf.mxu1  ;;  %v5708_v14 = vpop.eup %5707  ;;  %v3264_v6 = vadd.f32 1.0, %v5706_v2  ;;  %5733 = vrcp.f32 %v3257_v24  ;;  %v7641_v8 = vadd.f32 %v7491_v33, %v8541_v47  ;;  %v4397_v24 = vmul.f32 -1.442695, %v7627_v29  ;;  %v8544_v12 = vld [vmem:[#allocation11_spill] sm:$0xff]  ;;  %v8561_v50 = vld [vmem:[#allocation20_spill] sm:$0xff] }
 0x24f   : > { %v5710_v21 = vpop.eup %5709  ;;  %5735 = vrcp.f32 %v3255_v28  ;;  %v3260_v16 = vadd.f32 1.0, %v5708_v14  ;;  %v7697_v38 = vadd.f32 %v7491_v33, %v7616_v57 }
 0x250   : > { %v7623_v31 = vpop.f32.mrf.mxu1  ;;  %v5712_v37 = vpop.eup %5711  ;;  %v3262_v19 = vadd.f32 1.0, %v5710_v21  ;;  %4630 = vmatpush3.bf16.xpose.msra.mxu0 %v3747_v36  ;;  %5737 = vpow2.f32 %v4399_v59  ;;  %8542 = vst [vmem:[#allocation19_spill] sm:$0xff] %v7641_v8 }
 0x251   : > { %v5714_v23 = vpop.eup %5713  ;;  %4631 = vmatprep.subr.bf16.mxu0 %v3754_v13  ;;  %5739 = vrcp.f32 %v3264_v6  ;;  %v3258_v51 = vadd.f32 1.0, %v5712_v37  ;;  %v4407_v6 = vmul.f32 -1.442695, %v7635_v9  ;;  %v3746_v13 = vpack.c.bf16 %v3607_v56, %v3606_v18 }
 0x252   : > { %v7629_v0 = vpop.f32.mrf.mxu1  ;;  %v5716_v54 = vpop.eup %5715  ;;  %v3265_v20 = vadd.f32 1.0, %v5714_v23  ;;  %5741 = vrcp.f32 %v3262_v19  ;;  %v4400_v37 = vmul.f32 -1.442695, %v7641_v8  ;;  %v4404_v18 = vmul.f32 -1.442695, %v7655_v27 }
 0x253   : > { %v5718_v1 = vpop.eup %5717  ;;  %v3620_v36 = vmul.f32 %v5716_v54, %v8544_v12  ;;  %v7714_v57 = vadd.f32 %v7491_v33, %v7623_v31 }
 0x254   : > { %v7643_v63 = vpop.f32.mrf.mxu1  ;;  %v7651_v28 = vpop.eup %5719  ;;  %5743 = vrcp.f32 %v3265_v20  ;;  %v3263_v2 = vadd.f32 1.0, %v5718_v1  ;;  %v7688_v20 = vadd.f32 %v7491_v33, %v7522_v53  ;;  %v8545_v1 = vld [vmem:[#allocation18_spill] sm:$0xff]  ;;  %v7705_v53 = vadd.f32 %v7491_v33, %v7542_v17 }
 0x255   : > { %v5722_v14 = vpop.eup %5721  ;;  %5745 = vrcp.f32 %v3260_v16  ;;  %v4405_v16 = vmul.f32 -1.442695, %v7649_v26  ;;  %v3753_v54 = vpack.c.bf16 %v3621_v44, %v3620_v36  ;;  %v4403_v44 = vmul.f32 -1.442695, %v7668_v62  ;;  %v8546_v36 = vld [vmem:[#allocation16_spill] sm:$0xff] }
 0x256   : > { %v7657_v59 = vpop.f32.mrf.mxu1  ;;  %v5724_v21 = vpop.eup %5723  ;;  %5747 = vrcp.f32 %v3263_v2  ;;  %v4406_v2 = vmul.f32 -1.442695, %v7675_v4  ;;  %v4401_v17 = vmul.f32 -1.442695, %v7688_v20  ;;  %v4402_v52 = vmul.f32 -1.442695, %v7705_v53 }
 0x257   : > { %v5726_v23 = vpop.eup %5725  ;;  %5749 = vpow2.f32 %v4397_v24  ;;  %v3619_v22 = vmul.f32 %v5724_v21, %v8545_v1  ;;  %v4411_v21 = vmul.f32 -1.442695, %v7682_v34 }
 0x258   : > { %v7670_v19 = vpop.f32.mrf.mxu1  ;;  %v7677_v46 = vpop.eup %5727  ;;  %5751 = vrcp.f32 %v3258_v51  ;;  %4632 = vmatpush3.bf16.xpose.msra.mxu0 %v3746_v13 }
 0x259   : > { %5753 = vpow2.f32 %v4407_v6  ;;  %4633 = vmatprep.subr.bf16.mxu0 %v3753_v54  ;;  %v7691_v47 = vpop.eup %5729  ;;  %v3618_v6 = vmul.f32 %v5722_v14, %v8546_v36  ;;  %v4409_v14 = vmul.f32 -1.442695, %v7697_v38  ;;  %v8548_v36 = vld [vmem:[#allocation28_spill] sm:$0xff] }
 0x25a   : > { %v7684_v56 = vpop.f32.mrf.mxu1  ;;  %5755 = vpow2.f32 %v4400_v37  ;;  %v7701_v51 = vpop.eup %5731  ;;  %v7732_v40 = vadd.f32 %v7491_v33, %v8548_v36  ;;  %v3261_v36 = vadd.f32 1.0, %v5726_v23 }
 0x25b   : > { %5757 = vpow2.f32 %v4405_v16  ;;  %v7708_v12 = vpop.eup %5733  ;;  %v7723_v16 = vadd.f32 %v7491_v33, %v7629_v0  ;;  %v7737_v0 = vadd.f32 %v7491_v33, %v7643_v63 }
 0x25c   : > { %v7699_v24 = vpop.f32.mrf.mxu1  ;;  %5759 = vpow2.f32 %v4404_v18  ;;  %v7718_v37 = vpop.eup %5735  ;;  %v3752_v18 = vpack.c.bf16 %v3619_v22, %v3618_v6  ;;  %8549 = vst [vmem:[#allocation17_spill] sm:$0xff] %v7732_v40  ;;  %v8551_v22 = vld [vmem:[#allocation12_spill] sm:$0xff] }
 0x25d   : > { %8547 = vst [vmem:[#allocation27_spill] sm:$0xff] %v7718_v37  ;;  %5761 = vpow2.f32 %v4408_v43  ;;  %v7725_v54 = vpop.eup %5737  ;;  %v8552_v6 = vpack.c.bf16 %v8550_v35, %v8551_v22  ;;  %v7756_v35 = vadd.f32 %v7491_v33, %v7657_v59 }
 0x25e   : > { %v7716_v13 = vpop.f32.mrf.mxu1  ;;  %5763 = vpow2.f32 %v4403_v44  ;;  %v5740_v31 = vpop.eup %5739  ;;  %v4412_v44 = vmul.f32 -1.442695, %v7714_v57 }
 0x25f   : > { %5765 = vpow2.f32 %v4406_v2  ;;  %v5742_v43 = vpop.eup %5741  ;;  %v4410_v2 = vmul.f32 -1.442695, %v7723_v16  ;;  %v7749_v63 = vmul.f32 %v5740_v31, %v7494_v58  ;;  %v7764_v58 = vadd.f32 %v7491_v33, %v7670_v19 }
 0x260   : > { %v7728_v1 = vpop.f32.mrf.mxu1  ;;  %5767 = vpow2.f32 %v4411_v21  ;;  %4634 = vmatpush3.bf16.xpose.msra.mxu0 %v8552_v6  ;;  %v4413_v19 = vmul.f32 -1.442695, %v7756_v35 }
 0x261   : > { %v5744_v15 = vpop.eup %5743  ;;  %5769 = vpow2.f32 %v4401_v17  ;;  %4635 = vmatprep.subr.bf16.mxu0 %v3752_v18  ;;  %8553 = vst [vmem:[#allocation11_spill] sm:$0xff] %v7749_v63  ;;  %v4398_v17 = vmul.f32 -1.442695, %v7732_v40  ;;  %v4415_v18 = vmul.f32 -1.442695, %v7737_v0 }
 0x262   : > { %v7743_v42 = vpop.f32.mrf.mxu1  ;;  %v7746_v39 = vpop.eup %5745  ;;  %v7752_v21 = vmul.f32 %v5744_v15, %v7520_v55  ;;  %5771 = vpow2.f32 %v4409_v14  ;;  %v7769_v55 = vmul.f32 %v5742_v43, %v7508_v48  ;;  %v7783_v48 = vadd.f32 %v7491_v33, %v7684_v56 }
 0x263   : > { %v5748_v23 = vpop.eup %5747  ;;  %5773 = vpow2.f32 %v4402_v52 }
 0x264   : > { %8554 = vst [vmem:[#allocation18_spill] sm:$0xff] %v7752_v21  ;;  %v7758_v22 = vpop.f32.mrf.mxu1  ;;  %v7766_v31 = vpop.eup %5749  ;;  %8555 = vst [vmem:[#allocation16_spill] sm:$0xff] %v7769_v55  ;;  %v7772_v15 = vmul.f32 %v5748_v23, %v7532_v5  ;;  %5775 = vpow2.f32 %v4412_v44  ;;  %v8562_v5 = vpack.c.bf16 %v8560_v45, %v8561_v50  ;;  %v8565_v45 = vld [vmem:[#allocation24_spill] sm:$0xff] }
 0x265   : > { %v7778_v14 = vpop.eup %5751  ;;  %5777 = vrcp.f32 %v3261_v36  ;;  %v4416_v36 = vmul.f32 -1.442695, %v7764_v58  ;;  %v3614_v50 = vmul.f32 %v8565_v45, %v8564_v7 }
 0x266   : > { %8556 = vst [vmem:[#allocation28_spill] sm:$0xff] %v7772_v15  ;;  %v7774_v59 = vpop.f32.mrf.mxu1  ;;  %v5754_v6 = vpop.eup %5753  ;;  %5779 = vpow2.f32 %v4410_v2  ;;  %v8557_v2 = vld [vmem:[#allocation15_spill] sm:$0xff]  ;;  %v8563_v15 = vld [vmem:[#allocation10_spill] sm:$0xff] }
 0x267   : > { %v7789_v44 = vpop.eup %5755  ;;  %5781 = vpow2.f32 %v4398_v17  ;;  %v3276_v23 = vadd.f32 1.0, %v5754_v6  ;;  %v8559_v49 = vpack.c.bf16 %v8557_v2, %v8558_v60  ;;  %v4414_v17 = vmul.f32 -1.442695, %v7783_v48 }
 0x268   : > { %v7785_v43 = vpop.f32.mrf.mxu1  ;;  %v5758_v52 = vpop.eup %5757  ;;  %5783 = vpow2.f32 %v4415_v18  ;;  %v3615_v41 = vmul.f32 %v7651_v28, %v8563_v15  ;;  %v3259_v2 = vadd.f32 1.0, %v7677_v46  ;;  %v8566_v15 = vld [vmem:[#allocation6_spill] sm:$0xff] }
 0x269   : > { %4636 = vmatpush3.bf16.xpose.msra.mxu0 %v8559_v49  ;;  %v5760_v56 = vpop.eup %5759  ;;  %5785 = vrcp.f32 %v3276_v23  ;;  %v3274_v21 = vadd.f32 1.0, %v5758_v52 }
 0x26a   : > { %v7795_v63 = vpop.f32.mrf.mxu1  ;;  %4637 = vmatprep.subr.bf16.mxu0 %v8562_v5  ;;  %v5762_v55 = vpop.eup %5761  ;;  %5787 = vpow2.f32 %v4413_v19  ;;  %v3273_v5 = vadd.f32 1.0, %v5760_v56 }
 0x26b   : > { %v5764_v6 = vpop.eup %5763  ;;  %5789 = vrcp.f32 %v3274_v21  ;;  %v3277_v60 = vadd.f32 1.0, %v5762_v55  ;;  %v3750_v21 = vpack.c.bf16 %v3615_v41, %v3614_v50 }
 0x26c   : > { %v4927_v18 = vpop.f32.mrf.mxu1  ;;  %v5766_v49 = vpop.eup %5765  ;;  %5791 = vpow2.f32 %v4416_v36  ;;  %v8567_v36 = vld [vmem:[#allocation5_spill] sm:$0xff]  ;;  %v3272_v56 = vadd.f32 1.0, %v5764_v6 }
 0x26d   : > { %v5768_v23 = vpop.eup %5767  ;;  %5793 = vrcp.f32 %v3277_v60  ;;  %v3275_v19 = vadd.f32 1.0, %v5766_v49  ;;  %v8568_v8 = vpack.c.bf16 %v8566_v15, %v8567_v36  ;;  %v3644_v15 = vmul.f32 %v7746_v39, %v7503_v11 }
 0x26e   : > { %v2639_v52 = vpop.f32.mrf.mxu1  ;;  %v5770_v29 = vpop.eup %5769  ;;  %v3280_v40 = vadd.f32 1.0, %v5768_v23  ;;  %5795 = vpow2.f32 %v4414_v17  ;;  %v7815_v17 = vadd.f32 %v7491_v33, %v7699_v24 }
 0x26f   : > { %v5772_v28 = vpop.eup %5771  ;;  %5797 = vrcp.f32 %v3275_v19  ;;  %v3270_v23 = vadd.f32 1.0, %v5770_v29 }
 0x270   : > { %v7806_v30 = vpop.f32.mrf.mxu1  ;;  %v5774_v55 = vpop.eup %5773  ;;  %5799 = vrcp.f32 %v3259_v2  ;;  %v3278_v46 = vadd.f32 1.0, %v5772_v28  ;;  %v4419_v24 = vmul.f32 -1.442695, %v7815_v17 }
 0x271   : > { %4638 = vmatpush3.bf16.xpose.msra.mxu0 %v8568_v8  ;;  %v5776_v7 = vpop.eup %5775  ;;  %5801 = vrcp.f32 %v3273_v5  ;;  %v3271_v8 = vadd.f32 1.0, %v5774_v55  ;;  %v3268_v55 = vadd.f32 1.0, %v7725_v54  ;;  %v3269_v54 = vadd.f32 1.0, %v7789_v44 }
 0x272   : > { %v7811_v37 = vpop.f32.mrf.mxu1  ;;  %4639 = vmatprep.subr.bf16.mxu0 %v3750_v21  ;;  %v5778_v60 = vpop.eup %5777  ;;  %5803 = vrcp.f32 %v3280_v40  ;;  %v3281_v41 = vadd.f32 1.0, %v5776_v7  ;;  %v7826_v40 = vadd.f32 %v7491_v33, %v7728_v1  ;;  %v8569_v7 = vld [vmem:[#allocation8_spill] sm:$0xff]  ;;  %v7837_v1 = vadd.f32 %v7491_v33, %v4927_v18 }
 0x273   : > { %v5780_v2 = vpop.eup %5779  ;;  %5805 = vrcp.f32 %v3278_v46  ;;  %v7849_v18 = vadd.f32 %v7491_v33, %v2639_v52  ;;  %v7862_v52 = vadd.f32 %v7491_v33, %v7806_v30 }
 0x274   : > { %v7817_v49 = vpop.f32.mrf.mxu1  ;;  %v7819_v45 = vpop.eup %5781  ;;  %5807 = vrcp.f32 %v3281_v41  ;;  %v3279_v50 = vadd.f32 1.0, %v5780_v2 }
 0x275   : > { %v5784_v5 = vpop.eup %5783  ;;  %5809 = vrcp.f32 %v3272_v56  ;;  %v8570_v56 = vld [vmem:[#allocation7_spill] sm:$0xff] }
 0x276   : > { %v7821_v6 = vpop.f32.mrf.mxu1  ;;  %v5786_v19 = vpop.eup %5785  ;;  %5811 = vrcp.f32 %v3279_v50  ;;  %v3284_v28 = vadd.f32 1.0, %v5784_v5  ;;  %v8571_v41 = vpack.c.bf16 %v8569_v7, %v8570_v56  ;;  %v3645_v5 = vmul.f32 %v5778_v60, %v7550_v10 }
 0x277   : > { %v5788_v21 = vpop.eup %5787  ;;  %5813 = vrcp.f32 %v3270_v23  ;;  %v4420_v23 = vmul.f32 -1.442695, %v7826_v40  ;;  %v3660_v10 = vmul.f32 %v5786_v19, %v7635_v9  ;;  %v7857_v60 = vadd.f32 %v7491_v33, %v7774_v59 }
 0x278   : > { %v7828_v29 = vpop.f32.mrf.mxu1  ;;  %v5790_v46 = vpop.eup %5789  ;;  %5815 = vrcp.f32 %v3271_v8  ;;  %v3282_v36 = vadd.f32 1.0, %v5788_v21  ;;  %v7846_v8 = vadd.f32 %v7491_v33, %v7758_v22  ;;  %v4427_v22 = vmul.f32 -1.442695, %v7837_v1 }
 0x279   : > { %4640 = vmatpush3.bf16.xpose.msra.mxu0 %v8571_v41  ;;  %v5792_v50 = vpop.eup %5791  ;;  %5817 = vpow2.f32 %v4419_v24  ;;  %v3658_v9 = vmul.f32 %v5790_v46, %v7649_v26  ;;  %v4428_v46 = vmul.f32 -1.442695, %v7862_v52 }
 0x27a   : > { %v7839_v2 = vpop.f32.mrf.mxu1  ;;  %v5794_v11 = vpop.eup %5793  ;;  %5819 = vrcp.f32 %v3284_v28  ;;  %v3285_v39 = vadd.f32 1.0, %v5792_v50  ;;  %v4425_v50 = vmul.f32 -1.442695, %v7849_v18 }
 0x27b   : > { %v5796_v7 = vpop.eup %5795  ;;  %v3661_v44 = vmul.f32 %v5794_v11, %v7663_v3  ;;  %5821 = vrcp.f32 %v3282_v36  ;;  %v3765_v36 = vpack.c.bf16 %v3645_v5, %v3644_v15  ;;  %v7871_v11 = vadd.f32 %v7491_v33, %v7811_v37 }
 0x27c   : > { %v7851_v21 = vpop.f32.mrf.mxu1  ;;  %v5798_v24 = vpop.eup %5797  ;;  %5823 = vrcp.f32 %v3285_v39  ;;  %v3283_v28 = vadd.f32 1.0, %v5796_v7  ;;  %v4423_v7 = vmul.f32 -1.442695, %v7846_v8 }
 0x27d   : > { %v5800_v41 = vpop.eup %5799  ;;  %v3659_v3 = vmul.f32 %v5798_v24, %v7675_v4  ;;  %5825 = vpow2.f32 %v4420_v23  ;;  %v3773_v19 = vpack.c.bf16 %v3661_v44, %v3660_v10  ;;  %v4426_v24 = vmul.f32 -1.442695, %v7871_v11 }
 0x27e   : > { %v7864_v56 = vpop.f32.mrf.mxu1  ;;  %v5802_v59 = vpop.eup %5801  ;;  %5827 = vrcp.f32 %v3283_v28  ;;  %v3643_v5 = vmul.f32 %v5800_v41, %v7567_v25  ;;  %v3642_v25 = vmul.f32 %v7778_v14, %v7516_v32 }
 0x27f   : > { %v5804_v39 = vpop.eup %5803  ;;  %5829 = vrcp.f32 %v3268_v55  ;;  %4643 = vmatprep.subr.bf16.mxu1 %v3773_v19  ;;  %v3772_v26 = vpack.c.bf16 %v3659_v3, %v3658_v9  ;;  %v4421_v55 = vmul.f32 -1.442695, %v7857_v60 }
 0x280   : > { %v7873_v30 = vpop.f32.mrf.mxu1  ;;  %4642 = vmatmul.mubr.bf16.vlgmr.msra.gmra.mxu0 %v7537_v61  ;;  %v5806_v4 = vpop.eup %5805  ;;  %5831 = vpow2.f32 %v4427_v22  ;;  %4644 = vmatpush3.bf16.xpose.msra.mxu1 %v3765_v36  ;;  %v7884_v10 = vmul.f32 %v5804_v39, %v7682_v34  ;;  %v3266_v36 = vadd.f32 1.0, %v7766_v31  ;;  %v3764_v14 = vpack.c.bf16 %v3643_v5, %v3642_v25  ;;  %v8590_v34 = vld [vmem:[#allocation35_spill] sm:$0xff] }
 0x281   : > { %4677 = vmatprep.mubr.bf16.mxu0 %v7537_v61  ;;  %v5808_v37 = vpop.eup %5807  ;;  %5833 = vrcp.f32 %v3269_v54  ;;  %4645 = vmatprep.subr.bf16.mxu1 %v3772_v26  ;;  %v3657_v54 = vmul.f32 %v5802_v59, %v7655_v27  ;;  %v7896_v9 = vmul.f32 %v5806_v4, %v7697_v38  ;;  %v7909_v27 = vadd.f32 %v7491_v33, %v7716_v13 }
 0x282   : > { %v7878_v15 = vpop.f32.mrf.mxu1  ;;  %v5810_v23 = vpop.eup %5809  ;;  %8572 = vst [vmem:[#allocation13_spill] sm:$0xff] %v7884_v10  ;;  %v7887_v44 = vmul.f32 %v5808_v37, %v7714_v57  ;;  %5835 = vpow2.f32 %v4425_v50  ;;  %v7922_v13 = vadd.f32 %v7491_v33, %v7785_v43  ;;  %v7926_v26 = vadd.f32 %v7491_v33, %v7795_v63 }
 0x283   : > { %v5812_v22 = vpop.eup %5811  ;;  %5837 = vpow2.f32 %v4423_v7  ;;  %8574 = vst [vmem:[#allocation15_spill] sm:$0xff] %v7896_v9  ;;  %v3656_v32 = vmul.f32 %v5810_v23, %v7668_v62  ;;  %v3267_v62 = vadd.f32 1.0, %v7819_v45  ;;  %v4417_v5 = vmul.f32 -1.442695, %v7909_v27 }
 0x284   : > { %8573 = vst [vmem:[#allocation12_spill] sm:$0xff] %v7887_v44  ;;  %v7890_v28 = vpop.f32.mrf.mxu1  ;;  %v5814_v41 = vpop.eup %5813  ;;  %v7901_v57 = vmul.f32 %v5812_v22, %v7723_v16  ;;  %5839 = vpow2.f32 %v4428_v46  ;;  %v7915_v16 = vadd.f32 %v7491_v33, %v7743_v42  ;;  %v8576_v46 = vld [vmem:[#allocation25_spill] sm:$0xff]  ;;  %v8579_v22 = vld [vmem:[#allocation22_spill] sm:$0xff] }
 0x285   : > { %v5816_v19 = vpop.eup %5815  ;;  %5841 = vpow2.f32 %v4421_v55  ;;  %v3771_v39 = vpack.c.bf16 %v3657_v54, %v3656_v32  ;;  %v3641_v37 = vmul.f32 %v7708_v12, %v8576_v46  ;;  %v3640_v25 = vmul.f32 %v7691_v47, %v8579_v22 }
 0x286   : > { %8575 = vst [vmem:[#allocation14_spill] sm:$0xff] %v7901_v57  ;;  %v7903_v3 = vpop.f32.mrf.mxu1  ;;  %v5818_v38 = vpop.eup %5817  ;;  %5843 = vpow2.f32 %v4426_v24  ;;  %v4418_v63 = vmul.f32 -1.442695, %v7915_v16  ;;  %v3655_v12 = vmul.f32 %v5816_v19, %v7705_v53  ;;  %v4424_v54 = vmul.f32 -1.442695, %v7922_v13 }
 0x287   : > { %v5820_v31 = vpop.eup %5819  ;;  %5845 = vrcp.f32 %v3266_v36  ;;  %v3288_v53 = vadd.f32 1.0, %v5818_v38 }
 0x288   : > { %v7917_v50 = vpop.f32.mrf.mxu1  ;;  %v5822_v7 = vpop.eup %5821  ;;  %4646 = vmatpush3.bf16.xpose.msra.mxu1 %v3764_v14  ;;  %v7934_v43 = vmul.f32 %v5820_v31, %v7737_v0  ;;  %5847 = vrcp.f32 %v3267_v62  ;;  %v4422_v14 = vmul.f32 -1.442695, %v7926_v26  ;;  %v3654_v62 = vmul.f32 %v5814_v41, %v7688_v20 }
 0x289   : > { %v5824_v42 = vpop.eup %5823  ;;  %4647 = vmatprep.subr.bf16.mxu1 %v3771_v39  ;;  %v7947_v0 = vmul.f32 %v5822_v7, %v7756_v35  ;;  %5849 = vpow2.f32 %v4417_v5  ;;  %v3763_v39 = vpack.c.bf16 %v3641_v37, %v3640_v25  ;;  %v7968_v37 = vadd.f32 %v7491_v33, %v7890_v28  ;;  %v8583_v25 = vld [vmem:[#allocation26_spill] sm:$0xff] }
 0x28a   : > { %v7928_v4 = vpop.f32.mrf.mxu1  ;;  %v5826_v45 = vpop.eup %5825  ;;  %8577 = vst [vmem:[#allocation21_spill] sm:$0xff] %v7934_v43  ;;  %v7937_v55 = vmul.f32 %v5824_v42, %v7764_v58  ;;  %5851 = vpow2.f32 %v4418_v63  ;;  %v3770_v22 = vpack.c.bf16 %v3655_v12, %v3654_v62  ;;  %v8585_v62 = vld [vmem:[#allocation19_spill] sm:$0xff]  ;;  %v7978_v28 = vadd.f32 %v7491_v33, %v7903_v3  ;;  %v8591_v35 = vld [vmem:[#allocation34_spill] sm:$0xff]  ;;  %v8612_v43 = vld [vmem:[#allocation16_spill] sm:$0xff] }
 0x28b   : > { %v5828_v24 = vpop.eup %5827  ;;  %8580 = vst [vmem:[#allocation10_spill] sm:$0xff] %v7947_v0  ;;  %v3289_v7 = vadd.f32 1.0, %v5826_v45  ;;  %5853 = vpow2.f32 %v4424_v54  ;;  %v8582_v45 = vld [vmem:[#allocation23_spill] sm:$0xff]  ;;  %v7992_v3 = vadd.f32 %v7491_v33, %v7828_v29  ;;  %v8592_v58 = vpack.c.bf16 %v8590_v34, %v8591_v35 }
 0x28c   : > { %8578 = vst [vmem:[#allocation20_spill] sm:$0xff] %v7937_v55  ;;  %v7940_v23 = vpop.f32.mrf.mxu1  ;;  %v5830_v36 = vpop.eup %5829  ;;  %v7952_v32 = vmul.f32 %v5828_v24, %v7783_v48  ;;  %v7964_v24 = vadd.f32 %v7491_v33, %v7817_v49  ;;  %5855 = vpow2.f32 %v4422_v14  ;;  %v3638_v63 = vmul.f32 %v7701_v51, %v8582_v45  ;;  %v8584_v54 = vld [vmem:[#allocation27_spill] sm:$0xff] }
 0x28d   : > { %v5832_v47 = vpop.eup %5831  ;;  %5857 = vrcp.f32 %v3288_v53  ;;  %v3639_v49 = vmul.f32 %v8584_v54, %v8583_v25  ;;  %v7982_v51 = vadd.f32 %v7491_v33, %v7873_v30  ;;  %v4439_v45 = vmul.f32 -1.442695, %v7968_v37 }
 0x28e   : > { %8581 = vst [vmem:[#allocation9_spill] sm:$0xff] %v7952_v32  ;;  %v7955_v31 = vpop.f32.mrf.mxu1  ;;  %v5834_v19 = vpop.eup %5833  ;;  %v3296_v46 = vadd.f32 1.0, %v5832_v47  ;;  %5859 = vrcp.f32 %v3289_v7  ;;  %v4431_v53 = vmul.f32 -1.442695, %v7964_v24  ;;  %v8586_v7 = vld [vmem:[#allocation33_spill] sm:$0xff] }
 0x28f   : > { %v5836_v48 = vpop.eup %5835  ;;  %v4437_v30 = vmul.f32 -1.442695, %v7978_v28 }
 0x290   : > { %v7960_v42 = vpop.f32.mrf.mxu1  ;;  %v5838_v20 = vpop.eup %5837  ;;  %4648 = vmatpush3.bf16.xpose.msra.mxu1 %v3763_v39  ;;  %v3294_v38 = vadd.f32 1.0, %v5836_v48  ;;  %v3653_v39 = vmul.f32 %v5834_v19, %v8585_v62  ;;  %5861 = vrcp.f32 %v3296_v46  ;;  %v7988_v19 = vadd.f32 %v7491_v33, %v7917_v50 }
 0x291   : > { %v5840_v41 = vpop.eup %5839  ;;  %4649 = vmatprep.subr.bf16.mxu1 %v3770_v22  ;;  %v3292_v48 = vadd.f32 1.0, %v5838_v20  ;;  %v3762_v46 = vpack.c.bf16 %v3639_v49, %v3638_v63  ;;  %v4436_v50 = vmul.f32 -1.442695, %v7982_v51  ;;  %v8006_v63 = vadd.f32 %v7491_v33, %v7851_v21 }
 0x292   : > { %v5842_v5 = vpop.eup %5841  ;;  %v3297_v12 = vadd.f32 1.0, %v5840_v41  ;;  %v2706_v47 = vpop.f32.mrf.mxu1  ;;  %v3652_v41 = vmul.f32 %v5830_v36, %v8586_v7  ;;  %v4440_v49 = vmul.f32 -1.442695, %v7988_v19  ;;  %v8014_v62 = vadd.f32 %v7491_v33, %v7955_v31  ;;  %v8588_v31 = vld [vmem:[#allocation38_spill] sm:$0xff] }
 0x293   : > { %v5844_v14 = vpop.eup %5843  ;;  %v3290_v25 = vadd.f32 1.0, %v5842_v5  ;;  %v8002_v5 = vadd.f32 %v7491_v33, %v7940_v23 }
 0x294   : > { %5863 = vrcp.f32 %v3297_v12  ;;  %v3295_v22 = vadd.f32 1.0, %v5844_v14  ;;  %v5846_v54 = vpop.eup %5845  ;;  %v3769_v36 = vpack.c.bf16 %v3653_v39, %v3652_v41  ;;  %v4432_v14 = vmul.f32 -1.442695, %v7992_v3 }
 0x295   : > { %5865 = vrcp.f32 %v3294_v38  ;;  %v4947_v20 = vpop.f32.mrf.mxu1  ;;  %v7997_v38 = vadd.f32 %v7491_v33, %v7928_v4  ;;  %v5848_v12 = vpop.eup %5847  ;;  %v4443_v7 = vmul.f32 -1.442695, %v8002_v5  ;;  %v8023_v41 = vadd.f32 %v7491_v33, %v7960_v42  ;;  %v8039_v42 = vld [vmem:[%s8451_s4] ss:$0 sm:$0xff] }
 0x296   : > { %5867 = vrcp.f32 %v3295_v22  ;;  %v8009_v4 = vpop.eup %5849 }
 0x297   : > { %5869 = vpow2.f32 %v4431_v53  ;;  %v2719_v29 = vpop.f32.mrf.mxu1  ;;  %v8016_v39 = vpop.eup %5851  ;;  %v8587_v53 = vld [vmem:[#allocation17_spill] sm:$0xff]  ;;  %v4438_v21 = vmul.f32 -1.442695, %v7997_v38  ;;  %v4444_v59 = vmul.f32 -1.442695, %v8023_v41 }
 0x298   : > { %5871 = vrcp.f32 %v3292_v48  ;;  %4650 = vmatpush3.bf16.xpose.msra.mxu1 %v3762_v46  ;;  %v3651_v48 = vmul.f32 %v5848_v12, %v8587_v53  ;;  %v5854_v22 = vpop.eup %5853  ;;  %v8042_v53 = vadd.f32 %v8039_v42, %v2706_v47  ;;  %v8057_v47 = vadd.f32 %v8039_v42, %v4947_v20 }
 0x299   : > { %5873 = vpow2.f32 %v4439_v45  ;;  %4651 = vmatprep.subr.bf16.mxu1 %v3769_v36  ;;  %v4948_v23 = vpop.f32.mrf.mxu1  ;;  %v8025_v46 = vpop.eup %5855  ;;  %v4435_v36 = vmul.f32 -1.442695, %v8006_v63  ;;  %v8067_v34 = vadd.f32 %v8039_v42, %v2719_v29 }
 0x29a   : > { %5875 = vrcp.f32 %v3290_v25  ;;  %v3650_v25 = vmul.f32 %v5846_v54, %v8588_v31  ;;  %v8033_v12 = vpop.eup %5857  ;;  %v3293_v31 = vadd.f32 1.0, %v5854_v22  ;;  %v8082_v29 = vadd.f32 %v8039_v42, %v4948_v23 }
 0x29b   : > { %5877 = vpow2.f32 %v4437_v30  ;;  %v2722_v45 = vpop.f32.mrf.mxu1  ;;  %v8031_v30 = vadd.f32 %v7491_v33, %v7878_v15  ;;  %v8044_v54 = vpop.eup %5859  ;;  %v8048_v33 = vadd.f32 %v8039_v42, %v7864_v56 }
 0x29c   : > { %5879 = vpow2.f32 %v4436_v50  ;;  %v4441_v50 = vmul.f32 -1.442695, %v8014_v62  ;;  %v3768_v15 = vpack.c.bf16 %v3651_v48, %v3650_v25 }
 0x29d   : > { %5881 = vpow2.f32 %v4440_v49  ;;  %v8050_v49 = vpop.f32.mrf.mxu1  ;;  %v4434_v56 = vmul.f32 -1.442695, %v8031_v30  ;;  %v4433_v20 = vmul.f32 -1.442695, %v8048_v33 }
 0x29e   : > { %5883 = vpow2.f32 %v4432_v14  ;;  %8589 = vst [vmem:[#allocation24_spill] sm:$0xff] %v8050_v49  ;;  %v5862_v14 = vpop.eup %5861  ;;  %v8614_v49 = vld [vmem:[#allocation32_spill] sm:$0xff] }
 0x29f   : > { %5885 = vpow2.f32 %v4438_v21  ;;  %v8060_v21 = vpop.f32.mrf.mxu1  ;;  %v8070_v35 = vmul.f32 %v5862_v14, %v7837_v1  ;;  %v8600_v14 = vld [vmem:[#allocation37_spill] sm:$0xff] }
 0x2a0   : > { %5887 = vpow2.f32 %v4443_v7  ;;  %4652 = vmatpush3.bf16.xpose.msra.mxu1 %v8592_v58  ;;  %8593 = vst [vmem:[#allocation6_spill] sm:$0xff] %v8060_v21  ;;  %v4442_v7 = vmul.f32 -1.442695, %v8042_v53  ;;  %v8611_v21 = vld [vmem:[#allocation28_spill] sm:$0xff] }
 0x2a1   : > { %v5864_v22 = vpop.eup %5863  ;;  %5889 = vpow2.f32 %v4435_v36  ;;  %4653 = vmatprep.subr.bf16.mxu1 %v3768_v15  ;;  %8595 = vst [vmem:[#allocation8_spill] sm:$0xff] %v8070_v35  ;;  %v8073_v36 = vpop.f32.mrf.mxu1  ;;  %v8603_v35 = vld [vmem:[#allocation18_spill] sm:$0xff] }
 0x2a2   : > { %v5866_v48 = vpop.eup %5865  ;;  %v8063_v25 = vmul.f32 %v5864_v22, %v7862_v52  ;;  %5891 = vpow2.f32 %v4441_v50  ;;  %8596 = vst [vmem:[#allocation7_spill] sm:$0xff] %v8073_v36  ;;  %v4447_v50 = vmul.f32 -1.442695, %v8057_v47 }
 0x2a3   : > { %v5868_v58 = vpop.eup %5867  ;;  %5893 = vrcp.f32 %v3293_v31  ;;  %v8087_v1 = vmul.f32 %v5866_v48, %v7849_v18  ;;  %v8089_v31 = vpop.f32.mrf.mxu1  ;;  %v4448_v48 = vmul.f32 -1.442695, %v8082_v29 }
 0x2a4   : > { %8594 = vst [vmem:[#allocation5_spill] sm:$0xff] %v8063_v25  ;;  %v8075_v15 = vpop.eup %5869  ;;  %v8078_v52 = vmul.f32 %v5868_v58, %v7871_v11  ;;  %5895 = vpow2.f32 %v4444_v59  ;;  %8599 = vst [vmem:[#allocation23_spill] sm:$0xff] %v8089_v31  ;;  %v4445_v11 = vmul.f32 -1.442695, %v8067_v34  ;;  %v8095_v59 = vadd.f32 %v8039_v42, %v2722_v45  ;;  %v8604_v25 = vld [vmem:[#allocation11_spill] sm:$0xff] }
 0x2a5   : > { %v8084_v22 = vpop.eup %5871  ;;  %8598 = vst [vmem:[#allocation22_spill] sm:$0xff] %v8087_v1  ;;  %5897 = vpow2.f32 %v4434_v56  ;;  %v8099_v57 = vpop.f32.mrf.mxu1 }
 0x2a6   : > { %8597 = vst [vmem:[#allocation25_spill] sm:$0xff] %v8078_v52  ;;  %v5874_v9 = vpop.eup %5873  ;;  %5899 = vpow2.f32 %v4442_v7  ;;  %v8601_v7 = vld [vmem:[#allocation36_spill] sm:$0xff]  ;;  %v4446_v18 = vmul.f32 -1.442695, %v8095_v59 }
 0x2a7   : > { %v8097_v23 = vpop.eup %5875  ;;  %5901 = vpow2.f32 %v4433_v20  ;;  %v3308_v58 = vadd.f32 1.0, %v5874_v9  ;;  %v8602_v10 = vpack.c.bf16 %v8600_v14, %v8601_v7  ;;  %v8605_v20 = vpack.c.bf16 %v8603_v35, %v8604_v25  ;;  %v8110_v9 = vpop.f32.mrf.mxu1 }
 0x2a8   : > { %v5878_v56 = vpop.eup %5877  ;;  %5903 = vpow2.f32 %v4447_v50  ;;  %8606 = vst [vmem:[#allocation26_spill] sm:$0xff] %v8110_v9  ;;  %v3291_v14 = vadd.f32 1.0, %v8025_v46  ;;  %v8126_v46 = vadd.f32 %v8039_v42, %v7821_v6 }
 0x2a9   : > { %4654 = vmatpush3.bf16.xpose.msra.mxu1 %v8602_v10  ;;  %v5880_v44 = vpop.eup %5879  ;;  %5905 = vrcp.f32 %v3308_v58  ;;  %v3306_v45 = vadd.f32 1.0, %v5878_v56  ;;  %v8115_v52 = vpop.f32.mrf.mxu1 }
 0x2aa   : > { %4655 = vmatprep.subr.bf16.mxu1 %v8605_v20  ;;  %v5882_v0 = vpop.eup %5881  ;;  %5907 = vpow2.f32 %v4445_v11  ;;  %v3305_v56 = vadd.f32 1.0, %v5880_v44 }
 0x2ab   : > { %v8113_v50 = vpop.eup %5883  ;;  %5909 = vrcp.f32 %v3306_v45  ;;  %v3309_v1 = vadd.f32 1.0, %v5882_v0  ;;  %v8118_v35 = vpop.f32.mrf.mxu1  ;;  %v8122_v45 = vadd.f32 %v8039_v42, %v7839_v2  ;;  %v8613_v2 = vpack.c.bf16 %v8611_v21, %v8612_v43 }
 0x2ac   : > { %v5886_v10 = vpop.eup %5885  ;;  %5911 = vpow2.f32 %v4448_v48  ;;  %v8609_v48 = vld [vmem:[#allocation29_spill] sm:$0xff] }
 0x2ad   : > { %v5888_v58 = vpop.eup %5887  ;;  %5913 = vrcp.f32 %v3309_v1  ;;  %v3307_v25 = vadd.f32 1.0, %v5886_v10  ;;  %8607 = vst [vmem:[#allocation27_spill] sm:$0xff] %v8122_v45  ;;  %v4959_v0 = vpop.f32.mrf.mxu1  ;;  %v8608_v1 = vld [vmem:[#allocation30_spill] sm:$0xff]  ;;  %v4430_v6 = vmul.f32 -1.442695, %v8122_v45  ;;  %v8615_v45 = vld [vmem:[#allocation31_spill] sm:$0xff] }
 0x2ae   : > { %v5890_v7 = vpop.eup %5889  ;;  %v3312_v11 = vadd.f32 1.0, %v5888_v58  ;;  %5915 = vpow2.f32 %v4446_v18  ;;  %v8610_v10 = vpack.c.bf16 %v8608_v1, %v8609_v48  ;;  %v4429_v1 = vmul.f32 -1.442695, %v8126_v46 }
 0x2af   : > { %v5892_v20 = vpop.eup %5891  ;;  %5917 = vrcp.f32 %v3307_v25  ;;  %v3304_v18 = vadd.f32 1.0, %v5890_v7  ;;  %v2767_v25 = vpop.f32.mrf.mxu1  ;;  %v8616_v9 = vpack.c.bf16 %v8614_v49, %v8615_v45  ;;  %v3676_v45 = vmul.f32 %v8084_v22, %v7846_v8 }
 0x2b0   : > { %v5894_v32 = vpop.eup %5893  ;;  %5919 = vrcp.f32 %v3291_v14  ;;  %v3310_v44 = vadd.f32 1.0, %v5892_v20  ;;  %v8150_v49 = vadd.f32 %v8039_v42, %v2767_v25 }
 0x2b1   : > { %4656 = vmatpush3.bf16.xpose.msra.mxu1 %v8610_v10  ;;  %v5896_v58 = vpop.eup %5895  ;;  %5921 = vrcp.f32 %v3305_v56  ;;  %v4960_v20 = vpop.f32.mrf.mxu1 }
 0x2b2   : > { %4657 = vmatprep.subr.bf16.mxu1 %v8613_v2  ;;  %v5898_v55 = vpop.eup %5897  ;;  %5923 = vrcp.f32 %v3312_v11  ;;  %v3313_v14 = vadd.f32 1.0, %v5896_v58 }
 0x2b3   : > { %v5900_v31 = vpop.eup %5899  ;;  %5925 = vrcp.f32 %v3310_v44  ;;  %v3303_v56 = vadd.f32 1.0, %v5898_v55  ;;  %v2770_v10 = vpop.f32.mrf.mxu1  ;;  %v3286_v55 = vadd.f32 1.0, %v8009_v4 }
 0x2b4   : > { %v5902_v36 = vpop.eup %5901  ;;  %5927 = vrcp.f32 %v3313_v14  ;;  %v3311_v48 = vadd.f32 1.0, %v5900_v31  ;;  %v8142_v31 = vadd.f32 %v8039_v42, %v4959_v0  ;;  %v3287_v14 = vadd.f32 1.0, %v8016_v39 }
 0x2b5   : > { %v5904_v7 = vpop.eup %5903  ;;  %5929 = vrcp.f32 %v3304_v18  ;;  %v8136_v11 = vpop.f32.mrf.mxu1 }
 0x2b6   : > { %v5906_v43 = vpop.eup %5905  ;;  %5931 = vrcp.f32 %v3311_v48  ;;  %v3316_v21 = vadd.f32 1.0, %v5904_v7  ;;  %v3302_v48 = vadd.f32 1.0, %v5902_v36 }
 0x2b7   : > { %v5908_v2 = vpop.eup %5907  ;;  %5933 = vpow2.f32 %v4430_v6  ;;  %v8146_v6 = vpop.f32.mrf.mxu1  ;;  %v3692_v4 = vmul.f32 %v5906_v43, %v7968_v37  ;;  %v4457_v43 = vmul.f32 -1.442695, %v8150_v49 }
 0x2b8   : > { %v5910_v58 = vpop.eup %5909  ;;  %5935 = vpow2.f32 %v4429_v1  ;;  %v3314_v44 = vadd.f32 1.0, %v5908_v2  ;;  %v3677_v1 = vmul.f32 %v5894_v32, %v7922_v13  ;;  %v4459_v13 = vmul.f32 -1.442695, %v8142_v31 }
 0x2b9   : > { %4658 = vmatpush3.bf16.xpose.msra.mxu1 %v8616_v9  ;;  %v5912_v18 = vpop.eup %5911  ;;  %5937 = vrcp.f32 %v3303_v56  ;;  %v8156_v36 = vpop.f32.mrf.mxu1  ;;  %v8160_v32 = vadd.f32 %v8039_v42, %v4960_v20  ;;  %v3301_v20 = vadd.f32 1.0, %v8113_v50  ;;  %v3300_v50 = vadd.f32 1.0, %v8075_v15 }
 0x2ba   : > { %v5914_v7 = vpop.eup %5913  ;;  %5939 = vrcp.f32 %v3316_v21  ;;  %v3317_v2 = vadd.f32 1.0, %v5912_v18  ;;  %v3690_v21 = vmul.f32 %v5910_v58, %v7978_v28  ;;  %v3806_v28 = vld [vmem:[%s8453_s6] sm:$0x7]  ;;  %v3674_v15 = vmul.f32 %v8097_v23, %v7857_v60 }
 0x2bb   : > { %v5916_v9 = vpop.eup %5915  ;;  %v3693_v39 = vmul.f32 %v5914_v7, %v7988_v19  ;;  %5941 = vrcp.f32 %v3314_v44  ;;  %v3781_v19 = vpack.c.bf16 %v3677_v1, %v3676_v45  ;;  %v8166_v44 = vadd.f32 %v8039_v42, %v2770_v10  ;;  %v8168_v18 = vpop.f32.mrf.mxu1 }
 0x2bc   : > { %v5918_v0 = vpop.eup %5917  ;;  %5943 = vrcp.f32 %v3317_v2  ;;  %v3315_v56 = vadd.f32 1.0, %v5916_v9  ;;  %v4460_v58 = vmul.f32 -1.442695, %v8160_v32  ;;  %v6123_v1 = vmov 0  }
 0x2bd   : > { %v5920_v25 = vpop.eup %5919  ;;  %5945 = vrcp.f32 %v3302_v48  ;;  %v3691_v8 = vmul.f32 %v5918_v0, %v7997_v38  ;;  %v3789_v37 = vpack.c.bf16 %v3693_v39, %v3692_v4  ;;  %5013 = vset.pattern.permute.xlu1 %v6123_v1  ;;  %v4458_v4 = vmul.f32 -1.442695, %v8166_v44  ;;  %5014 = vset.pattern.permute.xlu0 %v6123_v1 }
 0x2be   : > { %v5922_v22 = vpop.eup %5921  ;;  %5947 = vrcp.f32 %v3315_v56  ;;  %3809 = vperm.xlu1 %5013, %v3806_v28  }
 0x2bf   : > { %v5924_v7 = vpop.eup %5923  ;;  %5949 = vrcp.f32 %v3286_v55  ;;  %4661 = vmatprep.subr.bf16.mxu0 %v3789_v37  ;;  %v3788_v48 = vpack.c.bf16 %v3691_v8, %v3690_v21  ;;  %v3675_v55 = vmul.f32 %v5920_v25, %v7926_v26 }
 0x2c0   : > { %4660 = vmatmul.mubr.bf16.vlgmr.msra.gmra.mxu1 %v7537_v61  ;;  %v5926_v38 = vpop.eup %5925  ;;  %5951 = vpow2.f32 %v4459_v13  ;;  %4662 = vmatpush3.bf16.xpose.msra.mxu0 %v3781_v19  ;;  %v8180_v9 = vmul.f32 %v5924_v7, %v8002_v5 }
 0x2c1   : > { %4695 = vmatprep.mubr.bf16.mxu1 %v7537_v61  ;;  %v5928_v10 = vpop.eup %5927  ;;  %5953 = vrcp.f32 %v3287_v14  ;;  %4663 = vmatprep.subr.bf16.mxu0 %v3788_v48  ;;  %v3689_v14 = vmul.f32 %v5922_v22, %v7982_v51  ;;  %v8192_v5 = vmul.f32 %v5926_v38, %v8014_v62  ;;  %v3780_v23 = vpack.c.bf16 %v3675_v55, %v3674_v15 }
 0x2c2   : > { %v5930_v2 = vpop.eup %5929  ;;  %v8183_v45 = vmul.f32 %v5928_v10, %v8023_v41  ;;  %5955 = vpow2.f32 %v4457_v43  ;;  %v8206_v43 = vadd.f32 %v8039_v42, %v8099_v57  ;;  %v3672_v57 = vmul.f32 %v8033_v12, %v7815_v17 }
 0x2c3   : > { %v5932_v26 = vpop.eup %5931  ;;  %5957 = vrcp.f32 %v3301_v20  ;;  %v3688_v25 = vmul.f32 %v5930_v2, %v8006_v63  ;;  %v3673_v20 = vmul.f32 %v8044_v54, %v7826_v40 }
 0x2c4   : > { %v8186_v39 = vpop.f32.mrf.mxu1  ;;  %v5934_v0 = vpop.eup %5933  ;;  %v3791_v41 = vpack.c.bf16 %v8183_v45, %v8180_v9  ;;  %v8197_v56 = vmul.f32 %v5932_v26, %v8042_v53  ;;  %5959 = vpow2.f32 %v4460_v58 }
 0x2c5   : > { %v5936_v13 = vpop.eup %5935  ;;  %5961 = vrcp.f32 %v3300_v50  ;;  %v3299_v8 = vadd.f32 1.0, %v5934_v0  ;;  %v3787_v37 = vpack.c.bf16 %v3689_v14, %v3688_v25  ;;  %v4455_v50 = vmul.f32 -1.442695, %v8206_v43 }
 0x2c6   : > { %v8200_v21 = vpop.f32.mrf.mxu1  ;;  %v5938_v60 = vpop.eup %5937  ;;  %v3790_v51 = vpack.c.bf16 %v8197_v56, %v8192_v5  ;;  %5963 = vpow2.f32 %v4458_v4  ;;  %v3298_v19 = vadd.f32 1.0, %v5936_v13 }
 0x2c7   : > { %v5940_v62 = vpop.eup %5939  ;;  %5965 = vrcp.f32 %v3299_v8  ;;  %v3687_v58 = vmul.f32 %v5938_v60, %v8031_v30  ;;  %v8231_v30 = vadd.f32 %v8039_v42, %v8115_v52 }
 0x2c8   : > { %v5942_v22 = vpop.eup %5941  ;;  %4664 = vmatpush3.bf16.xpose.msra.mxu0 %v3780_v23  ;;  %v4968_v63 = vpop.f32.mrf.mxu1  ;;  %v8211_v48 = vmul.f32 %v5940_v62, %v8057_v47  ;;  %5967 = vrcp.f32 %v3298_v19 }
 0x2c9   : > { %v5944_v53 = vpop.eup %5943  ;;  %4665 = vmatprep.subr.bf16.mxu0 %v3787_v37  ;;  %v8220_v55 = vmul.f32 %v5942_v22, %v8067_v34  ;;  %v3779_v34 = vpack.c.bf16 %v3673_v20, %v3672_v57  ;;  %5969 = vpow2.f32 %v4455_v50  ;;  %v4456_v14 = vmul.f32 -1.442695, %v8231_v30 }
 0x2ca   : > { %v5946_v7 = vpop.eup %5945  ;;  %v8214_v28 = vmul.f32 %v5944_v53, %v8082_v29  ;;  %v8233_v17 = vpop.f32.mrf.mxu1  ;;  %v8246_v22 = vadd.f32 %v8039_v42, %v8118_v35 }
 0x2cb   : > { %v5948_v38 = vpop.eup %5947  ;;  %v3686_v29 = vmul.f32 %v5946_v7, %v8048_v33 }
 0x2cc   : > { %v5950_v10 = vpop.eup %5949  ;;  %v3793_v40 = vpack.c.bf16 %v8214_v28, %v8211_v48  ;;  %v8225_v54 = vmul.f32 %v5948_v38, %v8095_v59 }
 0x2cd   : > { %v5952_v47 = vpop.eup %5951  ;;  %v3786_v4 = vpack.c.bf16 %v3687_v58, %v3686_v29  ;;  %v3670_v62 = vmul.f32 %v5950_v10, %v7909_v27  ;;  %v4454_v29 = vmul.f32 -1.442695, %v8246_v22 }
 0x2ce   : > { %v5954_v12 = vpop.eup %5953  ;;  %v3792_v1 = vpack.c.bf16 %v8225_v54, %v8220_v55  ;;  %v3328_v2 = vadd.f32 1.0, %v5952_v47  ;;  %v8617_v47 = vld [vmem:[#allocation26_spill] sm:$0xff] }
 0x2cf   : > { %v5956_v59 = vpop.eup %5955  ;;  %v3671_v13 = vmul.f32 %v5954_v12, %v7915_v16 }
 0x2d0   : > { %v5958_v26 = vpop.eup %5957  ;;  %v3326_v15 = vadd.f32 1.0, %v5956_v59  ;;  %4666 = vmatpush3.bf16.xpose.msra.mxu0 %v3779_v34  ;;  %5971 = vrcp.f32 %v3328_v2  ;;  %v8618_v59 = vld [vmem:[#allocation27_spill] sm:$0xff] }
 0x2d1   : > { %v5960_v33 = vpop.eup %5959  ;;  %4667 = vmatprep.subr.bf16.mxu0 %v3786_v4  ;;  %v3685_v8 = vmul.f32 %v5958_v26, %v7992_v3  ;;  %v3778_v27 = vpack.c.bf16 %v3671_v13, %v3670_v62  ;;  %v8254_v3 = vadd.f32 %v8039_v42, %v4968_v63  ;;  %v8270_v63 = vadd.f32 %v8039_v42, %v8186_v39  ;;  %v8619_v26 = vld [vmem:[#allocation24_spill] sm:$0xff] }
 0x2d2   : > { %v5962_v52 = vpop.eup %5961  ;;  %v3329_v25 = vadd.f32 1.0, %v5960_v33  ;;  %5973 = vrcp.f32 %v3326_v15  ;;  %v8277_v15 = vadd.f32 %v8039_v42, %v8619_v26 }
 0x2d3   : > { %v4971_v0 = vpop.f32.mrf.mxu1  ;;  %v5964_v23 = vpop.eup %5963  ;;  %v3684_v19 = vmul.f32 %v5962_v52, %v7964_v24  ;;  %v8262_v24 = vadd.f32 %v8039_v42, %v8617_v47  ;;  %v4468_v2 = vmul.f32 -1.442695, %v8254_v3  ;;  %v4467_v13 = vmul.f32 -1.442695, %v8270_v63 }
 0x2d4   : > { %v8240_v60 = vadd.f32 %v8039_v42, %v4971_v0  ;;  %5975 = vrcp.f32 %v3329_v25  ;;  %v3327_v53 = vadd.f32 1.0, %v5964_v23  ;;  %v5966_v57 = vpop.eup %5965  ;;  %v8620_v0 = vld [vmem:[#allocation7_spill] sm:$0xff] }
 0x2d5   : > { %v2815_v37 = vpop.f32.mrf.mxu1  ;;  %5977 = vpow2.f32 %v4456_v14  ;;  %v3785_v58 = vpack.c.bf16 %v3685_v8, %v3684_v19  ;;  %v5968_v34 = vpop.eup %5967  ;;  %v3683_v4 = vmul.f32 %v5966_v57, %v8618_v59  ;;  %v4453_v14 = vmul.f32 -1.442695, %v8262_v24  ;;  %v8621_v23 = vld [vmem:[#allocation23_spill] sm:$0xff] }
 0x2d6   : > { %v8249_v16 = vadd.f32 %v8039_v42, %v2815_v37  ;;  %v4471_v7 = vmul.f32 -1.442695, %v8240_v60  ;;  %5979 = vrcp.f32 %v3327_v53  ;;  %v3682_v39 = vmul.f32 %v5968_v34, %v8126_v46  ;;  %v5970_v25 = vpop.eup %5969 }
 0x2d7   : > { %v4972_v20 = vpop.f32.mrf.mxu1  ;;  %v8284_v52 = vadd.f32 %v8039_v42, %v8620_v0  ;;  %v8289_v62 = vadd.f32 %v8039_v42, %v8621_v23  ;;  %v4451_v37 = vmul.f32 -1.442695, %v8277_v15  ;;  %v8294_v53 = vadd.f32 %v8039_v42, %v8233_v17 }
 0x2d8   : > { %v8257_v38 = vadd.f32 %v8039_v42, %v4972_v20  ;;  %v4469_v35 = vmul.f32 -1.442695, %v8249_v16  ;;  %4668 = vmatpush3.bf16.xpose.msra.mxu0 %v3778_v27  ;;  %5981 = vpow2.f32 %v4471_v7  ;;  %v3784_v46 = vpack.c.bf16 %v3683_v4, %v3682_v39  ;;  %v8622_v7 = vld [vmem:[#allocation20_spill] sm:$0xff]  ;;  %v8623_v20 = vld [vmem:[#allocation21_spill] sm:$0xff]  ;;  %v8625_v39 = vld [vmem:[#allocation6_spill] sm:$0xff] }
 0x2d9   : > { %v2818_v10 = vpop.f32.mrf.mxu1  ;;  %4669 = vmatprep.subr.bf16.mxu0 %v3785_v58  ;;  %v8624_v27 = vpack.c.bf16 %v8622_v7, %v8623_v20  ;;  %v4452_v58 = vmul.f32 -1.442695, %v8284_v52  ;;  %v4450_v17 = vmul.f32 -1.442695, %v8289_v62  ;;  %v4466_v34 = vmul.f32 -1.442695, %v8294_v53 }
 0x2da   : > { %v8266_v50 = vadd.f32 %v8039_v42, %v2818_v10  ;;  %v4472_v12 = vmul.f32 -1.442695, %v8257_v38  ;;  %5983 = vpow2.f32 %v4469_v35  ;;  %v8302_v10 = vadd.f32 %v8039_v42, %v8200_v21 }
 0x2db   : > { %5985 = vpow2.f32 %v4454_v29  ;;  %v8329_v0 = vadd.f32 %v8039_v42, %v8625_v39  ;;  %v8632_v39 = vld [vmem:[#allocation12_spill] sm:$0xff] }
 0x2dc   : > { %v4470_v33 = vmul.f32 -1.442695, %v8266_v50  ;;  %5987 = vpow2.f32 %v4472_v12 }
 0x2dd   : > { %5989 = vpow2.f32 %v4468_v2  ;;  %v5972_v8 = vpop.eup %5971  ;;  %v3324_v2 = vadd.f32 1.0, %v5970_v25  ;;  %v8627_v25 = vld [vmem:[#allocation10_spill] sm:$0xff] }
 0x2de   : > { %5991 = vpow2.f32 %v4470_v33  ;;  %v8306_v47 = vmul.f32 %v5972_v8, %v8142_v31  ;;  %v4465_v31 = vmul.f32 -1.442695, %v8302_v10  ;;  %v8323_v33 = vadd.f32 %v8039_v42, %v8156_v36 }
 0x2df   : > { %v5974_v19 = vpop.eup %5973  ;;  %5993 = vpow2.f32 %v4453_v14  ;;  %v8336_v36 = vadd.f32 %v8039_v42, %v8136_v11 }
 0x2e0   : > { %4670 = vmatpush3.bf16.xpose.msra.mxu0 %v8624_v27  ;;  %5995 = vpow2.f32 %v4467_v13  ;;  %v8313_v59 = vmul.f32 %v5974_v19, %v8150_v49  ;;  %v8626_v13 = vld [vmem:[#allocation9_spill] sm:$0xff]  ;;  %v8630_v19 = vld [vmem:[#allocation8_spill] sm:$0xff]  ;;  %v4464_v27 = vmul.f32 -1.442695, %v8323_v33 }
 0x2e1   : > { %v5976_v35 = vpop.eup %5975  ;;  %4671 = vmatprep.subr.bf16.mxu0 %v3784_v46  ;;  %5997 = vpow2.f32 %v4451_v37  ;;  %v8628_v23 = vpack.c.bf16 %v8626_v13, %v8627_v25  ;;  %v8629_v46 = vld [vmem:[#allocation5_spill] sm:$0xff]  ;;  %v4463_v11 = vmul.f32 -1.442695, %v8336_v36 }
 0x2e2   : > { %v5978_v57 = vpop.eup %5977  ;;  %v8309_v29 = vmul.f32 %v5976_v35, %v8160_v32  ;;  %5999 = vpow2.f32 %v4452_v58  ;;  %v8631_v7 = vpack.c.bf16 %v8629_v46, %v8630_v19  ;;  %v8633_v13 = vld [vmem:[#allocation13_spill] sm:$0xff]  ;;  %v8636_v46 = vld [vmem:[#allocation22_spill] sm:$0xff] }
 0x2e3   : > { %v5980_v12 = vpop.eup %5979  ;;  %6001 = vpow2.f32 %v4450_v17  ;;  %v3325_v32 = vadd.f32 1.0, %v5978_v57  ;;  %v4449_v17 = vmul.f32 -1.442695, %v8329_v0  ;;  %v8634_v25 = vpack.c.bf16 %v8632_v39, %v8633_v13 }
 0x2e4   : > { %v8316_v21 = vmul.f32 %v5980_v12, %v8166_v44  ;;  %v3799_v4 = vpack.c.bf16 %v8309_v29, %v8306_v47  ;;  %6003 = vpow2.f32 %v4466_v34 }
 0x2e5   : > { %v5982_v26 = vpop.eup %5981  ;;  %6005 = vrcp.f32 %v3324_v2 }
 0x2e6   : > { %v3798_v49 = vpack.c.bf16 %v8316_v21, %v8313_v59  ;;  %v3340_v14 = vadd.f32 1.0, %v5982_v26  ;;  %6007 = vpow2.f32 %v4465_v31  ;;  %v8346_v26 = vadd.f32 %v8039_v42, %v8168_v18 }
 0x2e7   : > { %v5984_v44 = vpop.eup %5983  ;;  %6009 = vrcp.f32 %v3325_v32 }
 0x2e8   : > { %4672 = vmatpush3.bf16.xpose.msra.mxu0 %v8628_v23  ;;  %v5986_v8 = vpop.eup %5985  ;;  %v3338_v37 = vadd.f32 1.0, %v5984_v44  ;;  %6011 = vrcp.f32 %v3340_v14  ;;  %v8353_v23 = vadd.f32 %v8039_v42, %v8146_v6 }
 0x2e9   : > { %4673 = vmatprep.subr.bf16.mxu0 %v8631_v7  ;;  %v5988_v20 = vpop.eup %5987  ;;  %v3323_v31 = vadd.f32 1.0, %v5986_v8 }
 0x2ea   : > { %v5990_v35 = vpop.eup %5989  ;;  %v3341_v58 = vadd.f32 1.0, %v5988_v20  ;;  %6013 = vrcp.f32 %v3338_v37  ;;  %v8635_v37 = vld [vmem:[#allocation25_spill] sm:$0xff]  ;;  %v4462_v20 = vmul.f32 -1.442695, %v8346_v26 }
 0x2eb   : > { %v5992_v57 = vpop.eup %5991  ;;  %v3337_v32 = vadd.f32 1.0, %v5990_v35  ;;  %v8637_v19 = vpack.c.bf16 %v8635_v37, %v8636_v46 }
 0x2ec   : > { %v5994_v12 = vpop.eup %5993  ;;  %6015 = vrcp.f32 %v3341_v58  ;;  %v3339_v34 = vadd.f32 1.0, %v5992_v57  ;;  %v4461_v58 = vmul.f32 -1.442695, %v8353_v23 }
 0x2ed   : > { %v5996_v2 = vpop.eup %5995  ;;  %6017 = vpow2.f32 %v4464_v27  ;;  %v3322_v44 = vadd.f32 1.0, %v5994_v12 }
 0x2ee   : > { %6019 = vrcp.f32 %v3339_v34  ;;  %v5998_v14 = vpop.eup %5997  ;;  %v3336_v8 = vadd.f32 1.0, %v5996_v2  ;;  %v8638_v34 = vld [vmem:[#allocation14_spill] sm:$0xff]  ;;  %v8639_v2 = vld [vmem:[#allocation15_spill] sm:$0xff] }
 0x2ef   : > { %6021 = vpow2.f32 %v4449_v17  ;;  %v6000_v18 = vpop.eup %5999 }
 0x2f0   : > { %4674 = vmatpush3.bf16.xpose.msra.mxu0 %v8634_v25  ;;  %6023 = vpow2.f32 %v4463_v11  ;;  %v6002_v7 = vpop.eup %6001  ;;  %v3321_v42 = vadd.f32 1.0, %v6000_v18  ;;  %v3320_v11 = vadd.f32 1.0, %v5998_v14 }
 0x2f1   : > { %4675 = vmatprep.subr.bf16.mxu0 %v8637_v19  ;;  %6025 = vrcp.f32 %v3323_v31  ;;  %v6004_v27 = vpop.eup %6003  ;;  %v8640_v31 = vpack.c.bf16 %v8638_v34, %v8639_v2 }
 0x2f2   : > { %6027 = vrcp.f32 %v3337_v32  ;;  %v6006_v35 = vpop.eup %6005  ;;  %v3335_v17 = vadd.f32 1.0, %v6004_v27 }
 0x2f3   : > { %6029 = vrcp.f32 %v3322_v44  ;;  %v6008_v57 = vpop.eup %6007  ;;  %v3708_v14 = vmul.f32 %v6006_v35, %v8206_v43 }
 0x2f4   : > { %6031 = vrcp.f32 %v3336_v8  ;;  %v6010_v6 = vpop.eup %6009  ;;  %v3334_v32 = vadd.f32 1.0, %v6008_v57  ;;  %v3319_v57 = vadd.f32 1.0, %v6002_v7 }
 0x2f5   : > { %6033 = vpow2.f32 %v4462_v20  ;;  %v6012_v12 = vpop.eup %6011  ;;  %v3709_v44 = vmul.f32 %v6010_v6, %v8231_v30 }
 0x2f6   : > { %6035 = vpow2.f32 %v4461_v58  ;;  %v3724_v8 = vmul.f32 %v6012_v12, %v8240_v60 }
 0x2f7   : > { %v6014_v39 = vpop.eup %6013  ;;  %6037 = vrcp.f32 %v3321_v42  ;;  %v3797_v30 = vpack.c.bf16 %v3709_v44, %v3708_v14 }
 0x2f8   : > { %4676 = vmatpush3.bf16.xpose.msra.mxu0 %v8640_v31  ;;  %6039 = vrcp.f32 %v3335_v17  ;;  %v3722_v18 = vmul.f32 %v6014_v39, %v8249_v16 }
 0x2f9   : > { %v6016_v13 = vpop.eup %6015  ;;  %6041 = vrcp.f32 %v3320_v11 }
 0x2fa   : > { %v6018_v25 = vpop.eup %6017  ;;  %v3725_v37 = vmul.f32 %v6016_v13, %v8257_v38  ;;  %6043 = vrcp.f32 %v3334_v32 }
 0x2fb   : > { %v6020_v46 = vpop.eup %6019  ;;  %v3333_v6 = vadd.f32 1.0, %v6018_v25  ;;  %6045 = vrcp.f32 %v3319_v57 }
 0x2fc   : > { %v6022_v19 = vpop.eup %6021  ;;  %v3723_v20 = vmul.f32 %v6020_v46, %v8266_v50  ;;  %v3805_v27 = vpack.c.bf16 %v3725_v37, %v3724_v8 }
 0x2fd   : > { %v6024_v58 = vpop.eup %6023  ;;  %v3318_v17 = vadd.f32 1.0, %v6022_v19  ;;  %6047 = vrcp.f32 %v3333_v6 }
 0x2fe   : > { %v6026_v42 = vpop.eup %6025  ;;  %4679 = vmatprep.subr.bf16.mxu1 %v3805_v27  ;;  %v3804_v60 = vpack.c.bf16 %v3723_v20, %v3722_v18  ;;  %v3332_v35 = vadd.f32 1.0, %v6024_v58 }
 0x2ff   : > { %4678 = vmatmul.mubr.bf16.vlgmr.msra.gmra.mxu0 %v7537_v61  ;;  %v6028_v38 = vpop.eup %6027  ;;  %4680 = vmatpush3.bf16.xpose.msra.mxu1 %v3797_v30  ;;  %v3707_v16 = vmul.f32 %v6026_v42, %v8246_v22  ;;  %6049 = vrcp.f32 %v3318_v17 }
 0x300   : > { %v6030_v43 = vpop.eup %6029  ;;  %4681 = vmatprep.subr.bf16.mxu1 %v3804_v60  ;;  %v3721_v50 = vmul.f32 %v6028_v38, %v8254_v3  ;;  %6051 = vrcp.f32 %v3332_v35 }
 0x301   : > { %v6032_v12 = vpop.eup %6031  ;;  %v3706_v11 = vmul.f32 %v6030_v43, %v8262_v24 }
 0x302   : > { %v6034_v7 = vpop.eup %6033  ;;  %v3720_v34 = vmul.f32 %v6032_v12, %v8270_v63 }
 0x303   : > { %v6036_v2 = vpop.eup %6035  ;;  %v3796_v31 = vpack.c.bf16 %v3707_v16, %v3706_v11  ;;  %v3331_v32 = vadd.f32 1.0, %v6034_v7 }
 0x304   : > { %v6038_v39 = vpop.eup %6037  ;;  %v3803_v13 = vpack.c.bf16 %v3721_v50, %v3720_v34  ;;  %v3330_v8 = vadd.f32 1.0, %v6036_v2 }
 0x305   : > { %v6040_v44 = vpop.eup %6039  ;;  %v3705_v3 = vmul.f32 %v6038_v39, %v8284_v52  ;;  %6053 = vrcp.f32 %v3331_v32 }
 0x306   : > { %v6042_v25 = vpop.eup %6041  ;;  %v3719_v37 = vmul.f32 %v6040_v44, %v8294_v53  ;;  %6055 = vrcp.f32 %v3330_v8 }
 0x307   : > { %4682 = vmatpush3.bf16.xpose.msra.mxu1 %v3796_v31  ;;  %v6044_v22 = vpop.eup %6043  ;;  %v3704_v24 = vmul.f32 %v6042_v25, %v8277_v15 }
 0x308   : > { %4683 = vmatprep.subr.bf16.mxu1 %v3803_v13  ;;  %v3718_v63 = vmul.f32 %v6044_v22, %v8302_v10  ;;  %v6046_v14 = vpop.eup %6045 }
 0x309   : > { %v3795_v46 = vpack.c.bf16 %v3705_v3, %v3704_v24  ;;  %v3703_v58 = vmul.f32 %v6046_v14, %v8289_v62 }
 0x30a   : > { %v3802_v19 = vpack.c.bf16 %v3719_v37, %v3718_v63  ;;  %v6048_v18 = vpop.eup %6047 }
 0x30b   : > { %v3717_v52 = vmul.f32 %v6048_v18, %v8323_v33 }
 0x30c   : > { %v6050_v20 = vpop.eup %6049 }
 0x30d   : > { %v6052_v27 = vpop.eup %6051  ;;  %v3702_v57 = vmul.f32 %v6050_v20, %v8329_v0 }
 0x30e   : > { %v3716_v53 = vmul.f32 %v6052_v27, %v8336_v36 }
 0x30f   : > { %4684 = vmatpush3.bf16.xpose.msra.mxu1 %v3795_v46  ;;  %v3794_v15 = vpack.c.bf16 %v3703_v58, %v3702_v57 }
 0x310   : > { %4685 = vmatprep.subr.bf16.mxu1 %v3802_v19  ;;  %v3801_v30 = vpack.c.bf16 %v3717_v52, %v3716_v53 }
 0x312   : > { %v6054_v42 = vpop.eup %6053 }
 0x313   : > { %v6056_v10 = vpop.eup %6055  ;;  %v3715_v6 = vmul.f32 %v6054_v42, %v8346_v26 }
 0x314   : > { %v3714_v60 = vmul.f32 %v6056_v10, %v8353_v23 }
 0x316   : > { %v3800_v38 = vpack.c.bf16 %v3715_v6, %v3714_v60 }
 0x317   : > { %4686 = vmatpush3.bf16.xpose.msra.mxu1 %v3794_v15 }
 0x318   : > { %4687 = vmatprep.subr.bf16.mxu1 %v3801_v30 }
 0x31f   : > { %4688 = vmatpush3.bf16.xpose.msra.mxu1 %v3793_v40 }
 0x320   : > { %4689 = vmatprep.subr.bf16.mxu1 %v3800_v38 }
 0x327   : > { %4690 = vmatpush3.bf16.xpose.msra.mxu1 %v3792_v1 }
 0x328   : > { %4691 = vmatprep.subr.bf16.mxu1 %v3799_v4 }
 0x32f   : > { %4692 = vmatpush3.bf16.xpose.msra.mxu1 %v3791_v41 }
 0x330   : > { %4693 = vmatprep.subr.bf16.mxu1 %v3798_v49 }
 0x337   : > { %4694 = vmatpush3.bf16.xpose.msra.mxu1 %v3790_v51 }
 0x339   : > { %v3810_v28 = vpop.permute.xlu1 %3809 }
 0x33e   : > { %4696 = vmatmul.mubr.bf16.vlgmr.msra.gmra.mxu1 %v7537_v61 }
 0x340   : > { %v3910_v48 = vpop.f32.mrf.mxu0 }
 0x341   : > { %v3911_v40 = vadd.f32 %v3910_v48, %v3810_v28 }
 0x342   : > { %v3912_v55 = vpop.f32.mrf.mxu0 }
 0x343   : > { %v3913_v54 = vadd.f32 %v3912_v55, %v3810_v28 }
 0x344   : > { %v3914_v1 = vpop.f32.mrf.mxu0 }
 0x345   : > { %v4048_v9 = vcombine.low %v3911_v40, %v3913_v54 }
 0x346   : > { %v3915_v45 = vpop.f32.mrf.mxu0 }
 0x347   : > { %4056 = vst [vmem:[%s284_s14] sm:$0x77] %v4048_v9 }
 0x380   : > { %v3951_v41 = vpop.f32.mrf.mxu1 }
 0x381   : > { %v3952_v62 = vadd.f32 %v3951_v41, %v3810_v28 }
 0x382   : > { %v3953_v47 = vpop.f32.mrf.mxu1 }
 0x383   : > { %v3954_v5 = vadd.f32 %v3953_v47, %v3810_v28 }
 0x384   : > { %v3955_v56 = vpop.f32.mrf.mxu1 }
 0x385   : > { %v4049_v61 = vcombine.low %v3952_v62, %v3954_v5 }
 0x386   : > { %v3956_v51 = vpop.f32.mrf.mxu1 }
 0x387   : > { %4057 = vst [vmem:[%s284_s14 + $0x8] sm:$0x77] %v4049_v61 }
 0x3bf   : > { %v3992_v29 = vpop.f32.mrf.mxu0 }
 0x3c0   : > { %v3993_v21 = vadd.f32 %v3992_v29, %v3810_v28 }
 0x3c1   : > { %v3994_v59 = vpop.f32.mrf.mxu0 }
 0x3c2   : > { %v3995_v4 = vadd.f32 %v3994_v59, %v3810_v28 }
 0x3c3   : > { %v3996_v33 = vpop.f32.mrf.mxu0 }
 0x3c4   : > { %v4050_v49 = vcombine.low %v3993_v21, %v3995_v4 }
 0x3c5   : > { %v3997_v0 = vpop.f32.mrf.mxu0 }
 0x3c6   : > { %4058 = vst [vmem:[%s284_s14 + $0x10] sm:$0x77] %v4050_v49 }
 0x3fe   : > { %v4033_v36 = vpop.f32.mrf.mxu1 }
 0x3ff   : > { %v4034_v23 = vadd.f32 %v4033_v36, %v3810_v28 }
 0x400   : > { %v4035_v26 = vpop.f32.mrf.mxu1 }
 0x401   : > { %v4036_v17 = vadd.f32 %v4035_v26, %v3810_v28 }
 0x402   : > { %v4037_v43 = vpop.f32.mrf.mxu1 }
 0x403   : > { %v4051_v35 = vcombine.low %v4034_v23, %v4036_v17 }
 0x404   : > { %v4038_v12 = vpop.f32.mrf.mxu1 }
 0x405   : > { %4059 = vst [vmem:[%s284_s14 + $0x18] sm:$0x77] %v4051_v35 }
 0x406   : > { %6074 = shalt.err (!%p6071_p3)
}
 0x407   : > { %s6075_s8 = scalar_lea.hbm %s8410_s19, 512  ;;  %s6079_s13 = scalar_lea.hbm %s8454_s7, 1024 }
 0x408   : > { %p6076_p4 = scmp.ne.s32.totalorder %s8410_s19, %s6075_s8  ;;  %p6080_p9 = scmp.lt.s32.totalorder %s8410_s19, %s8454_s7 }
 0x409   : > { %p6081_p10 = scmp.lt.s32.totalorder %s6079_s13, %s6075_s8 }
 0x40a   : > { %p6077_p7 = pnand %p6076_p4, %p6203_p5 }
 0x40b   : > { %p6082_p11 = por %p6081_p10, %p6080_p9 }
 0x40c   : > { %p6078_p8 = pneg %p6077_p7 }
 0x40e   : > { %p6083_p12 = pnand %p6082_p11, %p6078_p8 }
 0x410   : > { %6086 = shalt.err (!%p6083_p12)
}
 0x411   : > { %4973 = dma.vmem_to_hbm [thread:$0]  (%p6203_p5), %s4076_s16, 512, %s8410_s19, %s4061_s20  }
 0x412 PF: > { %p4979_p13 = scmp.ge.s32.totalorder %s6121_s27, 2  ;;  %s4087_s17 = sand.u32 1, %s6109_s24  }
 0x413   : > { %s4088_s18 = scalar_lea.sflag [#allocation3], %s4087_s17 }
 0x414   : > { %p4976_p0 = pnand %p4979_p13, %p6207_p6 }
 0x416   : > { %p4977_p1 = pneg %p4976_p0 }
 0x418   : > { %6104 = dma.done.wait (%p4977_p1), %s4088_s18, 512  }
 0x419   : > { %6106 = vsyncadd (%p4977_p1), %s4088_s18, 4294966784  ;;  %p17_p2 = scmp.ge.s32.totalorder %s6190_s30, 4   ;;  %s8641_s24 = smov %s6113_s25 }
 0x41a   : > { %s8642_s25 = smov %s6117_s26  ;;  %s8643_s26 = smov %s6201_s10 }
 0x41b   : > { %s8644_s27 = smov %s6190_s30  ;;  %19 = sbr.rel (!%p17_p2) target bundleno = 3 (0x3), region = 83 }
 0x420   :  { %4093 = vsyncpa [#allocation3], 1 }
 0x421   :  { %4095 = vsyncpa [#allocation3 + $0x1], 1 }

</bundles_post_ra>
